<compile_context>
chip_gen: v7x
topology: tpu7x:2x2x1
jax: 0.10.0
libtpu: 0.0.40
codegen_flags: <defaults>
</compile_context>

<pallas_src>
import numpy as np

import jax
import jax.numpy as jnp
from jax import lax
from jax.experimental import pallas as pl
from jax.experimental.pallas import tpu as pltpu

BN_EPS = 1e-5


# ----------------------------- host-side weight prep -------------------------

def _fold_bn_np(bn):
    gamma = np.asarray(bn["gamma"], np.float32)
    beta = np.asarray(bn["beta"], np.float32)
    mean = np.asarray(bn["mean"], np.float32)
    var = np.asarray(bn["var"], np.float32)
    scale = gamma / np.sqrt(var + BN_EPS)
    return scale, beta - mean * scale


def _conv3x3_slabs(w_hwio, bn, w_in, w_out, stride):
    """BN-folded, width-unrolled 3x3 conv weights, ky taps stacked along K.

    Returns (3*w_in*cin, w_out*cout) bf16 slab + (1, w_out*cout) f32 bias.
    K-block ky corresponds to input image row (stride*r + ky - 1) of output row r.
    """
    w = np.asarray(w_hwio, np.float32)                 # (3, 3, cin, cout)
    scale, bias = _fold_bn_np(bn)
    w = w * scale[None, None, None, :]
    _, _, cin, cout = w.shape
    big = np.zeros((3, w_in * cin, w_out * cout), np.float32)
    for ky in range(3):
        for kx in range(3):
            for wo in range(w_out):
                wi = stride * wo + kx - 1              # padding = 1
                if 0 <= wi < w_in:
                    big[ky, wi * cin:(wi + 1) * cin,
                        wo * cout:(wo + 1) * cout] = w[ky, kx]
    big = big.reshape(3 * w_in * cin, w_out * cout)    # stack ky taps along K
    bias_big = np.tile(bias, w_out)[None, :]
    return jnp.asarray(big, jnp.bfloat16), jnp.asarray(bias_big, jnp.float32)


def _conv1x1_upsample_slabs(w_hwio, bn, w_lo, factor):
    """1x1 conv + BN + nearest column-upsample folded into one weight slab."""
    w = np.asarray(w_hwio, np.float32)[0, 0]           # (cin, cout)
    scale, bias = _fold_bn_np(bn)
    w = w * scale[None, :]
    cin, cout = w.shape
    w_hi = w_lo * factor
    big = np.zeros((w_lo * cin, w_hi * cout), np.float32)
    for wl in range(w_lo):
        for d in range(factor):
            wh = factor * wl + d
            big[wl * cin:(wl + 1) * cin, wh * cout:(wh + 1) * cout] = w
    bias_big = np.tile(bias, w_hi)[None, :]
    return jnp.asarray(big, jnp.bfloat16), jnp.asarray(bias_big, jnp.float32)


def _make_fuse_row_ops(batch, h0, h1):
    """Exact 0/1 row-pick / row-replication matrices (block-diagonal over batch)."""
    m0, m1 = batch * h0, batch * h1
    s_even = np.zeros((m1, m0), np.float32)            # picks image rows 2r
    s_odd = np.zeros((m1, m0), np.float32)             # picks image rows 2r+1
    r_up = np.zeros((m0, m1), np.float32)              # nearest 2x row replication
    for n in range(batch):
        for r in range(h1):
            q = n * h1 + r
            s_even[q, n * h0 + 2 * r] = 1.0
            s_odd[q, n * h0 + 2 * r + 1] = 1.0
        for h in range(h0):
            r_up[n * h0 + h, n * h1 + h // 2] = 1.0
    return (jnp.asarray(s_even, jnp.bfloat16),
            jnp.asarray(s_odd, jnp.bfloat16),
            jnp.asarray(r_up, jnp.float32))


def prepare_params(params, spatial, batch):
    """Convert PyTorch-style conv/BN params into the kernel's fused slab form."""
    (H0, W0), (H1, W1) = spatial
    widths = [W0, W1]
    prep = {"branch0": [], "branch1": []}
    for b in (0, 1):
        Wb = widths[b]
        for blk in params["branches"][b]:
            w1, b1 = _conv3x3_slabs(blk["conv1"], blk["bn1"], Wb, Wb, 1)
            w2, b2 = _conv3x3_slabs(blk["conv2"], blk["bn2"], Wb, Wb, 1)
            prep[f"branch{b}"].append(dict(w1=w1, b1=b1, w2=w2, b2=b2))
    p01 = params["fuse"][(0, 1)]
    prep["f01w"], prep["f01b"] = _conv1x1_upsample_slabs(p01["conv"], p01["bn"], W1, 2)
    p10 = params["fuse"][(1, 0)][0]                    # single stride-2 step
    prep["f10w"], prep["f10b"] = _conv3x3_slabs(p10["conv"], p10["bn"], W0, W1, 2)
    prep["s_even"], prep["s_odd"], prep["r_up"] = _make_fuse_row_ops(batch, H0, H1)
    return prep


# ----------------------------- fused module forward --------------------------

def hr_module_forward(x0_nchw, x1_nchw, prep):
    N, C0, H0, W0 = x0_nchw.shape
    N1, C1, H1, W1 = x1_nchw.shape
    assert N1 == N and H0 == 2 * H1 and W0 == 2 * W1
    L0, L1 = W0 * C0, W1 * C1
    M0, M1 = N * H0, N * H1
    # (8,128) tiling constraints for the whole-batch blocks.
    assert M0 % 8 == 0 and M1 % 8 == 0 and L0 % 128 == 0 and L1 % 128 == 0
    # TODO(synk): pad M / W*C for configs that do not satisfy the (8,128) tiling.

    # layout plumbing: NCHW -> lane-dense (N*H, W*C) slabs (batch folded into M)
    x0 = jnp.transpose(x0_nchw, (0, 2, 3, 1)).reshape(M0, L0)
    x1 = jnp.transpose(x1_nchw, (0, 2, 3, 1)).reshape(M1, L1)

    nblk0 = len(prep["branch0"])
    nblk1 = len(prep["branch1"])

    w_args, w_specs = [], []

    def add_w(a):
        w_args.append(a)
        w_specs.append(pl.BlockSpec(a.shape, lambda i, nd=a.ndim: (0,) * nd))

    for blk in prep["branch0"]:
        for name in ("w1", "b1", "w2", "b2"):
            add_w(blk[name])
    for blk in prep["branch1"]:
        for name in ("w1", "b1", "w2", "b2"):
            add_w(blk[name])
    for name in ("f01w", "f01b", "f10w", "f10b", "s_even", "s_odd", "r_up"):
        add_w(prep[name])

    def conv3x3_s1(x_f32, w_ref, b_ref, mask_top, mask_bot, *, relu, residual=None):
        """3x3 stride-1 pad-1 conv + folded BN [+ residual] [+ ReLU].

        x_f32: (M, L_in) f32 slab (batch stacked along rows).
        w_ref: (3*L_in, L_out) bf16 K-stacked slab; b_ref: (1, L_out) f32 bias.
        Row shifts are XLU rolls; per-sample boundary rows are zeroed by masks.
        """
        m = x_f32.shape[0]
        up = pltpu.roll(x_f32, shift=1, axis=0) * mask_top         # row r-1 (ky=0)
        dn = pltpu.roll(x_f32, shift=m - 1, axis=0) * mask_bot     # row r+1 (ky=2)
        x3 = jnp.concatenate([up, x_f32, dn], axis=-1).astype(jnp.bfloat16)
        y = jnp.dot(x3, w_ref[...], preferred_element_type=jnp.float32) + b_ref[...]
        if residual is not None:
            y = y + residual
        if relu:
            y = jnp.maximum(y, 0.0)
        return y

    def kernel(*refs):
        x0_ref, x1_ref = refs[0], refs[1]
        o0_ref, o1_ref = refs[-2], refs[-1]
        w = list(refs[2:-2])
        idx = 0

        def row_masks(m, h):
            r = lax.broadcasted_iota(jnp.int32, (m, 1), 0) % h
            top = (r != 0).astype(jnp.float32)        # zero rows reading row -1
            bot = (r != h - 1).astype(jnp.float32)    # zero rows reading row h
            return top, bot

        mt0, mb0 = row_masks(M0, H0)
        mt1, mb1 = row_masks(M1, H1)

        # ---- branch 0: chain of BasicBlocks (intermediates never leave VMEM) ----
        y0 = x0_ref[...]                                           # (M0, L0) f32
        for _ in range(nblk0):
            w1, b1, w2, b2 = w[idx:idx + 4]; idx += 4
            xin = y0
            h = conv3x3_s1(xin, w1, b1, mt0, mb0, relu=True)
            y0 = conv3x3_s1(h, w2, b2, mt0, mb0, relu=True, residual=xin)

        # ---- branch 1 ----
        y1 = x1_ref[...]                                           # (M1, L1) f32
        for _ in range(nblk1):
            w1, b1, w2, b2 = w[idx:idx + 4]; idx += 4
            xin = y1
            h = conv3x3_s1(xin, w1, b1, mt1, mb1, relu=True)
            y1 = conv3x3_s1(h, w2, b2, mt1, mb1, relu=True, residual=xin)

        f01w, f01b, f10w, f10b, s_even, s_odd, r_up = w[idx:idx + 7]

        # ---- fuse output 0: relu(y0 + upsample2x(bn(1x1conv(y1)))) ----
        t_lo = jnp.dot(y1.astype(jnp.bfloat16), f01w[...],
                       preferred_element_type=jnp.float32) + f01b[...]  # (M1, L0)
        t_hi = jnp.dot(r_up[...], t_lo,
                       preferred_element_type=jnp.float32)              # (M0, L0), exact
        o0_ref[...] = jnp.maximum(y0 + t_hi, 0.0).astype(o0_ref.dtype)

        # ---- fuse output 1: relu(bn(3x3 stride-2 conv(y0)) + y1) ----
        y0b = y0.astype(jnp.bfloat16)
        even = jnp.dot(s_even[...], y0b, preferred_element_type=jnp.float32)  # rows 2r
        odd = jnp.dot(s_odd[...], y0b, preferred_element_type=jnp.float32)    # rows 2r+1
        prev = pltpu.roll(odd, shift=1, axis=0) * mt1                         # rows 2r-1
        x3 = jnp.concatenate([prev, even, odd], axis=-1).astype(jnp.bfloat16)
        d = jnp.dot(x3, f10w[...], preferred_element_type=jnp.float32) + f10b[...]
        o1_ref[...] = jnp.maximum(d + y1, 0.0).astype(o1_ref.dtype)

    out0, out1 = pl.pallas_call(
        kernel,
        out_shape=(jax.ShapeDtypeStruct((M0, L0), x0.dtype),
                   jax.ShapeDtypeStruct((M1, L1), x1.dtype)),
        grid=(1,),                                   # whole batch in one step
        in_specs=[pl.BlockSpec((M0, L0), lambda i: (0, 0)),
                  pl.BlockSpec((M1, L1), lambda i: (0, 0))] + w_specs,
        out_specs=(pl.BlockSpec((M0, L0), lambda i: (0, 0)),
                   pl.BlockSpec((M1, L1), lambda i: (0, 0))),
        compiler_params=pltpu.CompilerParams(dimension_semantics=("arbitrary",)),
    )(x0, x1, *w_args)

    out0 = jnp.transpose(out0.reshape(N, H0, W0, C0), (0, 3, 1, 2))
    out1 = jnp.transpose(out1.reshape(N, H1, W1, C1), (0, 3, 1, 2))
    return out0, out1


# ----------------------------- parameters ------------------------------------

def init_conv(key, k, cin, cout):
    return jax.random.normal(key, (k, k, cin, cout), jnp.float32) * (1.0 / (k * k * cin) ** 0.5)


def init_bn(key, c):
    k1, k2, k3, k4 = jax.random.split(key, 4)
    return dict(
        gamma=1.0 + 0.1 * jax.random.normal(k1, (c,), jnp.float32),
        beta=0.1 * jax.random.normal(k2, (c,), jnp.float32),
        mean=0.1 * jax.random.normal(k3, (c,), jnp.float32),
        var=jax.random.uniform(k4, (c,), jnp.float32, minval=0.5, maxval=1.5),
    )


def make_params(key, num_branches, num_blocks, channels):
    keys = iter(jax.random.split(key, 256))
    params = {"branches": [], "fuse": {}}
    for b in range(num_branches):
        c = channels[b]
        blocks = []
        for _ in range(num_blocks[b]):
            blocks.append({
                "conv1": init_conv(next(keys), 3, c, c), "bn1": init_bn(next(keys), c),
                "conv2": init_conv(next(keys), 3, c, c), "bn2": init_bn(next(keys), c),
            })
        params["branches"].append(blocks)
    if num_branches > 1:
        for i in range(num_branches):
            for j in range(num_branches):
                if j > i:
                    params["fuse"][(i, j)] = {
                        "conv": init_conv(next(keys), 1, channels[j], channels[i]),
                        "bn": init_bn(next(keys), channels[i]),
                    }
                elif j < i:
                    steps, cin = [], channels[j]
                    for k in range(i - j):
                        cout = channels[i] if k == i - j - 1 else channels[j]
                        steps.append({"conv": init_conv(next(keys), 3, cin, cout),
                                      "bn": init_bn(next(keys), cout)})
                        cin = cout
                    params["fuse"][(i, j)] = steps
    return params


# ----------------------------- pure-JAX reference ----------------------------

def _conv_bn_ref(x, w_hwio, bn, stride, pad, relu=False, residual=None):
    y = lax.conv_general_dilated(
        x, w_hwio, window_strides=(stride, stride),
        padding=[(pad, pad), (pad, pad)],
        dimension_numbers=("NHWC", "HWIO", "NHWC"))
    scale = bn["gamma"] / jnp.sqrt(bn["var"] + BN_EPS)
    y = y * scale + (bn["beta"] - bn["mean"] * scale)
    if residual is not None:
        y = y + residual
    if relu:
        y = jnp.maximum(y, 0.0)
    return y


def hr_module_ref(x0_nhwc, x1_nhwc, params):
    def basic(x, blk):
        h = _conv_bn_ref(x, blk["conv1"], blk["bn1"], 1, 1, relu=True)
        return _conv_bn_ref(h, blk["conv2"], blk["bn2"], 1, 1, relu=True, residual=x)

    y0, y1 = x0_nhwc, x1_nhwc
    for blk in params["branches"][0]:
        y0 = basic(y0, blk)
    for blk in params["branches"][1]:
        y1 = basic(y1, blk)

    p01 = params["fuse"][(0, 1)]
    t = _conv_bn_ref(y1, p01["conv"], p01["bn"], 1, 0)
    t = jnp.repeat(jnp.repeat(t, 2, axis=1), 2, axis=2)      # nearest 2x upsample
    out0 = jnp.maximum(y0 + t, 0.0)

    d = y0
    steps = params["fuse"][(1, 0)]
    for k, p in enumerate(steps):
        d = _conv_bn_ref(d, p["conv"], p["bn"], 2, 1, relu=(k < len(steps) - 1))
    out1 = jnp.maximum(d + y1, 0.0)
    return out0, out1


# ----------------------------- main -------------------------------------------

if __name__ == "__main__":
    key = jax.random.PRNGKey(0)
    kx0, kx1, kp = jax.random.split(key, 3)

    num_branches = 2
    num_blocks = [1, 1]
    channels = [16, 32]          # num_inchannels == num_channels * BasicBlock.expansion
    N, H0, W0 = 2, 16, 16
    H1, W1 = H0 // 2, W0 // 2

    # PyTorch-style NCHW inputs
    x0_nchw = jax.random.normal(kx0, (N, channels[0], H0, W0), jnp.float32)
    x1_nchw = jax.random.normal(kx1, (N, channels[1], H1, W1), jnp.float32)

    params = make_params(kp, num_branches, num_blocks, channels)
    prep = prepare_params(params, ((H0, W0), (H1, W1)), N)

    fwd = jax.jit(hr_module_forward)
    out0, out1 = fwd(x0_nchw, x1_nchw, prep)
    out0 = jax.block_until_ready(out0)
    out1 = jax.block_until_ready(out1)

    assert out0.shape == (N, channels[0], H0, W0)
    assert out1.shape == (N, channels[1], H1, W1)
    assert bool(jnp.all(jnp.isfinite(out0))) and bool(jnp.all(jnp.isfinite(out1)))

    # Correctness check against a pure-JAX f32 reference (kernel uses bf16 matmul
    # inputs with f32 accumulation -> small, bounded numeric drift).
    r0, r1 = hr_module_ref(jnp.transpose(x0_nchw, (0, 2, 3, 1)),
                           jnp.transpose(x1_nchw, (0, 2, 3, 1)), params)
    r0 = jnp.transpose(r0, (0, 3, 1, 2))
    r1 = jnp.transpose(r1, (0, 3, 1, 2))
    err = max(float(jnp.max(jnp.abs(out0 - r0))), float(jnp.max(jnp.abs(out1 - r1))))
    assert err < 0.3, f"max abs error vs reference too large: {err}"

    print("KERNEL_OK")
</pallas_src>

<mosaic_0001>
module attributes {stable_mosaic.version = 11 : i64} {
  func.func @kernel(%arg0: i32, %arg1: memref<32x256xf32, #tpu.memory_space<vmem>>, %arg2: memref<16x256xf32, #tpu.memory_space<vmem>>, %arg3: memref<768x256xbf16, #tpu.memory_space<vmem>>, %arg4: memref<1x256xf32, #tpu.memory_space<vmem>>, %arg5: memref<768x256xbf16, #tpu.memory_space<vmem>>, %arg6: memref<1x256xf32, #tpu.memory_space<vmem>>, %arg7: memref<768x256xbf16, #tpu.memory_space<vmem>>, %arg8: memref<1x256xf32, #tpu.memory_space<vmem>>, %arg9: memref<768x256xbf16, #tpu.memory_space<vmem>>, %arg10: memref<1x256xf32, #tpu.memory_space<vmem>>, %arg11: memref<256x256xbf16, #tpu.memory_space<vmem>>, %arg12: memref<1x256xf32, #tpu.memory_space<vmem>>, %arg13: memref<768x256xbf16, #tpu.memory_space<vmem>>, %arg14: memref<1x256xf32, #tpu.memory_space<vmem>>, %arg15: memref<16x32xbf16, #tpu.memory_space<vmem>>, %arg16: memref<16x32xbf16, #tpu.memory_space<vmem>>, %arg17: memref<32x16xf32, #tpu.memory_space<vmem>>, %arg18: memref<32x256xf32, #tpu.memory_space<vmem>>, %arg19: memref<16x256xf32, #tpu.memory_space<vmem>>) attributes {dimension_semantics = [#tpu.dimension_semantics<arbitrary>], iteration_bounds = array<i64: 1>, scalar_prefetch = 0 : i64, scratch_operands = 0 : i64, tpu.core_type = #tpu.core_type<tc>, window_params = [{pipeline_mode = #tpu.pipeline_mode<synchronous>, transform_indices = @transform_0, window_bounds = array<i64: 32, 256>}, {pipeline_mode = #tpu.pipeline_mode<synchronous>, transform_indices = @transform_1, window_bounds = array<i64: 16, 256>}, {pipeline_mode = #tpu.pipeline_mode<synchronous>, transform_indices = @transform_2, window_bounds = array<i64: 768, 256>}, {pipeline_mode = #tpu.pipeline_mode<synchronous>, transform_indices = @transform_3, window_bounds = array<i64: 1, 256>}, {pipeline_mode = #tpu.pipeline_mode<synchronous>, transform_indices = @transform_4, window_bounds = array<i64: 768, 256>}, {pipeline_mode = #tpu.pipeline_mode<synchronous>, transform_indices = @transform_5, window_bounds = array<i64: 1, 256>}, {pipeline_mode = #tpu.pipeline_mode<synchronous>, transform_indices = @transform_6, window_bounds = array<i64: 768, 256>}, {pipeline_mode = #tpu.pipeline_mode<synchronous>, transform_indices = @transform_7, window_bounds = array<i64: 1, 256>}, {pipeline_mode = #tpu.pipeline_mode<synchronous>, transform_indices = @transform_8, window_bounds = array<i64: 768, 256>}, {pipeline_mode = #tpu.pipeline_mode<synchronous>, transform_indices = @transform_9, window_bounds = array<i64: 1, 256>}, {pipeline_mode = #tpu.pipeline_mode<synchronous>, transform_indices = @transform_10, window_bounds = array<i64: 256, 256>}, {pipeline_mode = #tpu.pipeline_mode<synchronous>, transform_indices = @transform_11, window_bounds = array<i64: 1, 256>}, {pipeline_mode = #tpu.pipeline_mode<synchronous>, transform_indices = @transform_12, window_bounds = array<i64: 768, 256>}, {pipeline_mode = #tpu.pipeline_mode<synchronous>, transform_indices = @transform_13, window_bounds = array<i64: 1, 256>}, {pipeline_mode = #tpu.pipeline_mode<synchronous>, transform_indices = @transform_14, window_bounds = array<i64: 16, 32>}, {pipeline_mode = #tpu.pipeline_mode<synchronous>, transform_indices = @transform_15, window_bounds = array<i64: 16, 32>}, {pipeline_mode = #tpu.pipeline_mode<synchronous>, transform_indices = @transform_16, window_bounds = array<i64: 32, 16>}, {pipeline_mode = #tpu.pipeline_mode<synchronous>, transform_indices = @transform_17, window_bounds = array<i64: 32, 256>}, {pipeline_mode = #tpu.pipeline_mode<synchronous>, transform_indices = @transform_18, window_bounds = array<i64: 16, 256>}]} {
    %0 = tpu.iota {dimensions = array<i32: 0>} : vector<32x1xi32>
    %c16_i32 = arith.constant 16 : i32
    %c0_i32 = arith.constant 0 : i32
    %1 = arith.cmpi eq, %c16_i32, %c0_i32 : i32
    %c1_i32 = arith.constant 1 : i32
    %2 = arith.select %1, %c1_i32, %c16_i32 : i32
    %3 = vector.broadcast %2 : i32 to vector<32x1xi32>
    %4 = arith.remsi %0, %3 : vector<32x1xi32>
    %c0_i32_0 = arith.constant 0 : i32
    %5 = vector.broadcast %c0_i32_0 : i32 to vector<32x1xi32>
    %6 = arith.cmpi ne, %4, %5 : vector<32x1xi32>
    %c0_i32_1 = arith.constant 0 : i32
    %7 = vector.broadcast %c0_i32_1 : i32 to vector<32x1xi32>
    %8 = arith.cmpi slt, %4, %7 : vector<32x1xi32>
    %c0_i32_2 = arith.constant 0 : i32
    %9 = arith.cmpi slt, %2, %c0_i32_2 : i32
    %10 = vector.broadcast %9 : i1 to vector<32x1xi1>
    %11 = vector.broadcast %10 : vector<32x1xi1> to vector<32x1xi1>
    %12 = arith.xori %8, %11 : vector<32x1xi1>
    %13 = arith.andi %12, %6 : vector<32x1xi1>
    %14 = vector.broadcast %2 : i32 to vector<32x1xi32>
    %15 = arith.addi %4, %14 : vector<32x1xi32>
    %16 = arith.select %13, %15, %4 : vector<32x1xi1>, vector<32x1xi32>
    %c0_i32_3 = arith.constant 0 : i32
    %17 = vector.broadcast %c0_i32_3 : i32 to vector<32x1xi32>
    %18 = arith.cmpi ne, %16, %17 : vector<32x1xi32>
    %19 = arith.extui %18 : vector<32x1xi1> to vector<32x1xi32>
    %20 = arith.sitofp %19 : vector<32x1xi32> to vector<32x1xf32>
    %c15_i32 = arith.constant 15 : i32
    %21 = vector.broadcast %c15_i32 : i32 to vector<32x1xi32>
    %22 = arith.cmpi ne, %16, %21 : vector<32x1xi32>
    %23 = arith.extui %22 : vector<32x1xi1> to vector<32x1xi32>
    %24 = arith.sitofp %23 : vector<32x1xi32> to vector<32x1xf32>
    %25 = tpu.iota {dimensions = array<i32: 0>} : vector<16x1xi32>
    %c8_i32 = arith.constant 8 : i32
    %c0_i32_4 = arith.constant 0 : i32
    %26 = arith.cmpi eq, %c8_i32, %c0_i32_4 : i32
    %c1_i32_5 = arith.constant 1 : i32
    %27 = arith.select %26, %c1_i32_5, %c8_i32 : i32
    %28 = vector.broadcast %27 : i32 to vector<16x1xi32>
    %29 = arith.remsi %25, %28 : vector<16x1xi32>
    %c0_i32_6 = arith.constant 0 : i32
    %30 = vector.broadcast %c0_i32_6 : i32 to vector<16x1xi32>
    %31 = arith.cmpi ne, %29, %30 : vector<16x1xi32>
    %c0_i32_7 = arith.constant 0 : i32
    %32 = vector.broadcast %c0_i32_7 : i32 to vector<16x1xi32>
    %33 = arith.cmpi slt, %29, %32 : vector<16x1xi32>
    %c0_i32_8 = arith.constant 0 : i32
    %34 = arith.cmpi slt, %27, %c0_i32_8 : i32
    %35 = vector.broadcast %34 : i1 to vector<16x1xi1>
    %36 = vector.broadcast %35 : vector<16x1xi1> to vector<16x1xi1>
    %37 = arith.xori %33, %36 : vector<16x1xi1>
    %38 = arith.andi %37, %31 : vector<16x1xi1>
    %39 = vector.broadcast %27 : i32 to vector<16x1xi32>
    %40 = arith.addi %29, %39 : vector<16x1xi32>
    %41 = arith.select %38, %40, %29 : vector<16x1xi1>, vector<16x1xi32>
    %c0_i32_9 = arith.constant 0 : i32
    %42 = vector.broadcast %c0_i32_9 : i32 to vector<16x1xi32>
    %43 = arith.cmpi ne, %41, %42 : vector<16x1xi32>
    %44 = arith.extui %43 : vector<16x1xi1> to vector<16x1xi32>
    %45 = arith.sitofp %44 : vector<16x1xi32> to vector<16x1xf32>
    %c7_i32 = arith.constant 7 : i32
    %46 = vector.broadcast %c7_i32 : i32 to vector<16x1xi32>
    %47 = arith.cmpi ne, %41, %46 : vector<16x1xi32>
    %48 = arith.extui %47 : vector<16x1xi1> to vector<16x1xi32>
    %49 = arith.sitofp %48 : vector<16x1xi32> to vector<16x1xf32>
    %c0 = arith.constant 0 : index
    %c0_10 = arith.constant 0 : index
    %50 = vector.load %arg1[%c0, %c0_10] : memref<32x256xf32, #tpu.memory_space<vmem>>, vector<32x256xf32>
    %c1_i32_11 = arith.constant 1 : i32
    %51 = tpu.dynamic_rotate %50 by %c1_i32_11 dim 0 : vector<32x256xf32>, i32 -> vector<32x256xf32>
    %52 = vector.broadcast %20 : vector<32x1xf32> to vector<32x256xf32>
    %53 = arith.mulf %51, %52 : vector<32x256xf32>
    %c31_i32 = arith.constant 31 : i32
    %54 = tpu.dynamic_rotate %50 by %c31_i32 dim 0 : vector<32x256xf32>, i32 -> vector<32x256xf32>
    %55 = vector.broadcast %24 : vector<32x1xf32> to vector<32x256xf32>
    %56 = arith.mulf %54, %55 : vector<32x256xf32>
    %57 = tpu.concatenate %53, %50, %56 in 1 : vector<32x256xf32>, vector<32x256xf32>, vector<32x256xf32> -> vector<32x768xf32>
    %58 = arith.truncf %57 : vector<32x768xf32> to vector<32x768xbf16>
    %c0_12 = arith.constant 0 : index
    %c0_13 = arith.constant 0 : index
    %59 = vector.load %arg3[%c0_12, %c0_13] : memref<768x256xbf16, #tpu.memory_space<vmem>>, vector<768x256xbf16>
    %cst = arith.constant dense<0.000000e+00> : vector<32x256xf32>
    %60 = tpu.matmul %58, %59, %cst {dimension_numbers = #tpu.dot_dimension_numbers<[1], [0], [0], [1], [0, 0, 1, 1], [], []>} : vector<32x768xbf16>, vector<768x256xbf16>, vector<32x256xf32> -> vector<32x256xf32>
    %c0_14 = arith.constant 0 : index
    %c0_15 = arith.constant 0 : index
    %61 = vector.load %arg4[%c0_14, %c0_15] : memref<1x256xf32, #tpu.memory_space<vmem>>, vector<1x256xf32>
    %62 = vector.broadcast %61 : vector<1x256xf32> to vector<32x256xf32>
    %63 = arith.addf %60, %62 : vector<32x256xf32>
    %cst_16 = arith.constant 0.000000e+00 : f32
    %64 = vector.broadcast %cst_16 : f32 to vector<32x256xf32>
    %65 = arith.maximumf %63, %64 : vector<32x256xf32>
    %c1_i32_17 = arith.constant 1 : i32
    %66 = tpu.dynamic_rotate %65 by %c1_i32_17 dim 0 : vector<32x256xf32>, i32 -> vector<32x256xf32>
    %67 = vector.broadcast %20 : vector<32x1xf32> to vector<32x256xf32>
    %68 = arith.mulf %66, %67 : vector<32x256xf32>
    %c31_i32_18 = arith.constant 31 : i32
    %69 = tpu.dynamic_rotate %65 by %c31_i32_18 dim 0 : vector<32x256xf32>, i32 -> vector<32x256xf32>
    %70 = vector.broadcast %24 : vector<32x1xf32> to vector<32x256xf32>
    %71 = arith.mulf %69, %70 : vector<32x256xf32>
    %72 = tpu.concatenate %68, %65, %71 in 1 : vector<32x256xf32>, vector<32x256xf32>, vector<32x256xf32> -> vector<32x768xf32>
    %73 = arith.truncf %72 : vector<32x768xf32> to vector<32x768xbf16>
    %c0_19 = arith.constant 0 : index
    %c0_20 = arith.constant 0 : index
    %74 = vector.load %arg5[%c0_19, %c0_20] : memref<768x256xbf16, #tpu.memory_space<vmem>>, vector<768x256xbf16>
    %cst_21 = arith.constant dense<0.000000e+00> : vector<32x256xf32>
    %75 = tpu.matmul %73, %74, %cst_21 {dimension_numbers = #tpu.dot_dimension_numbers<[1], [0], [0], [1], [0, 0, 1, 1], [], []>} : vector<32x768xbf16>, vector<768x256xbf16>, vector<32x256xf32> -> vector<32x256xf32>
    %c0_22 = arith.constant 0 : index
    %c0_23 = arith.constant 0 : index
    %76 = vector.load %arg6[%c0_22, %c0_23] : memref<1x256xf32, #tpu.memory_space<vmem>>, vector<1x256xf32>
    %77 = vector.broadcast %76 : vector<1x256xf32> to vector<32x256xf32>
    %78 = arith.addf %75, %77 : vector<32x256xf32>
    %79 = arith.addf %78, %50 : vector<32x256xf32>
    %cst_24 = arith.constant 0.000000e+00 : f32
    %80 = vector.broadcast %cst_24 : f32 to vector<32x256xf32>
    %81 = arith.maximumf %79, %80 : vector<32x256xf32>
    %c0_25 = arith.constant 0 : index
    %c0_26 = arith.constant 0 : index
    %82 = vector.load %arg2[%c0_25, %c0_26] : memref<16x256xf32, #tpu.memory_space<vmem>>, vector<16x256xf32>
    %c1_i32_27 = arith.constant 1 : i32
    %83 = tpu.dynamic_rotate %82 by %c1_i32_27 dim 0 : vector<16x256xf32>, i32 -> vector<16x256xf32>
    %84 = vector.broadcast %45 : vector<16x1xf32> to vector<16x256xf32>
    %85 = arith.mulf %83, %84 : vector<16x256xf32>
    %c15_i32_28 = arith.constant 15 : i32
    %86 = tpu.dynamic_rotate %82 by %c15_i32_28 dim 0 : vector<16x256xf32>, i32 -> vector<16x256xf32>
    %87 = vector.broadcast %49 : vector<16x1xf32> to vector<16x256xf32>
    %88 = arith.mulf %86, %87 : vector<16x256xf32>
    %89 = tpu.concatenate %85, %82, %88 in 1 : vector<16x256xf32>, vector<16x256xf32>, vector<16x256xf32> -> vector<16x768xf32>
    %90 = arith.truncf %89 : vector<16x768xf32> to vector<16x768xbf16>
    %c0_29 = arith.constant 0 : index
    %c0_30 = arith.constant 0 : index
    %91 = vector.load %arg7[%c0_29, %c0_30] : memref<768x256xbf16, #tpu.memory_space<vmem>>, vector<768x256xbf16>
    %cst_31 = arith.constant dense<0.000000e+00> : vector<16x256xf32>
    %92 = tpu.matmul %90, %91, %cst_31 {dimension_numbers = #tpu.dot_dimension_numbers<[1], [0], [0], [1], [0, 0, 1, 1], [], []>} : vector<16x768xbf16>, vector<768x256xbf16>, vector<16x256xf32> -> vector<16x256xf32>
    %c0_32 = arith.constant 0 : index
    %c0_33 = arith.constant 0 : index
    %93 = vector.load %arg8[%c0_32, %c0_33] : memref<1x256xf32, #tpu.memory_space<vmem>>, vector<1x256xf32>
    %94 = vector.broadcast %93 : vector<1x256xf32> to vector<16x256xf32>
    %95 = arith.addf %92, %94 : vector<16x256xf32>
    %cst_34 = arith.constant 0.000000e+00 : f32
    %96 = vector.broadcast %cst_34 : f32 to vector<16x256xf32>
    %97 = arith.maximumf %95, %96 : vector<16x256xf32>
    %c1_i32_35 = arith.constant 1 : i32
    %98 = tpu.dynamic_rotate %97 by %c1_i32_35 dim 0 : vector<16x256xf32>, i32 -> vector<16x256xf32>
    %99 = vector.broadcast %45 : vector<16x1xf32> to vector<16x256xf32>
    %100 = arith.mulf %98, %99 : vector<16x256xf32>
    %c15_i32_36 = arith.constant 15 : i32
    %101 = tpu.dynamic_rotate %97 by %c15_i32_36 dim 0 : vector<16x256xf32>, i32 -> vector<16x256xf32>
    %102 = vector.broadcast %49 : vector<16x1xf32> to vector<16x256xf32>
    %103 = arith.mulf %101, %102 : vector<16x256xf32>
    %104 = tpu.concatenate %100, %97, %103 in 1 : vector<16x256xf32>, vector<16x256xf32>, vector<16x256xf32> -> vector<16x768xf32>
    %105 = arith.truncf %104 : vector<16x768xf32> to vector<16x768xbf16>
    %c0_37 = arith.constant 0 : index
    %c0_38 = arith.constant 0 : index
    %106 = vector.load %arg9[%c0_37, %c0_38] : memref<768x256xbf16, #tpu.memory_space<vmem>>, vector<768x256xbf16>
    %cst_39 = arith.constant dense<0.000000e+00> : vector<16x256xf32>
    %107 = tpu.matmul %105, %106, %cst_39 {dimension_numbers = #tpu.dot_dimension_numbers<[1], [0], [0], [1], [0, 0, 1, 1], [], []>} : vector<16x768xbf16>, vector<768x256xbf16>, vector<16x256xf32> -> vector<16x256xf32>
    %c0_40 = arith.constant 0 : index
    %c0_41 = arith.constant 0 : index
    %108 = vector.load %arg10[%c0_40, %c0_41] : memref<1x256xf32, #tpu.memory_space<vmem>>, vector<1x256xf32>
    %109 = vector.broadcast %108 : vector<1x256xf32> to vector<16x256xf32>
    %110 = arith.addf %107, %109 : vector<16x256xf32>
    %111 = arith.addf %110, %82 : vector<16x256xf32>
    %cst_42 = arith.constant 0.000000e+00 : f32
    %112 = vector.broadcast %cst_42 : f32 to vector<16x256xf32>
    %113 = arith.maximumf %111, %112 : vector<16x256xf32>
    %114 = arith.truncf %113 : vector<16x256xf32> to vector<16x256xbf16>
    %c0_43 = arith.constant 0 : index
    %c0_44 = arith.constant 0 : index
    %115 = vector.load %arg11[%c0_43, %c0_44] : memref<256x256xbf16, #tpu.memory_space<vmem>>, vector<256x256xbf16>
    %cst_45 = arith.constant dense<0.000000e+00> : vector<16x256xf32>
    %116 = tpu.matmul %114, %115, %cst_45 {dimension_numbers = #tpu.dot_dimension_numbers<[1], [0], [0], [1], [0, 0, 1, 1], [], []>} : vector<16x256xbf16>, vector<256x256xbf16>, vector<16x256xf32> -> vector<16x256xf32>
    %c0_46 = arith.constant 0 : index
    %c0_47 = arith.constant 0 : index
    %117 = vector.load %arg12[%c0_46, %c0_47] : memref<1x256xf32, #tpu.memory_space<vmem>>, vector<1x256xf32>
    %118 = vector.broadcast %117 : vector<1x256xf32> to vector<16x256xf32>
    %119 = arith.addf %116, %118 : vector<16x256xf32>
    %c0_48 = arith.constant 0 : index
    %c0_49 = arith.constant 0 : index
    %120 = vector.load %arg17[%c0_48, %c0_49] : memref<32x16xf32, #tpu.memory_space<vmem>>, vector<32x16xf32>
    %cst_50 = arith.constant dense<0.000000e+00> : vector<32x256xf32>
    %121 = tpu.matmul %120, %119, %cst_50 {dimension_numbers = #tpu.dot_dimension_numbers<[1], [0], [0], [1], [0, 0, 1, 1], [], []>} : vector<32x16xf32>, vector<16x256xf32>, vector<32x256xf32> -> vector<32x256xf32>
    %122 = arith.addf %81, %121 : vector<32x256xf32>
    %cst_51 = arith.constant 0.000000e+00 : f32
    %123 = vector.broadcast %cst_51 : f32 to vector<32x256xf32>
    %124 = arith.maximumf %122, %123 : vector<32x256xf32>
    %c0_52 = arith.constant 0 : index
    %c0_53 = arith.constant 0 : index
    %125 = vector.load %arg18[%c0_52, %c0_53] : memref<32x256xf32, #tpu.memory_space<vmem>>, vector<32x256xf32>
    tpu.vector_store %arg18[%c0_52, %c0_53], %124 {strides = array<i32>} : memref<32x256xf32, #tpu.memory_space<vmem>>, vector<32x256xf32>,
    %126 = arith.truncf %81 : vector<32x256xf32> to vector<32x256xbf16>
    %c0_54 = arith.constant 0 : index
    %c0_55 = arith.constant 0 : index
    %127 = vector.load %arg15[%c0_54, %c0_55] : memref<16x32xbf16, #tpu.memory_space<vmem>>, vector<16x32xbf16>
    %cst_56 = arith.constant dense<0.000000e+00> : vector<16x256xf32>
    %128 = tpu.matmul %127, %126, %cst_56 {dimension_numbers = #tpu.dot_dimension_numbers<[1], [0], [0], [1], [0, 0, 1, 1], [], []>} : vector<16x32xbf16>, vector<32x256xbf16>, vector<16x256xf32> -> vector<16x256xf32>
    %c0_57 = arith.constant 0 : index
    %c0_58 = arith.constant 0 : index
    %129 = vector.load %arg16[%c0_57, %c0_58] : memref<16x32xbf16, #tpu.memory_space<vmem>>, vector<16x32xbf16>
    %cst_59 = arith.constant dense<0.000000e+00> : vector<16x256xf32>
    %130 = tpu.matmul %129, %126, %cst_59 {dimension_numbers = #tpu.dot_dimension_numbers<[1], [0], [0], [1], [0, 0, 1, 1], [], []>} : vector<16x32xbf16>, vector<32x256xbf16>, vector<16x256xf32> -> vector<16x256xf32>
    %c1_i32_60 = arith.constant 1 : i32
    %131 = tpu.dynamic_rotate %130 by %c1_i32_60 dim 0 : vector<16x256xf32>, i32 -> vector<16x256xf32>
    %132 = vector.broadcast %45 : vector<16x1xf32> to vector<16x256xf32>
    %133 = arith.mulf %131, %132 : vector<16x256xf32>
    %134 = tpu.concatenate %133, %128, %130 in 1 : vector<16x256xf32>, vector<16x256xf32>, vector<16x256xf32> -> vector<16x768xf32>
    %135 = arith.truncf %134 : vector<16x768xf32> to vector<16x768xbf16>
    %c0_61 = arith.constant 0 : index
    %c0_62 = arith.constant 0 : index
    %136 = vector.load %arg13[%c0_61, %c0_62] : memref<768x256xbf16, #tpu.memory_space<vmem>>, vector<768x256xbf16>
    %cst_63 = arith.constant dense<0.000000e+00> : vector<16x256xf32>
    %137 = tpu.matmul %135, %136, %cst_63 {dimension_numbers = #tpu.dot_dimension_numbers<[1], [0], [0], [1], [0, 0, 1, 1], [], []>} : vector<16x768xbf16>, vector<768x256xbf16>, vector<16x256xf32> -> vector<16x256xf32>
    %c0_64 = arith.constant 0 : index
    %c0_65 = arith.constant 0 : index
    %138 = vector.load %arg14[%c0_64, %c0_65] : memref<1x256xf32, #tpu.memory_space<vmem>>, vector<1x256xf32>
    %139 = vector.broadcast %138 : vector<1x256xf32> to vector<16x256xf32>
    %140 = arith.addf %137, %139 : vector<16x256xf32>
    %141 = arith.addf %140, %113 : vector<16x256xf32>
    %cst_66 = arith.constant 0.000000e+00 : f32
    %142 = vector.broadcast %cst_66 : f32 to vector<16x256xf32>
    %143 = arith.maximumf %141, %142 : vector<16x256xf32>
    %c0_67 = arith.constant 0 : index
    %c0_68 = arith.constant 0 : index
    %144 = vector.load %arg19[%c0_67, %c0_68] : memref<16x256xf32, #tpu.memory_space<vmem>>, vector<16x256xf32>
    tpu.vector_store %arg19[%c0_67, %c0_68], %143 {strides = array<i32>} : memref<16x256xf32, #tpu.memory_space<vmem>>, vector<16x256xf32>,
    return
  }
  func.func @transform_0(%arg0: i32) -> (i32, i32) {
    %c0_i32 = arith.constant 0 : i32
    %c0_i32_0 = arith.constant 0 : i32
    %c0_i32_1 = arith.constant 0 : i32
    return %c0_i32, %c0_i32_0 : i32, i32
  }
  func.func @transform_1(%arg0: i32) -> (i32, i32) {
    %c0_i32 = arith.constant 0 : i32
    %c0_i32_0 = arith.constant 0 : i32
    %c0_i32_1 = arith.constant 0 : i32
    return %c0_i32, %c0_i32_0 : i32, i32
  }
  func.func @transform_2(%arg0: i32) -> (i32, i32) {
    %c0_i32 = arith.constant 0 : i32
    %c0_i32_0 = arith.constant 0 : i32
    %c0_i32_1 = arith.constant 0 : i32
    return %c0_i32, %c0_i32_0 : i32, i32
  }
  func.func @transform_3(%arg0: i32) -> (i32, i32) {
    %c0_i32 = arith.constant 0 : i32
    %c0_i32_0 = arith.constant 0 : i32
    %c0_i32_1 = arith.constant 0 : i32
    return %c0_i32, %c0_i32_0 : i32, i32
  }
  func.func @transform_4(%arg0: i32) -> (i32, i32) {
    %c0_i32 = arith.constant 0 : i32
    %c0_i32_0 = arith.constant 0 : i32
    %c0_i32_1 = arith.constant 0 : i32
    return %c0_i32, %c0_i32_0 : i32, i32
  }
  func.func @transform_5(%arg0: i32) -> (i32, i32) {
    %c0_i32 = arith.constant 0 : i32
    %c0_i32_0 = arith.constant 0 : i32
    %c0_i32_1 = arith.constant 0 : i32
    return %c0_i32, %c0_i32_0 : i32, i32
  }
  func.func @transform_6(%arg0: i32) -> (i32, i32) {
    %c0_i32 = arith.constant 0 : i32
    %c0_i32_0 = arith.constant 0 : i32
    %c0_i32_1 = arith.constant 0 : i32
    return %c0_i32, %c0_i32_0 : i32, i32
  }
  func.func @transform_7(%arg0: i32) -> (i32, i32) {
    %c0_i32 = arith.constant 0 : i32
    %c0_i32_0 = arith.constant 0 : i32
    %c0_i32_1 = arith.constant 0 : i32
    return %c0_i32, %c0_i32_0 : i32, i32
  }
  func.func @transform_8(%arg0: i32) -> (i32, i32) {
    %c0_i32 = arith.constant 0 : i32
    %c0_i32_0 = arith.constant 0 : i32
    %c0_i32_1 = arith.constant 0 : i32
    return %c0_i32, %c0_i32_0 : i32, i32
  }
  func.func @transform_9(%arg0: i32) -> (i32, i32) {
    %c0_i32 = arith.constant 0 : i32
    %c0_i32_0 = arith.constant 0 : i32
    %c0_i32_1 = arith.constant 0 : i32
    return %c0_i32, %c0_i32_0 : i32, i32
  }
  func.func @transform_10(%arg0: i32) -> (i32, i32) {
    %c0_i32 = arith.constant 0 : i32
    %c0_i32_0 = arith.constant 0 : i32
    %c0_i32_1 = arith.constant 0 : i32
    return %c0_i32, %c0_i32_0 : i32, i32
  }
  func.func @transform_11(%arg0: i32) -> (i32, i32) {
    %c0_i32 = arith.constant 0 : i32
    %c0_i32_0 = arith.constant 0 : i32
    %c0_i32_1 = arith.constant 0 : i32
    return %c0_i32, %c0_i32_0 : i32, i32
  }
  func.func @transform_12(%arg0: i32) -> (i32, i32) {
    %c0_i32 = arith.constant 0 : i32
    %c0_i32_0 = arith.constant 0 : i32
    %c0_i32_1 = arith.constant 0 : i32
    return %c0_i32, %c0_i32_0 : i32, i32
  }
  func.func @transform_13(%arg0: i32) -> (i32, i32) {
    %c0_i32 = arith.constant 0 : i32
    %c0_i32_0 = arith.constant 0 : i32
    %c0_i32_1 = arith.constant 0 : i32
    return %c0_i32, %c0_i32_0 : i32, i32
  }
  func.func @transform_14(%arg0: i32) -> (i32, i32) {
    %c0_i32 = arith.constant 0 : i32
    %c0_i32_0 = arith.constant 0 : i32
    %c0_i32_1 = arith.constant 0 : i32
    return %c0_i32, %c0_i32_0 : i32, i32
  }
  func.func @transform_15(%arg0: i32) -> (i32, i32) {
    %c0_i32 = arith.constant 0 : i32
    %c0_i32_0 = arith.constant 0 : i32
    %c0_i32_1 = arith.constant 0 : i32
    return %c0_i32, %c0_i32_0 : i32, i32
  }
  func.func @transform_16(%arg0: i32) -> (i32, i32) {
    %c0_i32 = arith.constant 0 : i32
    %c0_i32_0 = arith.constant 0 : i32
    %c0_i32_1 = arith.constant 0 : i32
    return %c0_i32, %c0_i32_0 : i32, i32
  }
  func.func @transform_17(%arg0: i32) -> (i32, i32) {
    %c0_i32 = arith.constant 0 : i32
    %c0_i32_0 = arith.constant 0 : i32
    %c0_i32_1 = arith.constant 0 : i32
    return %c0_i32, %c0_i32_0 : i32, i32
  }
  func.func @transform_18(%arg0: i32) -> (i32, i32) {
    %c0_i32 = arith.constant 0 : i32
    %c0_i32_0 = arith.constant 0 : i32
    %c0_i32_1 = arith.constant 0 : i32
    return %c0_i32, %c0_i32_0 : i32, i32
  }
}

</mosaic_0001>

<bundles_post_ra>
// kernel: hr_module_forward.1
= control target key start
LH: loop header
LB: loop body
LE: loop exit
PB: predicated region body
PF: predicated region fallthrough
CT: control target
= control target key end

     0   :  { %s7751_s0 = inlined_call_operand.vmem [shape: f32[32,256], index: 0, kind: input, shape index: {}]   ;;  %s7752_s1 = inlined_call_operand.vmem [shape: f32[16,256], index: 1, kind: input, shape index: {}]   ;;  %s7753_s2 = inlined_call_operand.vmem [shape: bf16[768,256], index: 2, kind: input, shape index: {}]   ;;  %s7754_s3 = inlined_call_operand.vmem [shape: f32[1,256], index: 3, kind: input, shape index: {}]   ;;  %s7755_s4 = inlined_call_operand.vmem [shape: bf16[768,256], index: 4, kind: input, shape index: {}]   ;;  %s7756_s5 = inlined_call_operand.vmem [shape: f32[1,256], index: 5, kind: input, shape index: {}]   ;;  %s7757_s6 = inlined_call_operand.hbm [shape: bf16[768,256], index: 6, kind: input, shape index: {}]   ;;  %s7758_s7 = inlined_call_operand.vmem [shape: f32[1,256], index: 7, kind: input, shape index: {}]   ;;  %s7759_s8 = inlined_call_operand.hbm [shape: bf16[768,256], index: 8, kind: input, shape index: {}]   ;;  %s7760_s9 = inlined_call_operand.vmem [shape: f32[1,256], index: 9, kind: input, shape index: {}]   ;;  %s7761_s10 = inlined_call_operand.vmem [shape: bf16[256,256], index: 10, kind: input, shape index: {}]   ;;  %s7762_s11 = inlined_call_operand.vmem [shape: f32[1,256], index: 11, kind: input, shape index: {}]   ;;  %s7763_s12 = inlined_call_operand.hbm [shape: bf16[768,256], index: 12, kind: input, shape index: {}]   ;;  %s7764_s13 = inlined_call_operand.hbm [shape: f32[1,256], index: 13, kind: input, shape index: {}]   ;;  %s7765_s14 = inlined_call_operand.hbm [shape: bf16[16,32], index: 14, kind: input, shape index: {}]   ;;  %s7766_s15 = inlined_call_operand.hbm [shape: bf16[16,32], index: 15, kind: input, shape index: {}]   ;;  %s7767_s16 = inlined_call_operand.vmem [shape: f32[32,16], index: 16, kind: input, shape index: {}]   ;;  %s7768_s17 = inlined_call_operand.vmem [shape: f32[32,256], index: 17, kind: output, shape index: {0}]   ;;  %s7769_s18 = inlined_call_operand.vmem [shape: f32[16,256], index: 18, kind: output, shape index: {1}]  }
   0x1   :  { %7773 = sst [smem:[#allocation16_spill]] %s7751_s0 }
   0x2   :  { %7774 = sst [smem:[#allocation17_spill]] %s7752_s1 }
   0x3   :  { %7775 = sst [smem:[#allocation18_spill]] %s7753_s2 }
   0x4   :  { %24 = vsyncpa [#allocation3], 0 }
   0x5   :  { %25 = vsyncpa [#allocation5], 0 }
   0x6   :  { %26 = vsyncpa [#allocation8], 0 }
   0x7   :  { %27 = vsyncpa [#allocation11], 0  ;;  %s6214_s27 = smov [#allocation4]   ;;  %s6215_s29 = smov [#allocation7]  }
   0x8   :  { %s59_s28 = sshll.u32 %s6214_s27, 4  ;;  %s90_s30 = sshll.u32 %s6215_s29, 4  ;;  %s60_s28 = int_to_ptr.vmem [resolvable:$true] %s59_s28  ;;  %s91_s30 = int_to_ptr.vmem [resolvable:$true] %s90_s30 }
   0x9   :  { %s6074_s1 = scalar_lea.hbm %s7759_s8, 12288 }
   0xa   :  { %p6075_p0 = scmp.ne.s32.totalorder %s7759_s8, %s6074_s1  ;;  %p6078_p1 = scmp.lt.u32.totalorder %s6074_s1, %s7759_s8 }
   0xc   :  { %p6080_p2 = pnand %p6078_p1, %p6075_p0 }
   0xe   :  { %6083 = shalt.err (!%p6080_p2)
}
   0xf   :  { %s6084_s23 = scalar_lea.vmem %s60_s28, 12288  ;;  %p6089_p4 = scmp.lt.s32.totalorder %s60_s28, %s60_s28 }
  0x10   :  { %p6085_p3 = scmp.ne.s32.totalorder %s60_s28, %s6084_s23  ;;  %p6090_p5 = scmp.lt.s32.totalorder %s6084_s23, %s6084_s23 }
  0x12   :  { %p6091_p6 = por %p6090_p5, %p6089_p4 }
  0x14   :  { %p6092_p7 = pnand %p6091_p6, %p6085_p3 }
  0x16   :  { %6095 = shalt.err (!%p6092_p7)
}
  0x17   :  { %s6216_s24 = smov 128   ;;  %s6217_s25 = smov 8  }
  0x18   :  { %65 = dma.hbm_to_vmem [thread:$0]  %s7759_s8, 12288, %s60_s28, [#allocation5], %s6216_s24, %s6216_s24, %s6217_s25  }
  0x19   :  { %s6096_s19 = scalar_lea.hbm %s7764_s13, 32 }
  0x1a   :  { %p6097_p8 = scmp.ne.s32.totalorder %s7764_s13, %s6096_s19  ;;  %p6100_p9 = scmp.lt.u32.totalorder %s6096_s19, %s7764_s13 }
  0x1c   :  { %p6102_p10 = pnand %p6100_p9, %p6097_p8 }
  0x1e   :  { %6105 = shalt.err (!%p6102_p10)
}
  0x1f   :  { %s6106_s2 = scalar_lea.vmem %s91_s30, 32  ;;  %p6111_p12 = scmp.lt.s32.totalorder %s91_s30, %s91_s30 }
  0x20   :  { %p6107_p11 = scmp.ne.s32.totalorder %s91_s30, %s6106_s2  ;;  %p6112_p13 = scmp.lt.s32.totalorder %s6106_s2, %s6106_s2 }
  0x22   :  { %p6113_p0 = por %p6112_p13, %p6111_p12 }
  0x24   :  { %p6114_p1 = pnand %p6113_p0, %p6107_p11 }
  0x26   :  { %6117 = shalt.err (!%p6114_p1)
}
  0x27   :  { %93 = dma.hbm_to_vmem [thread:$0]  %s7764_s13, 32, %s91_s30, [#allocation8]  }
  0x28   :  { %s6218_s23 = smov [#allocation2]   ;;  %s6219_s27 = smov [#allocation6]  }
  0x29   :  { %s45_s26 = sshll.u32 %s6218_s23, 4  ;;  %s77_s29 = sshll.u32 %s6219_s27, 4  ;;  %s46_s26 = int_to_ptr.vmem [resolvable:$true] %s45_s26  ;;  %s6348_s29 = int_to_ptr.vmem [resolvable:$true] %s77_s29 }
  0x2a   :  { %s6118_s1 = scalar_lea.hbm %s7757_s6, 12288 }
  0x2b   :  { %p6119_p2 = scmp.ne.s32.totalorder %s7757_s6, %s6118_s1  ;;  %p6122_p3 = scmp.lt.u32.totalorder %s6118_s1, %s7757_s6 }
  0x2d   :  { %p6124_p4 = pnand %p6122_p3, %p6119_p2 }
  0x2f   :  { %6127 = shalt.err (!%p6124_p4)
}
  0x30   :  { %s6128_s13 = scalar_lea.vmem %s46_s26, 12288  ;;  %p6133_p6 = scmp.lt.s32.totalorder %s46_s26, %s46_s26 }
  0x31   :  { %p6129_p5 = scmp.ne.s32.totalorder %s46_s26, %s6128_s13  ;;  %p6134_p7 = scmp.lt.s32.totalorder %s6128_s13, %s6128_s13 }
  0x33   :  { %p6135_p8 = por %p6134_p7, %p6133_p6 }
  0x35   :  { %p6136_p9 = pnand %p6135_p8, %p6129_p5 }
  0x37   :  { %6139 = shalt.err (!%p6136_p9)
}
  0x38   :  { %51 = dma.hbm_to_vmem [thread:$0]  %s7757_s6, 12288, %s46_s26, [#allocation3], %s6216_s24, %s6216_s24, %s6217_s25  }
  0x39   :  { %s6140_s27 = scalar_lea.hbm %s7763_s12, 12288 }
  0x3a   :  { %p6141_p10 = scmp.ne.s32.totalorder %s7763_s12, %s6140_s27  ;;  %p6144_p11 = scmp.lt.u32.totalorder %s6140_s27, %s7763_s12 }
  0x3c   :  { %p6146_p12 = pnand %p6144_p11, %p6141_p10 }
  0x3e   :  { %6149 = shalt.err (!%p6146_p12)
}
  0x3f   :  { %s6150_s21 = scalar_lea.vmem %s6348_s29, 12288  ;;  %p6155_p0 = scmp.lt.s32.totalorder %s6348_s29, %s6348_s29 }
  0x40   :  { %p6151_p13 = scmp.ne.s32.totalorder %s6348_s29, %s6150_s21  ;;  %p6156_p1 = scmp.lt.s32.totalorder %s6150_s21, %s6150_s21 }
  0x42   :  { %p6157_p2 = por %p6156_p1, %p6155_p0 }
  0x44   :  { %p6158_p3 = pnand %p6157_p2, %p6151_p13 }
  0x46   :  { %6161 = shalt.err (!%p6158_p3)
}
  0x47   :  { %83 = dma.hbm_to_vmem [thread:$0]  %s7763_s12, 12288, %s6348_s29, [#allocation5], %s6216_s24, %s6216_s24, %s6217_s25  }
  0x48   :  { %s6220_s22 = smov [#allocation9]   ;;  %s6162_s8 = scalar_lea.hbm %s7765_s14, 128 }
  0x49   :  { %s99_s2 = sshll.u32 %s6220_s22, 4  ;;  %p6163_p4 = scmp.ne.s32.totalorder %s7765_s14, %s6162_s8  ;;  %s100_s2 = int_to_ptr.vmem [resolvable:$true] %s99_s2 }
  0x4a   :  { %p6166_p5 = scmp.lt.u32.totalorder %s6162_s8, %s7765_s14 }
  0x4c   :  { %p6168_p6 = pnand %p6166_p5, %p6163_p4 }
  0x4e   :  { %6171 = shalt.err (!%p6168_p6)
}
  0x4f   :  { %s6172_s19 = scalar_lea.vmem %s100_s2, 128  ;;  %p6177_p8 = scmp.lt.s32.totalorder %s100_s2, %s100_s2 }
  0x50   :  { %p6173_p7 = scmp.ne.s32.totalorder %s100_s2, %s6172_s19  ;;  %p6178_p9 = scmp.lt.s32.totalorder %s6172_s19, %s6172_s19 }
  0x52   :  { %p6179_p10 = por %p6178_p9, %p6177_p8 }
  0x54   :  { %p6180_p11 = pnand %p6179_p10, %p6173_p7 }
  0x56   :  { %6183 = shalt.err (!%p6180_p11)
}
  0x57   :  { %s6221_s12 = smov 64   ;;  %s6222_s24 = smov 4  }
  0x58   :  { %105 = dma.hbm_to_vmem [thread:$0]  %s7765_s14, 128, %s100_s2, [#allocation8], %s6221_s12, %s6221_s12, %s6222_s24  }
  0x59   :  { %s6223_s1 = smov [#allocation10]   ;;  %s6184_s26 = scalar_lea.hbm %s7766_s15, 128 }
  0x5a   :  { %s111_s20 = sshll.u32 %s6223_s1, 4  ;;  %p6185_p12 = scmp.ne.s32.totalorder %s7766_s15, %s6184_s26  ;;  %s112_s20 = int_to_ptr.vmem [resolvable:$true] %s111_s20 }
  0x5b   :  { %p6188_p13 = scmp.lt.u32.totalorder %s6184_s26, %s7766_s15 }
  0x5d   :  { %p6190_p0 = pnand %p6188_p13, %p6185_p12 }
  0x5f   :  { %6193 = shalt.err (!%p6190_p0)
}
  0x60   :  { %s6194_s28 = scalar_lea.vmem %s112_s20, 128  ;;  %p6199_p2 = scmp.lt.s32.totalorder %s112_s20, %s112_s20 }
  0x61   :  { %p6195_p1 = scmp.ne.s32.totalorder %s112_s20, %s6194_s28  ;;  %p6200_p3 = scmp.lt.s32.totalorder %s6194_s28, %s6194_s28 }
  0x63   :  { %p6201_p4 = por %p6200_p3, %p6199_p2 }
  0x65   :  { %p6202_p5 = pnand %p6201_p4, %p6195_p1 }
  0x67   :  { %6205 = shalt.err (!%p6202_p5)
}
  0x68   :  { %117 = dma.hbm_to_vmem [thread:$0]  %s7766_s15, 128, %s112_s20, [#allocation11], %s6221_s12, %s6221_s12, %s6222_s24  }
  0x69   :  { %6206 = dma.done.wait [#allocation3], 12288  }
  0x6a   :  { %6207 = vsyncadd [#allocation3], 4294955008 }
  0x6b   :  { %6208 = dma.done.wait [#allocation5], 24576  }
  0x6c   :  { %6209 = vsyncadd [#allocation5], 4294942720 }
  0x6d   :  { %6210 = dma.done.wait [#allocation8], 160  }
  0x6e   :  { %6211 = vsyncadd [#allocation8], 4294967136 }
  0x6f   :  { %6212 = dma.done.wait [#allocation11], 128  }
  0x70   :  { %6213 = vsyncadd [#allocation11], 4294967168  ;;  %s7776_s0 = sld [smem:[#allocation18_spill]]  ;;  %v139_v7 = vlaneseq  ;;  %s7777_s24 = sld [smem:[#allocation16_spill]]  ;;  %v6224_v22 = vmov 0.0   ;;  %vm3800_vm10 = vcmask 261120  }
  0x71   :  { %s7778_s20 = sld [smem:[#allocation17_spill]]  ;;  %vm3663_vm11 = vcmask 130048  }
  0x72   :  { %v6436_v10 = vshrl.u32 %v139_v7, 7 }
  0x74   :  { %v148_v13 = vand.u32 15, %v6436_v10  ;;  %vm268_vm1 = vcmp.lt.s32.totalorder %v6436_v10, 1  ;;  %v142_v40 = vadd.s32 16, %v6436_v10  ;;  %vm293_vm3 = vcmp.lt.s32.totalorder %v6436_v10, 7 }
  0x76   :  { %v5287_v0 = vld [vmem:[%s7776_s0 + $0x4] ss:$8 sps:$4 sm:$0xff]   ;;  %v5289_v1 = vld [vmem:[%s7776_s0] ss:$8 sps:$4 sm:$0xff]   ;;  %v5290_v2 = vld [vmem:[%s7776_s0 + $0x14] ss:$8 sps:$4 sm:$0xff]  }
  0x77   :  { %910 = vmatprep.subr.bf16.mxu0 %v5287_v0  ;;  %v5292_v3 = vld [vmem:[%s7776_s0 + $0x10] ss:$8 sps:$4 sm:$0xff]   ;;  %v5293_v4 = vld [vmem:[%s7776_s0 + $0x24] ss:$8 sps:$4 sm:$0xff]   ;;  %v5295_v5 = vld [vmem:[%s7776_s0 + $0x20] ss:$8 sps:$4 sm:$0xff]  }
  0x78   :  { %911 = vmatpush1.bf16.msra.mxu0 %v5289_v1  ;;  %v5296_v6 = vld [vmem:[%s7776_s0 + $0x34] ss:$8 sps:$4 sm:$0xff]   ;;  %v5298_v8 = vld [vmem:[%s7776_s0 + $0x30] ss:$8 sps:$4 sm:$0xff]   ;;  %v5299_v9 = vld [vmem:[%s7776_s0 + $0x44] ss:$8 sps:$4 sm:$0xff]  }
  0x79   :  { %912 = vmatprep.subr.bf16.mxu0 %v5290_v2  ;;  %v5301_v11 = vld [vmem:[%s7776_s0 + $0x40] ss:$8 sps:$4 sm:$0xff]   ;;  %v5302_v12 = vld [vmem:[%s7776_s0 + $0x54] ss:$8 sps:$4 sm:$0xff]   ;;  %v5304_v14 = vld [vmem:[%s7776_s0 + $0x50] ss:$8 sps:$4 sm:$0xff]  }
  0x7a   :  { %v5305_v15 = vld [vmem:[%s7776_s0 + $0x64] ss:$8 sps:$4 sm:$0xff]   ;;  %vm192_vm0 = vcmp.ne.s32.totalorder %v148_v13, 0  ;;  %v6459_v17 = vld [vmem:[%s7777_s24 + $0x18] sm:$0xff]  ;;  %v5307_v21 = vld [vmem:[%s7776_s0 + $0x60] ss:$8 sps:$4 sm:$0xff]  }
  0x7b   :  { %v6454_v16 = vld [vmem:[%s7777_s24 + $0x8] sm:$0xff]  ;;  %v6464_v18 = vld [vmem:[%s7777_s24 + $0x38] sm:$0xff]  ;;  %v263_v20 = vrot.slane %v6459_v17, 7  ;;  %v6473_v23 = vsel %vm192_vm0, 1.0, %v6224_v22  ;;  %v6526_v43 = vld [vmem:[%s7777_s24] sm:$0xff]  ;;  %v162_v45 = vand.u32 15, %v142_v40 }
  0x7c   :  { %913 = vmatpush1.bf16.msra.mxu0 %v5292_v3  ;;  %v261_v19 = vrot.slane %v6454_v16, 7  ;;  %v267_v24 = vrot.slane %v6464_v18, 7  ;;  %v5308_v25 = vld [vmem:[%s7776_s0 + $0x74] ss:$8 sps:$4 sm:$0xff]   ;;  %v5310_v29 = vld [vmem:[%s7776_s0 + $0x70] ss:$8 sps:$4 sm:$0xff]  }
  0x7d   :  { %914 = vmatprep.subr.bf16.mxu0 %v5293_v4  ;;  %v5311_v30 = vld [vmem:[%s7776_s0 + $0x84] ss:$8 sps:$4 sm:$0xff]   ;;  %v5313_v32 = vld [vmem:[%s7776_s0 + $0x80] ss:$8 sps:$4 sm:$0xff]   ;;  %v5314_v33 = vld [vmem:[%s7776_s0 + $0x94] ss:$8 sps:$4 sm:$0xff]  }
  0x7e   :  { %v274_v26 = vsel %vm268_vm1, %v261_v19, %v263_v20  ;;  %v276_v27 = vsel %vm268_vm1, %v267_v24, %v261_v19  ;;  %v5316_v34 = vld [vmem:[%s7776_s0 + $0x90] ss:$8 sps:$4 sm:$0xff]   ;;  %v5317_v35 = vld [vmem:[%s7776_s0 + $0xa4] ss:$8 sps:$4 sm:$0xff]   ;;  %v5319_v36 = vld [vmem:[%s7776_s0 + $0xa0] ss:$8 sps:$4 sm:$0xff]   ;;  %v313_v19 = vpack.c.bf16 %v6459_v17, %v6454_v16 }
  0x7f   :  { %v278_v28 = vmul.f32 %v6473_v23, %v276_v27  ;;  %v5320_v37 = vld [vmem:[%s7776_s0 + $0xb4] ss:$8 sps:$4 sm:$0xff]   ;;  %v5322_v38 = vld [vmem:[%s7776_s0 + $0xb0] ss:$8 sps:$4 sm:$0xff]   ;;  %v5323_v39 = vld [vmem:[%s7776_s0 + $0xc4] ss:$8 sps:$4 sm:$0xff]  }
  0x80   :  { %915 = vmatpush1.bf16.msra.mxu0 %v5295_v5  ;;  %v5325_v41 = vld [vmem:[%s7776_s0 + $0xc0] ss:$8 sps:$4 sm:$0xff]   ;;  %v5326_v42 = vld [vmem:[%s7776_s0 + $0xd4] ss:$8 sps:$4 sm:$0xff]   ;;  %v5328_v47 = vld [vmem:[%s7776_s0 + $0xd0] ss:$8 sps:$4 sm:$0xff]  }
  0x81   :  { %916 = vmatprep.subr.bf16.mxu0 %v5296_v6  ;;  %v311_v31 = vpack.c.bf16 %v274_v26, %v278_v28  ;;  %v6531_v44 = vld [vmem:[%s7777_s24 + $0x30] sm:$0xff]  ;;  %v6536_v46 = vld [vmem:[%s7777_s24 + $0x28] sm:$0xff]  ;;  %v260_v49 = vrot.slane %v6526_v43, 7  ;;  %vm194_vm2 = vcmp.ne.s32.totalorder %v162_v45, 0  ;;  %v6569_v59 = vld [vmem:[%s7777_s24 + $0x20] sm:$0xff] }
  0x82   :  { %v5329_v48 = vld [vmem:[%s7776_s0 + $0xe4] ss:$8 sps:$4 sm:$0xff]   ;;  %v266_v50 = vrot.slane %v6531_v44, 7  ;;  %v6549_v51 = vld [vmem:[%s7777_s24 + $0x10] sm:$0xff]  ;;  %v265_v52 = vrot.slane %v6536_v46, 7  ;;  %v6562_v57 = vsel %vm194_vm2, 1.0, %v6224_v22 }
  0x83   :  { %942 = vmatprep.mubr.bf16.mxu0 %v311_v31  ;;  %v5331_v53 = vld [vmem:[%s7776_s0 + $0xe0] ss:$8 sps:$4 sm:$0xff]   ;;  %v5332_v54 = vld [vmem:[%s7776_s0 + $0xf4] ss:$8 sps:$4 sm:$0xff]   ;;  %v262_v55 = vrot.slane %v6549_v51, 7  ;;  %v264_v0 = vrot.slane %v6569_v59, 7 }
  0x84   :  { %917 = vmatpush1.bf16.msra.mxu0 %v5298_v8  ;;  %v275_v56 = vsel %vm268_vm1, %v266_v50, %v260_v49  ;;  %v272_v58 = vsel %vm268_vm1, %v263_v20, %v265_v52  ;;  %v5334_v61 = vld [vmem:[%s7776_s0 + $0xf0] ss:$8 sps:$4 sm:$0xff]   ;;  %v5337_v1 = vld [vmem:[%s7776_s0 + $0x104] ss:$8 sps:$4 sm:$0xff]   ;;  %v270_v2 = vsel %vm268_vm1, %v265_v52, %v267_v24  ;;  %v5335_v4 = vld [vmem:[%s7776_s0 + $0x100] ss:$8 sps:$4 sm:$0xff]  }
  0x85   :  { %918 = vmatprep.subr.bf16.mxu0 %v5299_v9  ;;  %v277_v60 = vmul.f32 %v6473_v23, %v275_v56  ;;  %v273_v62 = vsel %vm268_vm1, %v260_v49, %v262_v55  ;;  %v282_v63 = vmul.f32 %v6562_v57, %v272_v58  ;;  %v271_v6 = vsel %vm268_vm1, %v262_v55, %v264_v0  ;;  %v5340_v7 = vld [vmem:[%s7776_s0 + $0x114] ss:$8 sps:$4 sm:$0xff]   ;;  %v5338_v8 = vld [vmem:[%s7776_s0 + $0x110] ss:$8 sps:$4 sm:$0xff]   ;;  %v5343_v9 = vld [vmem:[%s7776_s0 + $0x124] ss:$8 sps:$4 sm:$0xff]  }
  0x86   :  { %v5341_v13 = vld [vmem:[%s7776_s0 + $0x120] ss:$8 sps:$4 sm:$0xff]   ;;  %v5431_v20 = vld [vmem:[%s7755_s4 + $0x104] ss:$8 sps:$4 sm:$0xff]   ;;  %v5434_v24 = vld [vmem:[%s7755_s4 + $0x114] ss:$8 sps:$4 sm:$0xff]  }
  0x87   :  { %v310_v3 = vpack.c.bf16 %v273_v62, %v277_v60  ;;  %v317_v5 = vpack.c.bf16 %v270_v2, %v282_v63  ;;  %v5349_v26 = vld [vmem:[%s7776_s0 + $0x144] ss:$8 sps:$4 sm:$0xff]   ;;  %1778 = vmatprep.subr.bf16.mxu1 %v5431_v20  ;;  %v5436_v27 = vld [vmem:[%s7755_s4 + $0x110] ss:$8 sps:$4 sm:$0xff]   ;;  %v5439_v31 = vld [vmem:[%s7755_s4 + $0x120] ss:$8 sps:$4 sm:$0xff]  }
  0x88   :  { %919 = vmatpush1.bf16.msra.mxu0 %v5301_v11  ;;  %v281_v11 = vmul.f32 %v6562_v57, %v271_v6  ;;  %v5437_v28 = vld [vmem:[%s7755_s4 + $0x124] ss:$8 sps:$4 sm:$0xff]   ;;  %v5452_v40 = vld [vmem:[%s7755_s4 + $0x154] ss:$8 sps:$4 sm:$0xff]   ;;  %v5457_v45 = vld [vmem:[%s7755_s4 + $0x150] ss:$8 sps:$4 sm:$0xff]  }
  0x89   :  { %920 = vmatprep.subr.bf16.mxu0 %v5302_v12  ;;  %v269_v12 = vsel %vm268_vm1, %v264_v0, %v266_v50  ;;  %v5364_v49 = vld [vmem:[%s7776_s0 + $0x194] ss:$8 sps:$4 sm:$0xff]   ;;  %v5463_v50 = vld [vmem:[%s7755_s4 + $0x160] ss:$8 sps:$4 sm:$0xff]   ;;  %v5469_v55 = vld [vmem:[%s7755_s4 + $0x170] ss:$8 sps:$4 sm:$0xff]  }
  0x8a   :  { %v5464_v52 = vld [vmem:[%s7755_s4 + $0x174] ss:$8 sps:$4 sm:$0xff]   ;;  %v5470_v56 = vld [vmem:[%s7755_s4 + $0x184] ss:$8 sps:$4 sm:$0xff]   ;;  %v5365_v58 = vld [vmem:[%s7776_s0 + $0x1a0] ss:$8 sps:$4 sm:$0xff]  }
  0x8b   :  { %v5370_v60 = vld [vmem:[%s7776_s0 + $0x1b4] ss:$8 sps:$4 sm:$0xff]   ;;  %v5368_v63 = vld [vmem:[%s7776_s0 + $0x1b0] ss:$8 sps:$4 sm:$0xff]   ;;  %v5373_v0 = vld [vmem:[%s7776_s0 + $0x1c4] ss:$8 sps:$4 sm:$0xff]  }
  0x8c   :  { %921 = vmatpush1.bf16.msra.mxu0 %v5304_v14  ;;  %v5346_v14 = vld [vmem:[%s7776_s0 + $0x134] ss:$8 sps:$4 sm:$0xff]   ;;  %v5482_v2 = vld [vmem:[%s7755_s4 + $0x1a4] ss:$8 sps:$4 sm:$0xff]   ;;  %v5380_v20 = vld [vmem:[%s7776_s0 + $0x1f0] ss:$8 sps:$4 sm:$0xff]  }
  0x8d   :  { %922 = vmatprep.subr.bf16.mxu0 %v5305_v15  ;;  %v316_v15 = vpack.c.bf16 %v269_v12, %v281_v11  ;;  %v5476_v62 = vld [vmem:[%s7755_s4 + $0x194] ss:$8 sps:$4 sm:$0xff]   ;;  %v5494_v11 = vld [vmem:[%s7755_s4 + $0x1c4] ss:$8 sps:$4 sm:$0xff]   ;;  %v5377_v12 = vld [vmem:[%s7776_s0 + $0x1e0] ss:$8 sps:$4 sm:$0xff]  }
  0x8e   :  { %v5488_v6 = vld [vmem:[%s7755_s4 + $0x1b4] ss:$8 sps:$4 sm:$0xff]  }
  0x90   :  { %923 = vmatpush1.bf16.msra.mxu0 %v5307_v21  ;;  %v5433_v21 = vld [vmem:[%s7755_s4 + $0x100] ss:$8 sps:$4 sm:$0xff]  }
  0x91   :  { %924 = vmatprep.subr.bf16.mxu0 %v5308_v25  ;;  %v5344_v25 = vld [vmem:[%s7776_s0 + $0x130] ss:$8 sps:$4 sm:$0xff]   ;;  %1779 = vmatpush1.bf16.msra.mxu1 %v5433_v21 }
  0x92   :  { %1780 = vmatprep.subr.bf16.mxu1 %v5434_v24  ;;  %v5385_v24 = vld [vmem:[%s7776_s0 + $0x204] ss:$8 sps:$4 sm:$0xff]  }
  0x94   :  { %925 = vmatpush1.bf16.msra.mxu0 %v5310_v29  ;;  %v5347_v29 = vld [vmem:[%s7776_s0 + $0x140] ss:$8 sps:$4 sm:$0xff]  }
  0x95   :  { %926 = vmatprep.subr.bf16.mxu0 %v5311_v30  ;;  %v5352_v30 = vld [vmem:[%s7776_s0 + $0x154] ss:$8 sps:$4 sm:$0xff]   ;;  %1781 = vmatpush1.bf16.msra.mxu1 %v5436_v27  ;;  %v290_v27 = vrot.slane %v6536_v46, 1 }
  0x96   :  { %1782 = vmatprep.subr.bf16.mxu1 %v5437_v28  ;;  %v5383_v28 = vld [vmem:[%s7776_s0 + $0x200] ss:$8 sps:$4 sm:$0xff]  }
  0x98   :  { %927 = vmatpush1.bf16.msra.mxu0 %v5313_v32  ;;  %v5440_v32 = vld [vmem:[%s7755_s4 + $0x134] ss:$8 sps:$4 sm:$0xff]  }
  0x99   :  { %928 = vmatprep.subr.bf16.mxu0 %v5314_v33  ;;  %v5350_v33 = vld [vmem:[%s7776_s0 + $0x150] ss:$8 sps:$4 sm:$0xff]   ;;  %1783 = vmatpush1.bf16.msra.mxu1 %v5439_v31 }
  0x9a   :  { %1784 = vmatprep.subr.bf16.mxu1 %v5440_v32  ;;  %v286_v32 = vrot.slane %v6454_v16, 1  ;;  %v6061_v16 = vld [vmem:[%s7777_s24 + $0x30] sm:$0xff] }
  0x9c   :  { %929 = vmatpush1.bf16.msra.mxu0 %v5316_v34  ;;  %v5355_v34 = vld [vmem:[%s7776_s0 + $0x164] ss:$8 sps:$4 sm:$0xff]  }
  0x9d   :  { %930 = vmatprep.subr.bf16.mxu0 %v5317_v35  ;;  %v5445_v35 = vld [vmem:[%s7755_s4 + $0x130] ss:$8 sps:$4 sm:$0xff]  }
  0x9e   :  { %1785 = vmatpush1.bf16.msra.mxu1 %v5445_v35  ;;  %v5389_v35 = vld [vmem:[%s7776_s0 + $0x220] ss:$8 sps:$4 sm:$0xff]  }
  0xa0   :  { %931 = vmatpush1.bf16.msra.mxu0 %v5319_v36  ;;  %v5446_v36 = vld [vmem:[%s7755_s4 + $0x144] ss:$8 sps:$4 sm:$0xff]  }
  0xa1   :  { %932 = vmatprep.subr.bf16.mxu0 %v5320_v37  ;;  %v5353_v37 = vld [vmem:[%s7776_s0 + $0x160] ss:$8 sps:$4 sm:$0xff]   ;;  %1786 = vmatprep.subr.bf16.mxu1 %v5446_v36  ;;  %v5394_v36 = vld [vmem:[%s7776_s0 + $0x234] ss:$8 sps:$4 sm:$0xff]  }
  0xa4   :  { %933 = vmatpush1.bf16.msra.mxu0 %v5322_v38  ;;  %v5358_v38 = vld [vmem:[%s7776_s0 + $0x174] ss:$8 sps:$4 sm:$0xff]  }
  0xa5   :  { %934 = vmatprep.subr.bf16.mxu0 %v5323_v39  ;;  %v5451_v39 = vld [vmem:[%s7755_s4 + $0x140] ss:$8 sps:$4 sm:$0xff]  }
  0xa6   :  { %1787 = vmatpush1.bf16.msra.mxu1 %v5451_v39  ;;  %v5392_v39 = vld [vmem:[%s7776_s0 + $0x230] ss:$8 sps:$4 sm:$0xff]  }
  0xa7   :  { %1788 = vmatprep.subr.bf16.mxu1 %v5452_v40  ;;  %v5397_v40 = vld [vmem:[%s7776_s0 + $0x244] ss:$8 sps:$4 sm:$0xff]  }
  0xa8   :  { %935 = vmatpush1.bf16.msra.mxu0 %v5325_v41  ;;  %v5356_v41 = vld [vmem:[%s7776_s0 + $0x170] ss:$8 sps:$4 sm:$0xff]  }
  0xa9   :  { %936 = vmatprep.subr.bf16.mxu0 %v5326_v42  ;;  %v5361_v42 = vld [vmem:[%s7776_s0 + $0x184] ss:$8 sps:$4 sm:$0xff]  }
  0xaa   :  { %1789 = vmatpush1.bf16.msra.mxu1 %v5457_v45  ;;  %v5401_v45 = vld [vmem:[%s7776_s0 + $0x260] ss:$8 sps:$4 sm:$0xff]  }
  0xac   :  { %937 = vmatpush1.bf16.msra.mxu0 %v5328_v47  ;;  %v5458_v47 = vld [vmem:[%s7755_s4 + $0x164] ss:$8 sps:$4 sm:$0xff]  }
  0xad   :  { %938 = vmatprep.subr.bf16.mxu0 %v5329_v48  ;;  %v5359_v48 = vld [vmem:[%s7776_s0 + $0x180] ss:$8 sps:$4 sm:$0xff]   ;;  %1790 = vmatprep.subr.bf16.mxu1 %v5458_v47  ;;  %v5406_v47 = vld [vmem:[%s7776_s0 + $0x274] ss:$8 sps:$4 sm:$0xff]  }
  0xae   :  { %1791 = vmatpush1.bf16.msra.mxu1 %v5463_v50  ;;  %v5407_v50 = vld [vmem:[%s7776_s0 + $0x280] ss:$8 sps:$4 sm:$0xff]  }
  0xaf   :  { %1792 = vmatprep.subr.bf16.mxu1 %v5464_v52  ;;  %v5412_v52 = vld [vmem:[%s7776_s0 + $0x294] ss:$8 sps:$4 sm:$0xff]  }
  0xb0   :  { %939 = vmatpush1.bf16.msra.mxu0 %v5331_v53  ;;  %v5362_v53 = vld [vmem:[%s7776_s0 + $0x190] ss:$8 sps:$4 sm:$0xff]  }
  0xb1   :  { %940 = vmatprep.subr.bf16.mxu0 %v5332_v54  ;;  %v5367_v54 = vld [vmem:[%s7776_s0 + $0x1a4] ss:$8 sps:$4 sm:$0xff]  }
  0xb2   :  { %1793 = vmatpush1.bf16.msra.mxu1 %v5469_v55  ;;  %v5413_v55 = vld [vmem:[%s7776_s0 + $0x2a0] ss:$8 sps:$4 sm:$0xff]  }
  0xb3   :  { %1794 = vmatprep.subr.bf16.mxu1 %v5470_v56  ;;  %v5418_v56 = vld [vmem:[%s7776_s0 + $0x2b4] ss:$8 sps:$4 sm:$0xff]  }
  0xb4   :  { %941 = vmatpush1.bf16.msra.mxu0 %v5334_v61  ;;  %v5475_v61 = vld [vmem:[%s7755_s4 + $0x180] ss:$8 sps:$4 sm:$0xff]  }
  0xb5   :  { %963 = vmatprep.subr.bf16.mxu0 %v5337_v1  ;;  %v5481_v1 = vld [vmem:[%s7755_s4 + $0x190] ss:$8 sps:$4 sm:$0xff]  }
  0xb6   :  { %1795 = vmatpush1.bf16.msra.mxu1 %v5475_v61  ;;  %v5419_v61 = vld [vmem:[%s7776_s0 + $0x2c0] ss:$8 sps:$4 sm:$0xff]  }
  0xb7   :  { %943 = vmatmul.mubr.bf16.vlgmr.msra.gmra.mrb[0].mxu0 %v310_v3  ;;  %v5371_v3 = vld [vmem:[%s7776_s0 + $0x1c0] ss:$8 sps:$4 sm:$0xff]   ;;  %1796 = vmatprep.subr.bf16.mxu1 %v5476_v62  ;;  %v143_v62 = vadd.s32 24, %v6436_v10 }
  0xb8   :  { %964 = vmatpush1.bf16.msra.mxu0 %v5335_v4  ;;  %952 = vmatprep.mubr.bf16.mxu0 %v317_v5  ;;  %v5376_v4 = vld [vmem:[%s7776_s0 + $0x1d4] ss:$8 sps:$4 sm:$0xff]   ;;  %v5487_v5 = vld [vmem:[%s7755_s4 + $0x1a0] ss:$8 sps:$4 sm:$0xff]  }
  0xb9   :  { %965 = vmatprep.subr.bf16.mxu0 %v5340_v7  ;;  %v5374_v7 = vld [vmem:[%s7776_s0 + $0x1d0] ss:$8 sps:$4 sm:$0xff]  }
  0xba   :  { %1797 = vmatpush1.bf16.msra.mxu1 %v5481_v1  ;;  %v169_v1 = vand.u32 15, %v143_v62  ;;  %v5516_v62 = vld [vmem:[%s7755_s4 + $0xc4] ss:$8 sps:$4 sm:$0xff]  }
  0xbb   :  { %1798 = vmatprep.subr.bf16.mxu1 %v5482_v2  ;;  %v5427_v2 = vld [vmem:[%s7776_s0 + $0x2e4] ss:$8 sps:$4 sm:$0xff]  }
  0xbc   :  { %966 = vmatpush1.bf16.msra.mxu0 %v5338_v8  ;;  %v5379_v8 = vld [vmem:[%s7776_s0 + $0x1e4] ss:$8 sps:$4 sm:$0xff]   ;;  %vm207_vm5 = vcmp.ne.s32.totalorder %v169_v1, 15 }
  0xbd   :  { %967 = vmatprep.subr.bf16.mxu0 %v5343_v9  ;;  %v5493_v9 = vld [vmem:[%s7755_s4 + $0x1b0] ss:$8 sps:$4 sm:$0xff]   ;;  %v5520_v1 = vld [vmem:[%s7755_s4 + $0x204] ss:$8 sps:$4 sm:$0xff]  }
  0xbe   :  { %1799 = vmatpush1.bf16.msra.mxu1 %v5487_v5  ;;  %v6058_v5 = vld [vmem:[%s7777_s24 + $0x10] sm:$0xff] }
  0xbf   :  { %953 = vmatmul.mubr.bf16.gmra.mrb[4].mxu0 %v316_v15  ;;  %1800 = vmatprep.subr.bf16.mxu1 %v5488_v6  ;;  %v5499_v15 = vld [vmem:[%s7755_s4 + $0x1c0] ss:$8 sps:$4 sm:$0xff]   ;;  %v287_v6 = vrot.slane %v6058_v5, 1 }
  0xc0   :  { %968 = vmatpush1.bf16.msra.mxu0 %v5341_v13  ;;  %995 = vmatprep.mubr.bf16.mxu0 %v313_v19  ;;  %v6756_v13 = vadd.s32 8, %v6436_v10  ;;  %v5500_v19 = vld [vmem:[%s7755_s4 + $0x1d4] ss:$8 sps:$4 sm:$0xff]   ;;  %v5527_v5 = vld [vmem:[%s7755_s4 + $0xe0] ss:$8 sps:$4 sm:$0xff]  }
  0xc1   :  { %969 = vmatprep.subr.bf16.mxu0 %v5346_v14  ;;  %v5382_v14 = vld [vmem:[%s7776_s0 + $0x1f4] ss:$8 sps:$4 sm:$0xff]  }
  0xc2   :  { %v155_v21 = vand.u32 15, %v6756_v13  ;;  %1801 = vmatpush1.bf16.msra.mxu1 %v5493_v9  ;;  %v5425_v9 = vld [vmem:[%s7776_s0 + $0x2e0] ss:$8 sps:$4 sm:$0xff]  }
  0xc3   :  { %1802 = vmatprep.subr.bf16.mxu1 %v5494_v11  ;;  %v5430_v11 = vld [vmem:[%s7776_s0 + $0x2f4] ss:$8 sps:$4 sm:$0xff]  }
  0xc4   :  { %970 = vmatpush1.bf16.msra.mxu0 %v5344_v25  ;;  %v5505_v25 = vld [vmem:[%s7755_s4 + $0x1d0] ss:$8 sps:$4 sm:$0xff]   ;;  %vm205_vm4 = vcmp.ne.s32.totalorder %v155_v21, 15 }
  0xc5   :  { %971 = vmatprep.subr.bf16.mxu0 %v5349_v26  ;;  %v288_v26 = vrot.slane %v6459_v17, 1  ;;  %v319_v17 = vpack.c.bf16 %v6464_v18, %v6536_v46  ;;  %v6791_v31 = vsel %vm205_vm4, 1.0, %v6224_v22  ;;  %v5391_v18 = vld [vmem:[%s7776_s0 + $0x224] ss:$8 sps:$4 sm:$0xff]   ;;  %v5428_v21 = vld [vmem:[%s7776_s0 + $0x2f0] ss:$8 sps:$4 sm:$0xff]  }
  0xc6   :  { %1803 = vmatpush1.bf16.msra.mxu1 %v5499_v15  ;;  %v5448_v46 = vld [vmem:[%s7755_s4 + $0x10] ss:$8 sps:$4 sm:$0xff]  }
  0xc7   :  { %1804 = vmatprep.subr.bf16.mxu1 %v5500_v19  ;;  %v6905_v19 = vsel %vm207_vm5, 1.0, %v6224_v22 }
  0xc8   :  { %972 = vmatpush1.bf16.msra.mxu0 %v5347_v29  ;;  %v312_v29 = vpack.c.bf16 %v6549_v51, %v6526_v43  ;;  %v297_v43 = vsel %vm293_vm3, %v288_v26, %v290_v27  ;;  %v5386_v51 = vld [vmem:[%s7776_s0 + $0x210] ss:$8 sps:$4 sm:$0xff]  }
  0xc9   :  { %973 = vmatprep.subr.bf16.mxu0 %v5352_v30  ;;  %v5388_v30 = vld [vmem:[%s7776_s0 + $0x214] ss:$8 sps:$4 sm:$0xff]  }
  0xca   :  { %1805 = vmatpush1.bf16.msra.mxu1 %v5505_v25  ;;  %v5444_v25 = vld [vmem:[%s7755_s4 + $0x4] ss:$8 sps:$4 sm:$0xff]  }
  0xcc   :  { %974 = vmatpush1.bf16.msra.mxu0 %v5350_v33  ;;  %v305_v33 = vmul.f32 %v6791_v31, %v297_v43  ;;  %v5450_v43 = vld [vmem:[%s7755_s4 + $0x14] ss:$8 sps:$4 sm:$0xff]  }
  0xcd   :  { %975 = vmatprep.subr.bf16.mxu0 %v5355_v34  ;;  %v299_v34 = vsel %vm293_vm3, %v286_v32, %v288_v26 }
  0xd0   :  { %976 = vmatpush1.bf16.msra.mxu0 %v5353_v37  ;;  %v318_v37 = vpack.c.bf16 %v6531_v44, %v6569_v59  ;;  %v5400_v44 = vld [vmem:[%s7776_s0 + $0x254] ss:$8 sps:$4 sm:$0xff]   ;;  %v5398_v59 = vld [vmem:[%s7776_s0 + $0x250] ss:$8 sps:$4 sm:$0xff]  }
  0xd1   :  { %977 = vmatprep.subr.bf16.mxu0 %v5358_v38  ;;  %v315_v38 = vpack.c.bf16 %v305_v33, %v299_v34  ;;  %v5456_v33 = vld [vmem:[%s7755_s4 + $0x24] ss:$8 sps:$4 sm:$0xff]  }
  0xd4   :  { %978 = vmatpush1.bf16.msra.mxu0 %v5356_v41  ;;  %v5395_v41 = vld [vmem:[%s7776_s0 + $0x240] ss:$8 sps:$4 sm:$0xff]  }
  0xd5   :  { %979 = vmatprep.subr.bf16.mxu0 %v5361_v42  ;;  %v5403_v42 = vld [vmem:[%s7776_s0 + $0x264] ss:$8 sps:$4 sm:$0xff]  }
  0xd8   :  { %980 = vmatpush1.bf16.msra.mxu0 %v5359_v48  ;;  %v5404_v48 = vld [vmem:[%s7776_s0 + $0x270] ss:$8 sps:$4 sm:$0xff]  }
  0xd9   :  { %981 = vmatprep.subr.bf16.mxu0 %v5364_v49  ;;  %v5409_v49 = vld [vmem:[%s7776_s0 + $0x284] ss:$8 sps:$4 sm:$0xff]  }
  0xdc   :  { %982 = vmatpush1.bf16.msra.mxu0 %v5362_v53  ;;  %v5410_v53 = vld [vmem:[%s7776_s0 + $0x290] ss:$8 sps:$4 sm:$0xff]  }
  0xdd   :  { %983 = vmatprep.subr.bf16.mxu0 %v5367_v54  ;;  %v5415_v54 = vld [vmem:[%s7776_s0 + $0x2a4] ss:$8 sps:$4 sm:$0xff]  }
  0xe0   :  { %984 = vmatpush1.bf16.msra.mxu0 %v5365_v58  ;;  %v5416_v58 = vld [vmem:[%s7776_s0 + $0x2b0] ss:$8 sps:$4 sm:$0xff]  }
  0xe1   :  { %985 = vmatprep.subr.bf16.mxu0 %v5370_v60  ;;  %v5421_v60 = vld [vmem:[%s7776_s0 + $0x2c4] ss:$8 sps:$4 sm:$0xff]  }
  0xe4   :  { %986 = vmatpush1.bf16.msra.mxu0 %v5368_v63  ;;  %v5424_v63 = vld [vmem:[%s7776_s0 + $0x2d4] ss:$8 sps:$4 sm:$0xff]  }
  0xe5   :  { %987 = vmatprep.subr.bf16.mxu0 %v5373_v0  ;;  %v5422_v0 = vld [vmem:[%s7776_s0 + $0x2d0] ss:$8 sps:$4 sm:$0xff]  }
  0xe8   :  { %988 = vmatpush1.bf16.msra.mxu0 %v5371_v3  ;;  %v6057_v3 = vld [vmem:[%s7777_s24 + $0x20] sm:$0xff] }
  0xe9   :  { %989 = vmatprep.subr.bf16.mxu0 %v5376_v4  ;;  %v289_v4 = vrot.slane %v6057_v3, 1  ;;  %v5521_v3 = vld [vmem:[%s7755_s4 + $0xd0] ss:$8 sps:$4 sm:$0xff]  }
  0xeb   :  { %v296_v15 = vsel %vm293_vm3, %v287_v6, %v289_v4 }
  0xec   :  { %990 = vmatpush1.bf16.msra.mxu0 %v5374_v7  ;;  %v6059_v7 = vld [vmem:[%s7777_s24 + $0x38] sm:$0xff] }
  0xed   :  { %991 = vmatprep.subr.bf16.mxu0 %v5379_v8  ;;  %v292_v8 = vrot.slane %v6059_v7, 1  ;;  %v5535_v7 = vld [vmem:[%s7755_s4 + $0xf4] ss:$8 sps:$4 sm:$0xff]  }
  0xf0   :  { %992 = vmatpush1.bf16.msra.mxu0 %v5377_v12  ;;  %v6060_v12 = vld [vmem:[%s7777_s24] sm:$0xff] }
  0xf1   :  { %993 = vmatprep.subr.bf16.mxu0 %v5382_v14  ;;  %v285_v14 = vrot.slane %v6060_v12, 1  ;;  %v7048_v12 = vsub.s32 1, %v6436_v10 }
  0xf3   :  { %v298_v26 = vsel %vm293_vm3, %v285_v14, %v287_v6  ;;  %v5533_v6 = vld [vmem:[%s7755_s4 + $0xf0] ss:$8 sps:$4 sm:$0xff]  }
  0xf4   :  { %994 = vmatpush1.bf16.msra.mxu0 %v5380_v20  ;;  %v301_v20 = vsel %vm293_vm3, %v292_v8, %v286_v32 }
  0xf5   :  { %1016 = vmatprep.subr.bf16.mxu0 %v5385_v24  ;;  %v304_v24 = vmul.f32 %v6791_v31, %v296_v15 }
  0xf7   :  { %996 = vmatmul.mubr.bf16.vlgmr.msra.gmra.mrb[0].mxu0 %v312_v29  ;;  %v291_v29 = vrot.slane %v6061_v16, 1  ;;  %v314_v32 = vpack.c.bf16 %v304_v24, %v298_v26 }
  0xf8   :  { %1017 = vmatpush1.bf16.msra.mxu0 %v5383_v28  ;;  %1005 = vmatprep.mubr.bf16.mxu0 %v319_v17  ;;  %v309_v28 = vmul.f32 %v6905_v19, %v301_v20  ;;  %v5442_v17 = vld [vmem:[%s7755_s4] ss:$8 sps:$4 sm:$0xff]  }
  0xf9   :  { %1018 = vmatprep.subr.bf16.mxu0 %v5388_v30  ;;  %v295_v30 = vsel %vm293_vm3, %v290_v27, %v292_v8  ;;  %v294_v34 = vsel %vm293_vm3, %v289_v4, %v291_v29  ;;  %v5529_v4 = vld [vmem:[%s7755_s4 + $0xe4] ss:$8 sps:$4 sm:$0xff]  }
  0xfa   :  { %v5541_v8 = vld [vmem:[#allocation2 + $0x4] ss:$8 sps:$4 sm:$0xff]  }
  0xfc   :  { %1019 = vmatpush1.bf16.msra.mxu0 %v5386_v51  ;;  %v321_v51 = vpack.c.bf16 %v309_v28, %v295_v30 }
  0xfd   :  { %1020 = vmatprep.subr.bf16.mxu0 %v5391_v18  ;;  %v300_v18 = vsel %vm293_vm3, %v291_v29, %v285_v14 }
  0xfe   :  { %v308_v27 = vmul.f32 %v6905_v19, %v300_v18 }
  0xff   :  { %1006 = vmatmul.mubr.bf16.gmra.mrb[4].mxu0 %v318_v37  ;;  %v5462_v37 = vld [vmem:[%s7755_s4 + $0x34] ss:$8 sps:$4 sm:$0xff]  }
 0x100   :  { %1021 = vmatpush1.bf16.msra.mxu0 %v5389_v35  ;;  %1048 = vmatprep.mubr.bf16.mxu0 %v315_v38  ;;  %v5454_v35 = vld [vmem:[%s7755_s4 + $0x20] ss:$8 sps:$4 sm:$0xff]   ;;  %v5460_v38 = vld [vmem:[%s7755_s4 + $0x30] ss:$8 sps:$4 sm:$0xff]  }
 0x101   :  { %1022 = vmatprep.subr.bf16.mxu0 %v5394_v36  ;;  %v320_v36 = vpack.c.bf16 %v308_v27, %v294_v34 }
 0x104   :  { %1023 = vmatpush1.bf16.msra.mxu0 %v5392_v39  ;;  %v5468_v39 = vld [vmem:[%s7755_s4 + $0x44] ss:$8 sps:$4 sm:$0xff]  }
 0x105   :  { %1024 = vmatprep.subr.bf16.mxu0 %v5397_v40  ;;  %v5466_v40 = vld [vmem:[%s7755_s4 + $0x40] ss:$8 sps:$4 sm:$0xff]  }
 0x108   :  { %1025 = vmatpush1.bf16.msra.mxu0 %v5395_v41  ;;  %v5474_v41 = vld [vmem:[%s7755_s4 + $0x54] ss:$8 sps:$4 sm:$0xff]  }
 0x109   :  { %1026 = vmatprep.subr.bf16.mxu0 %v5400_v44  ;;  %v5472_v44 = vld [vmem:[%s7755_s4 + $0x50] ss:$8 sps:$4 sm:$0xff]  }
 0x10c   :  { %1027 = vmatpush1.bf16.msra.mxu0 %v5398_v59  ;;  %v5480_v59 = vld [vmem:[%s7755_s4 + $0x64] ss:$8 sps:$4 sm:$0xff]  }
 0x10d   :  { %1028 = vmatprep.subr.bf16.mxu0 %v5403_v42  ;;  %v5478_v42 = vld [vmem:[%s7755_s4 + $0x60] ss:$8 sps:$4 sm:$0xff]  }
 0x110   :  { %1029 = vmatpush1.bf16.msra.mxu0 %v5401_v45  ;;  %v5486_v45 = vld [vmem:[%s7755_s4 + $0x74] ss:$8 sps:$4 sm:$0xff]  }
 0x111   :  { %1030 = vmatprep.subr.bf16.mxu0 %v5406_v47  ;;  %v5484_v47 = vld [vmem:[%s7755_s4 + $0x70] ss:$8 sps:$4 sm:$0xff]  }
 0x114   :  { %1031 = vmatpush1.bf16.msra.mxu0 %v5404_v48  ;;  %v5492_v48 = vld [vmem:[%s7755_s4 + $0x84] ss:$8 sps:$4 sm:$0xff]  }
 0x115   :  { %1032 = vmatprep.subr.bf16.mxu0 %v5409_v49  ;;  %v5490_v49 = vld [vmem:[%s7755_s4 + $0x80] ss:$8 sps:$4 sm:$0xff]  }
 0x118   :  { %1033 = vmatpush1.bf16.msra.mxu0 %v5407_v50  ;;  %v5498_v50 = vld [vmem:[%s7755_s4 + $0x94] ss:$8 sps:$4 sm:$0xff]  }
 0x119   :  { %1034 = vmatprep.subr.bf16.mxu0 %v5412_v52  ;;  %v5496_v52 = vld [vmem:[%s7755_s4 + $0x90] ss:$8 sps:$4 sm:$0xff]  }
 0x11c   :  { %1035 = vmatpush1.bf16.msra.mxu0 %v5410_v53  ;;  %v5504_v53 = vld [vmem:[%s7755_s4 + $0xa4] ss:$8 sps:$4 sm:$0xff]  }
 0x11d   :  { %1036 = vmatprep.subr.bf16.mxu0 %v5415_v54  ;;  %v5502_v54 = vld [vmem:[%s7755_s4 + $0xa0] ss:$8 sps:$4 sm:$0xff]  }
 0x120   :  { %1037 = vmatpush1.bf16.msra.mxu0 %v5413_v55  ;;  %v5506_v55 = vld [vmem:[%s7755_s4 + $0x1e4] ss:$8 sps:$4 sm:$0xff]  }
 0x121   :  { %1038 = vmatprep.subr.bf16.mxu0 %v5418_v56  ;;  %v5510_v56 = vld [vmem:[%s7755_s4 + $0xb4] ss:$8 sps:$4 sm:$0xff]   ;;  %1806 = vmatprep.subr.bf16.mxu1 %v5506_v55 }
 0x122   :  { %v7105_v55 = vld [vmem:[%s7778_s20 + $0x18] sm:$0xff] }
 0x124   :  { %1039 = vmatpush1.bf16.msra.mxu0 %v5416_v58  ;;  %v5511_v58 = vld [vmem:[%s7755_s4 + $0x1e0] ss:$8 sps:$4 sm:$0xff]  }
 0x125   :  { %1040 = vmatprep.subr.bf16.mxu0 %v5421_v60  ;;  %v5508_v60 = vld [vmem:[%s7755_s4 + $0xb0] ss:$8 sps:$4 sm:$0xff]   ;;  %1807 = vmatpush1.bf16.msra.mxu1 %v5511_v58 }
 0x128   :  { %1041 = vmatpush1.bf16.msra.mxu0 %v5419_v61  ;;  %v5512_v61 = vld [vmem:[%s7755_s4 + $0x1f4] ss:$8 sps:$4 sm:$0xff]  }
 0x129   :  { %1042 = vmatprep.subr.bf16.mxu0 %v5424_v63  ;;  %v5517_v63 = vld [vmem:[%s7755_s4 + $0x1f0] ss:$8 sps:$4 sm:$0xff]   ;;  %1808 = vmatprep.subr.bf16.mxu1 %v5512_v61 }
 0x12a   :  { %1809 = vmatpush1.bf16.msra.mxu1 %v5517_v63  ;;  %v5524_v63 = vld [vmem:[%s7755_s4 + $0x210] ss:$8 sps:$4 sm:$0xff]  }
 0x12b   :  { %1831 = vmatprep.subr.bf16.mxu1 %v5520_v1 }
 0x12c   :  { %1043 = vmatpush1.bf16.msra.mxu0 %v5422_v0  ;;  %v5514_v0 = vld [vmem:[%s7755_s4 + $0xc0] ss:$8 sps:$4 sm:$0xff]  }
 0x12d   :  { %1044 = vmatprep.subr.bf16.mxu0 %v5427_v2  ;;  %v5523_v2 = vld [vmem:[%s7755_s4 + $0xd4] ss:$8 sps:$4 sm:$0xff]  }
 0x130   :  { %1045 = vmatpush1.bf16.msra.mxu0 %v5425_v9  ;;  %v7042_v9 = vsub.s32 0, %v6436_v10 }
 0x131   :  { %1046 = vmatprep.subr.bf16.mxu0 %v5430_v11  ;;  %v418_v11 = vld [vmem:[%s7754_s3] sm:$0x3] }
 0x132   :  { %v423_v14 = vrot.slane %v418_v11, %v7042_v9  ;;  %v427_v15 = vrot.slane %v418_v11, %v7048_v12 }
 0x134   :  { %1047 = vmatpush1.bf16.msra.mxu0 %v5428_v21 }
 0x135   :  { %1725 = vmatprep.subr.bf16.mxu0 %v5444_v25 }
 0x137   :  { %1049 = vmatmul.mubr.bf16.vlgmr.msra.gmra.mrb[0].mxu0 %v314_v32 }
 0x138   :  { %1058 = vmatprep.mubr.bf16.mxu0 %v321_v51  ;;  %1726 = vmatpush1.bf16.msra.mxu0 %v5442_v17 }
 0x139   :  { %1727 = vmatprep.subr.bf16.mxu0 %v5450_v43  ;;  %v227_v43 = vand.u32 7, %v6756_v13 }
 0x13b   :  { %vm7112_vm6 = vcmp.ne.s32.totalorder %v227_v43, 0  ;;  %vm247_vm9 = vcmp.ne.s32.totalorder %v227_v43, 7 }
 0x13c   :  { %1728 = vmatpush1.bf16.msra.mxu0 %v5448_v46 }
 0x13d   :  { %1729 = vmatprep.subr.bf16.mxu0 %v5456_v33 }
 0x13f   :  { %1059 = vmatmul.mubr.bf16.gmra.mrb[4].mxu0 %v320_v36 }
 0x140   :  { %1730 = vmatpush1.bf16.msra.mxu0 %v5454_v35 }
 0x141   :  { %1731 = vmatprep.subr.bf16.mxu0 %v5462_v37 }
 0x144   :  { %1732 = vmatpush1.bf16.msra.mxu0 %v5460_v38 }
 0x145   :  { %1733 = vmatprep.subr.bf16.mxu0 %v5468_v39 }
 0x148   :  { %1734 = vmatpush1.bf16.msra.mxu0 %v5466_v40 }
 0x149   :  { %1735 = vmatprep.subr.bf16.mxu0 %v5474_v41  ;;  %v5518_v41 = vld [vmem:[%s7755_s4 + $0x200] ss:$8 sps:$4 sm:$0xff]  }
 0x14c   :  { %1736 = vmatpush1.bf16.msra.mxu0 %v5472_v44 }
 0x14d   :  { %1737 = vmatprep.subr.bf16.mxu0 %v5480_v59 }
 0x150   :  { %1738 = vmatpush1.bf16.msra.mxu0 %v5478_v42 }
 0x151   :  { %1739 = vmatprep.subr.bf16.mxu0 %v5486_v45 }
 0x154   :  { %1740 = vmatpush1.bf16.msra.mxu0 %v5484_v47  ;;  %v5526_v47 = vld [vmem:[%s7755_s4 + $0x214] ss:$8 sps:$4 sm:$0xff]  }
 0x155   :  { %1741 = vmatprep.subr.bf16.mxu0 %v5492_v48  ;;  %v220_v48 = vand.u32 7, %v6436_v10  ;;  %v5972_v10 = vld [vmem:[#allocation6 + $0x134] ss:$8 sps:$4 sm:$0xff]  }
 0x157   :  { %vm7122_vm7 = vcmp.ne.s32.totalorder %v220_v48, 0  ;;  %vm246_vm8 = vcmp.ne.s32.totalorder %v220_v48, 7  ;;  %v5668_v48 = vld [vmem:[#allocation2 + $0x1f0] ss:$8 sps:$4 sm:$0xff]  }
 0x158   :  { %1742 = vmatpush1.bf16.msra.mxu0 %v5490_v49  ;;  %v7090_v49 = vld [vmem:[%s7778_s20 + $0x8] sm:$0xff] }
 0x159   :  { %1743 = vmatprep.subr.bf16.mxu0 %v5498_v50  ;;  %v1905_v1 = vrot.slane %v7090_v49, 7 }
 0x15c   :  { %1744 = vmatpush1.bf16.msra.mxu0 %v5496_v52 }
 0x15d   :  { %1745 = vmatprep.subr.bf16.mxu0 %v5504_v53 }
 0x160   :  { %1746 = vmatpush1.bf16.msra.mxu0 %v5502_v54 }
 0x161   :  { %1747 = vmatprep.subr.bf16.mxu0 %v5510_v56 }
 0x164   :  { %1748 = vmatpush1.bf16.msra.mxu0 %v5508_v60 }
 0x165   :  { %1749 = vmatprep.subr.bf16.mxu0 %v5516_v62 }
 0x168   :  { %1750 = vmatpush1.bf16.msra.mxu0 %v5514_v0  ;;  %v5542_v0 = vld [vmem:[%s7755_s4 + $0x240] ss:$8 sps:$4 sm:$0xff]  }
 0x169   :  { %1751 = vmatprep.subr.bf16.mxu0 %v5523_v2 }
 0x16c   :  { %1752 = vmatpush1.bf16.msra.mxu0 %v5521_v3 }
 0x16d   :  { %1753 = vmatprep.subr.bf16.mxu0 %v5529_v4  ;;  %v5532_v4 = vld [vmem:[%s7755_s4 + $0x224] ss:$8 sps:$4 sm:$0xff]  }
 0x170   :  { %1754 = vmatpush1.bf16.msra.mxu0 %v5527_v5 }
 0x171   :  { %1755 = vmatprep.subr.bf16.mxu0 %v5535_v7 }
 0x174   :  { %1756 = vmatpush1.bf16.msra.mxu0 %v5533_v6  ;;  %v1907_v6 = vrot.slane %v7105_v55, 7 }
 0x175   :  { %2522 = vmatprep.subr.bf16.mxu0 %v5541_v8 }
 0x20a   :  { %v1050_v20 = vpop.f32.mrb[0].mxu0 }
 0x20b   :  { %v5191_v21 = vadd.f32 %v1050_v20, %v423_v14  ;;  %v1052_v24 = vpop.f32.mrb[1].mxu0 }
 0x20c   :  { %v5192_v25 = vadd.f32 %v1052_v24, %v427_v15  ;;  %v1054_v26 = vpop.f32.mrb[2].mxu0 }
 0x20d   :  { %v7052_v28 = vmax.f32 %v5191_v21, 0.0  ;;  %v5193_v16 = vadd.f32 %v1054_v26, %v423_v14  ;;  %v1056_v29 = vpop.f32.mrb[3].mxu0 }
 0x20e   :  { %v7054_v30 = vmax.f32 %v5192_v25, 0.0  ;;  %v5194_v17 = vadd.f32 %v1056_v29, %v427_v15 }
 0x20f   :  { %v7056_v32 = vmax.f32 %v5193_v16, 0.0  ;;  %v1077_v51 = vrot.slane %v7052_v28, 7  ;;  %v1101_v18 = vrot.slane %v7052_v28, 1 }
 0x210   :  { %v1072_v46 = vmax.f32 %v5194_v17, 0.0  ;;  %v1078_v27 = vrot.slane %v7054_v30, 7  ;;  %v1102_v36 = vrot.slane %v7054_v30, 1  ;;  %v5530_v17 = vld [vmem:[%s7755_s4 + $0x220] ss:$8 sps:$4 sm:$0xff]  }
 0x211   :  { %v1079_v33 = vrot.slane %v7056_v32, 7  ;;  %v1103_v34 = vrot.slane %v7056_v32, 1  ;;  %v1127_v35 = vpack.c.bf16 %v7056_v32, %v7052_v28  ;;  %v1909_v28 = vsel %vm268_vm1, %v1905_v1, %v1907_v6 }
 0x212   :  { %v1080_v37 = vrot.slane %v1072_v46, 7  ;;  %v1104_v38 = vrot.slane %v1072_v46, 1  ;;  %v1060_v39 = vpop.f32.mrb[4].mxu0  ;;  %v1128_v40 = vpack.c.bf16 %v1072_v46, %v7054_v30 }
 0x213   :  { %v7075_v44 = vsel %vm268_vm1, %v1077_v51, %v1079_v33  ;;  %v7081_v59 = vsel %vm293_vm3, %v1101_v18, %v1103_v34  ;;  %v5195_v42 = vadd.f32 %v1060_v39, %v423_v14  ;;  %v1062_v45 = vpop.f32.mrb[5].mxu0 }
 0x214   :  { %v5196_v50 = vadd.f32 %v1062_v45, %v427_v15  ;;  %v1064_v52 = vpop.f32.mrb[6].mxu0  ;;  %1810 = vmatprep.mubr.bf16.mxu1 %v1128_v40  ;;  %v1114_v53 = vsel %vm293_vm3, %v1102_v36, %v1104_v38  ;;  %v7100_v54 = vsel %vm268_vm1, %v1078_v27, %v1080_v37 }
 0x215   :  { %v1073_v56 = vmax.f32 %v5195_v42, 0.0  ;;  %v5197_v58 = vadd.f32 %v1064_v52, %v423_v14  ;;  %v1066_v60 = vpop.f32.mrb[7].mxu0  ;;  %1811 = vmatmul.mubr.bf16.vlgmr.msra.gmra.mrb[0].mxu1 %v1127_v35  ;;  %v5538_v35 = vld [vmem:[%s7755_s4 + $0x234] ss:$8 sps:$4 sm:$0xff]  }
 0x216   :  { %v1074_v61 = vmax.f32 %v5196_v50, 0.0  ;;  %v5198_v62 = vadd.f32 %v1066_v60, %v427_v15  ;;  %1832 = vmatpush1.bf16.msra.mxu1 %v5518_v41 }
 0x217   :  { %v1105_v2 = vrot.slane %v1073_v56, 1  ;;  %v1075_v3 = vmax.f32 %v5197_v58, 0.0  ;;  %1833 = vmatprep.subr.bf16.mxu1 %v5526_v47  ;;  %v1081_v7 = vrot.slane %v1073_v56, 7 }
 0x218   :  { %v1082_v8 = vrot.slane %v1074_v61, 7  ;;  %v1106_v11 = vrot.slane %v1074_v61, 1  ;;  %v1076_v14 = vmax.f32 %v5198_v62, 0.0 }
 0x219   :  { %v1111_v15 = vsel %vm293_vm3, %v1103_v34, %v1105_v2  ;;  %v1083_v20 = vrot.slane %v1075_v3, 7  ;;  %v1107_v21 = vrot.slane %v1075_v3, 1  ;;  %v1133_v24 = vpack.c.bf16 %v1075_v3, %v1073_v56  ;;  %v5550_v3 = vld [vmem:[%s7755_s4 + $0x254] ss:$8 sps:$4 sm:$0xff]  }
 0x21a   :  { %v7130_v25 = vmul.f32 %v6791_v31, %v1111_v15  ;;  %v1084_v26 = vrot.slane %v1076_v14, 7  ;;  %v1108_v16 = vrot.slane %v1076_v14, 1  ;;  %1834 = vmatpush1.bf16.msra.mxu1 %v5524_v63  ;;  %v1134_v29 = vpack.c.bf16 %v1076_v14, %v1074_v61  ;;  %v5559_v14 = vld [vmem:[#allocation2 + $0x34] ss:$8 sps:$4 sm:$0xff]  }
 0x21b   :  { %v1091_v46 = vsel %vm268_vm1, %v1083_v20, %v1077_v51  ;;  %1835 = vmatprep.subr.bf16.mxu1 %v5532_v4  ;;  %v1112_v34 = vsel %vm293_vm3, %v1104_v38, %v1106_v11  ;;  %v1088_v39 = vsel %vm268_vm1, %v1080_v37, %v1082_v8  ;;  %v1085_v40 = vsel %vm268_vm1, %v1081_v7, %v1083_v20  ;;  %v5554_v20 = vld [vmem:[%s7755_s4 + $0x260] ss:$8 sps:$4 sm:$0xff]  }
 0x21c   :  { %v1093_v41 = vmul.f32 %v6473_v23, %v1091_v46  ;;  %1820 = vmatprep.mubr.bf16.mxu1 %v1134_v29  ;;  %v1120_v42 = vmul.f32 %v6791_v31, %v1112_v34  ;;  %v1092_v51 = vsel %vm268_vm1, %v1084_v26, %v1078_v27  ;;  %v1086_v38 = vsel %vm268_vm1, %v1082_v8, %v1084_v26  ;;  %v5536_v27 = vld [vmem:[%s7755_s4 + $0x230] ss:$8 sps:$4 sm:$0xff]   ;;  %v5551_v8 = vld [vmem:[#allocation2 + $0x20] ss:$8 sps:$4 sm:$0xff]   ;;  %v5565_v26 = vld [vmem:[#allocation2 + $0x44] ss:$8 sps:$4 sm:$0xff]  }
 0x21d   :  { %1821 = vmatmul.mubr.bf16.gmra.mrb[4].mxu1 %v1133_v24  ;;  %v1094_v45 = vmul.f32 %v6473_v23, %v1092_v51  ;;  %v1098_v37 = vmul.f32 %v6562_v57, %v1088_v39  ;;  %v1087_v47 = vsel %vm268_vm1, %v1079_v33, %v1081_v7  ;;  %v1129_v31 = vpack.c.bf16 %v7130_v25, %v7081_v59  ;;  %v5539_v33 = vld [vmem:[#allocation2] ss:$8 sps:$4 sm:$0xff]   ;;  %v5548_v7 = vld [vmem:[%s7755_s4 + $0x250] ss:$8 sps:$4 sm:$0xff]   ;;  %v5562_v24 = vld [vmem:[%s7755_s4 + $0x274] ss:$8 sps:$4 sm:$0xff]  }
 0x21e   :  { %1836 = vmatpush1.bf16.msra.mxu1 %v5530_v17  ;;  %v1130_v50 = vpack.c.bf16 %v1120_v42, %v1114_v53  ;;  %v1125_v52 = vpack.c.bf16 %v7075_v44, %v1093_v41  ;;  %v1097_v23 = vmul.f32 %v6562_v57, %v1087_v47  ;;  %v7169_v56 = vsel %vm293_vm3, %v1106_v11, %v1108_v16  ;;  %v5544_v57 = vld [vmem:[%s7755_s4 + $0x244] ss:$8 sps:$4 sm:$0xff]   ;;  %v5547_v44 = vld [vmem:[#allocation2 + $0x14] ss:$8 sps:$4 sm:$0xff]   ;;  %v5563_v29 = vld [vmem:[#allocation2 + $0x40] ss:$8 sps:$4 sm:$0xff]  }
 0x21f   :  { %1837 = vmatprep.subr.bf16.mxu1 %v5538_v35  ;;  %v1126_v32 = vpack.c.bf16 %v7100_v54, %v1094_v45  ;;  %v1132_v58 = vpack.c.bf16 %v1086_v38, %v1098_v37  ;;  %v1116_v53 = vsel %vm293_vm3, %v1108_v16, %v1102_v36  ;;  %v7178_v60 = vsel %vm293_vm3, %v1105_v2, %v1107_v21  ;;  %v5545_v2 = vld [vmem:[#allocation2 + $0x10] ss:$8 sps:$4 sm:$0xff]   ;;  %v5556_v11 = vld [vmem:[%s7755_s4 + $0x264] ss:$8 sps:$4 sm:$0xff]   ;;  %v5571_v46 = vld [vmem:[#allocation2 + $0x54] ss:$8 sps:$4 sm:$0xff]  }
 0x220   :  { %1863 = vmatprep.mubr.bf16.mxu1 %v1130_v50  ;;  %v1131_v61 = vpack.c.bf16 %v1085_v40, %v1097_v23  ;;  %v7184_v54 = vmul.f32 %v6905_v19, %v1116_v53  ;;  %v1115_v30 = vsel %vm293_vm3, %v1107_v21, %v1101_v18  ;;  %v7193_v36 = vsel %vm7112_vm6, 1.0, %v6224_v22  ;;  %v5557_v21 = vld [vmem:[#allocation2 + $0x30] ss:$8 sps:$4 sm:$0xff]   ;;  %v5568_v17 = vld [vmem:[%s7755_s4 + $0x284] ss:$8 sps:$4 sm:$0xff]  }
 0x221   :  { %1757 = vmatprep.mubr.bf16.mxu0 %v1126_v32  ;;  %v7196_v62 = vmul.f32 %v6905_v19, %v1115_v30  ;;  %v7201_v63 = vsel %vm7122_vm7, 1.0, %v6224_v22  ;;  %v1911_v18 = vsel %vm268_vm1, %v1907_v6, %v1905_v1  ;;  %v5553_v1 = vld [vmem:[#allocation2 + $0x24] ss:$8 sps:$4 sm:$0xff]   ;;  %v1915_v6 = vmul.f32 %v7193_v36, %v1909_v28  ;;  %v5560_v16 = vld [vmem:[%s7755_s4 + $0x270] ss:$8 sps:$4 sm:$0xff]  }
 0x222   :  { %1838 = vmatpush1.bf16.msra.mxu1 %v5536_v27  ;;  %1758 = vmatmul.mubr.bf16.vlgmr.msra.gmra.mrb[8].mxu0 %v1125_v52  ;;  %v1136_v19 = vpack.c.bf16 %v7184_v54, %v7169_v56  ;;  %v1913_v5 = vmul.f32 %v7201_v63, %v1911_v18  ;;  %v5566_v34 = vld [vmem:[%s7755_s4 + $0x280] ss:$8 sps:$4 sm:$0xff]   ;;  %v5569_v35 = vld [vmem:[#allocation2 + $0x50] ss:$8 sps:$4 sm:$0xff]   ;;  %v5574_v39 = vld [vmem:[%s7755_s4 + $0x294] ss:$8 sps:$4 sm:$0xff]   ;;  %v1931_v54 = vpack.c.bf16 %v7105_v55, %v7090_v49 }
 0x223   :  { %2523 = vmatpush1.bf16.msra.mxu0 %v5539_v33  ;;  %1767 = vmatprep.mubr.bf16.mxu0 %v1132_v58  ;;  %v1135_v4 = vpack.c.bf16 %v7196_v62, %v7178_v60  ;;  %v5577_v40 = vld [vmem:[#allocation2 + $0x64] ss:$8 sps:$4 sm:$0xff]   ;;  %v5572_v41 = vld [vmem:[%s7755_s4 + $0x290] ss:$8 sps:$4 sm:$0xff]   ;;  %v5575_v42 = vld [vmem:[#allocation2 + $0x60] ss:$8 sps:$4 sm:$0xff]  }
 0x224   :  { %1839 = vmatprep.subr.bf16.mxu1 %v5544_v57  ;;  %2524 = vmatprep.subr.bf16.mxu0 %v5547_v44  ;;  %v1929_v15 = vpack.c.bf16 %v1915_v6, %v1913_v5  ;;  %v5580_v51 = vld [vmem:[%s7755_s4 + $0x2a4] ss:$8 sps:$4 sm:$0xff]   ;;  %v5583_v38 = vld [vmem:[#allocation2 + $0x74] ss:$8 sps:$4 sm:$0xff]   ;;  %v5578_v45 = vld [vmem:[%s7755_s4 + $0x2a0] ss:$8 sps:$4 sm:$0xff]  }
 0x225   :  { %v5581_v37 = vld [vmem:[#allocation2 + $0x70] ss:$8 sps:$4 sm:$0xff]   ;;  %v5586_v47 = vld [vmem:[%s7755_s4 + $0x2b4] ss:$8 sps:$4 sm:$0xff]   ;;  %v5589_v50 = vld [vmem:[#allocation2 + $0x84] ss:$8 sps:$4 sm:$0xff]  }
 0x226   :  { %1840 = vmatpush1.bf16.msra.mxu1 %v5542_v0  ;;  %v5584_v27 = vld [vmem:[%s7755_s4 + $0x2b0] ss:$8 sps:$4 sm:$0xff]   ;;  %v5587_v52 = vld [vmem:[#allocation2 + $0x80] ss:$8 sps:$4 sm:$0xff]   ;;  %v5592_v23 = vld [vmem:[%s7755_s4 + $0x2c4] ss:$8 sps:$4 sm:$0xff]  }
 0x227   :  { %2525 = vmatpush1.bf16.msra.mxu0 %v5545_v2  ;;  %1841 = vmatprep.subr.bf16.mxu1 %v5550_v3  ;;  %v5595_v32 = vld [vmem:[#allocation2 + $0x94] ss:$8 sps:$4 sm:$0xff]   ;;  %v5590_v33 = vld [vmem:[%s7755_s4 + $0x2c0] ss:$8 sps:$4 sm:$0xff]   ;;  %v5593_v58 = vld [vmem:[#allocation2 + $0x90] ss:$8 sps:$4 sm:$0xff]  }
 0x228   :  { %2526 = vmatprep.subr.bf16.mxu0 %v5553_v1  ;;  %v5598_v53 = vld [vmem:[%s7755_s4 + $0x2d4] ss:$8 sps:$4 sm:$0xff]   ;;  %v5601_v57 = vld [vmem:[#allocation2 + $0xa4] ss:$8 sps:$4 sm:$0xff]   ;;  %v5596_v44 = vld [vmem:[%s7755_s4 + $0x2d0] ss:$8 sps:$4 sm:$0xff]  }
 0x229   :  { %v5604_v30 = vld [vmem:[%s7755_s4 + $0x2e4] ss:$8 sps:$4 sm:$0xff]   ;;  %v5607_v28 = vld [vmem:[#allocation2 + $0xb4] ss:$8 sps:$4 sm:$0xff]   ;;  %v5602_v18 = vld [vmem:[%s7755_s4 + $0x2e0] ss:$8 sps:$4 sm:$0xff]  }
 0x22a   :  { %1842 = vmatpush1.bf16.msra.mxu1 %v5548_v7  ;;  %1768 = vmatmul.mubr.bf16.gmra.mrb[12].mxu0 %v1131_v61  ;;  %v5599_v61 = vld [vmem:[#allocation2 + $0xa0] ss:$8 sps:$4 sm:$0xff]   ;;  %v5605_v0 = vld [vmem:[#allocation2 + $0xb0] ss:$8 sps:$4 sm:$0xff]   ;;  %v5610_v2 = vld [vmem:[%s7755_s4 + $0x2f4] ss:$8 sps:$4 sm:$0xff]  }
 0x22b   :  { %2527 = vmatpush1.bf16.msra.mxu0 %v5551_v8  ;;  %1843 = vmatprep.subr.bf16.mxu1 %v5556_v11  ;;  %v5613_v3 = vld [vmem:[#allocation2 + $0xc4] ss:$8 sps:$4 sm:$0xff]   ;;  %v5608_v1 = vld [vmem:[%s7755_s4 + $0x2f0] ss:$8 sps:$4 sm:$0xff]   ;;  %v5611_v5 = vld [vmem:[#allocation2 + $0xc0] ss:$8 sps:$4 sm:$0xff]  }
 0x22c   :  { %2528 = vmatprep.subr.bf16.mxu0 %v5559_v14  ;;  %2554 = vmatprep.mubr.bf16.mxu0 %v1929_v15  ;;  %v5616_v6 = vld [vmem:[#allocation2 + $0xd4] ss:$8 sps:$4 sm:$0xff]   ;;  %v7285_v7 = vld [vmem:[%s7778_s20] sm:$0xff]  ;;  %v5614_v11 = vld [vmem:[#allocation2 + $0xd0] ss:$8 sps:$4 sm:$0xff]  }
 0x22d   :  { %v7290_v8 = vld [vmem:[%s7778_s20 + $0x10] sm:$0xff]  ;;  %v1904_v14 = vrot.slane %v7285_v7, 7  ;;  %v5625_v25 = vld [vmem:[#allocation2 + $0x104] ss:$8 sps:$4 sm:$0xff]   ;;  %v5623_v56 = vld [vmem:[#allocation2 + $0x100] ss:$8 sps:$4 sm:$0xff]  }
 0x22e   :  { %1844 = vmatpush1.bf16.msra.mxu1 %v5554_v20  ;;  %v1906_v15 = vrot.slane %v7290_v8, 7  ;;  %v5619_v20 = vld [vmem:[#allocation2 + $0xe4] ss:$8 sps:$4 sm:$0xff]   ;;  %v5620_v59 = vld [vmem:[#allocation2 + $0xf0] ss:$8 sps:$4 sm:$0xff]  }
 0x22f   :  { %2529 = vmatpush1.bf16.msra.mxu0 %v5557_v21  ;;  %1845 = vmatprep.subr.bf16.mxu1 %v5562_v24  ;;  %v5617_v21 = vld [vmem:[#allocation2 + $0xe0] ss:$8 sps:$4 sm:$0xff]   ;;  %v5632_v60 = vld [vmem:[#allocation2 + $0x130] ss:$8 sps:$4 sm:$0xff]   ;;  %v5637_v62 = vld [vmem:[#allocation2 + $0x144] ss:$8 sps:$4 sm:$0xff]  }
 0x230   :  { %2530 = vmatprep.subr.bf16.mxu0 %v5565_v26  ;;  %v1908_v24 = vsel %vm268_vm1, %v1904_v14, %v1906_v15  ;;  %v1910_v26 = vsel %vm268_vm1, %v1906_v15, %v1904_v14  ;;  %v5676_v14 = vld [vmem:[#allocation2 + $0x214] ss:$8 sps:$4 sm:$0xff]   ;;  %v5674_v15 = vld [vmem:[#allocation2 + $0x210] ss:$8 sps:$4 sm:$0xff]  }
 0x232   :  { %1846 = vmatpush1.bf16.msra.mxu1 %v5560_v16  ;;  %v5622_v16 = vld [vmem:[#allocation2 + $0xf4] ss:$8 sps:$4 sm:$0xff]  }
 0x233   :  { %2531 = vmatpush1.bf16.msra.mxu0 %v5563_v29  ;;  %1847 = vmatprep.subr.bf16.mxu1 %v5568_v17  ;;  %v1912_v29 = vmul.f32 %v7201_v63, %v1910_v26  ;;  %v1914_v17 = vmul.f32 %v7193_v36, %v1908_v24  ;;  %v5682_v24 = vld [vmem:[#allocation2 + $0x234] ss:$8 sps:$4 sm:$0xff]   ;;  %v5680_v26 = vld [vmem:[#allocation2 + $0x230] ss:$8 sps:$4 sm:$0xff]  }
 0x234   :  { %2532 = vmatprep.subr.bf16.mxu0 %v5571_v46  ;;  %v5626_v46 = vld [vmem:[#allocation2 + $0x110] ss:$8 sps:$4 sm:$0xff]  }
 0x236   :  { %1848 = vmatpush1.bf16.msra.mxu1 %v5566_v34  ;;  %v5631_v34 = vld [vmem:[#allocation2 + $0x124] ss:$8 sps:$4 sm:$0xff]  }
 0x237   :  { %2533 = vmatpush1.bf16.msra.mxu0 %v5569_v35  ;;  %1849 = vmatprep.subr.bf16.mxu1 %v5574_v39  ;;  %v5629_v35 = vld [vmem:[#allocation2 + $0x120] ss:$8 sps:$4 sm:$0xff]   ;;  %v5634_v39 = vld [vmem:[#allocation2 + $0x134] ss:$8 sps:$4 sm:$0xff]  }
 0x238   :  { %2534 = vmatprep.subr.bf16.mxu0 %v5577_v40  ;;  %v5640_v40 = vld [vmem:[#allocation2 + $0x154] ss:$8 sps:$4 sm:$0xff]  }
 0x23a   :  { %1850 = vmatpush1.bf16.msra.mxu1 %v5572_v41  ;;  %v5638_v41 = vld [vmem:[#allocation2 + $0x150] ss:$8 sps:$4 sm:$0xff]  }
 0x23b   :  { %2535 = vmatpush1.bf16.msra.mxu0 %v5575_v42  ;;  %1851 = vmatprep.subr.bf16.mxu1 %v5580_v51  ;;  %v5643_v42 = vld [vmem:[#allocation2 + $0x164] ss:$8 sps:$4 sm:$0xff]   ;;  %v5641_v51 = vld [vmem:[#allocation2 + $0x160] ss:$8 sps:$4 sm:$0xff]  }
 0x23c   :  { %2536 = vmatprep.subr.bf16.mxu0 %v5583_v38  ;;  %v5646_v38 = vld [vmem:[#allocation2 + $0x174] ss:$8 sps:$4 sm:$0xff]  }
 0x23e   :  { %1852 = vmatpush1.bf16.msra.mxu1 %v5578_v45  ;;  %v5644_v45 = vld [vmem:[#allocation2 + $0x170] ss:$8 sps:$4 sm:$0xff]  }
 0x23f   :  { %2537 = vmatpush1.bf16.msra.mxu0 %v5581_v37  ;;  %1853 = vmatprep.subr.bf16.mxu1 %v5586_v47  ;;  %v5649_v37 = vld [vmem:[#allocation2 + $0x184] ss:$8 sps:$4 sm:$0xff]   ;;  %v5647_v47 = vld [vmem:[#allocation2 + $0x180] ss:$8 sps:$4 sm:$0xff]  }
 0x240   :  { %2538 = vmatprep.subr.bf16.mxu0 %v5589_v50  ;;  %v5652_v50 = vld [vmem:[#allocation2 + $0x194] ss:$8 sps:$4 sm:$0xff]  }
 0x242   :  { %1854 = vmatpush1.bf16.msra.mxu1 %v5584_v27  ;;  %v5650_v27 = vld [vmem:[#allocation2 + $0x190] ss:$8 sps:$4 sm:$0xff]  }
 0x243   :  { %2539 = vmatpush1.bf16.msra.mxu0 %v5587_v52  ;;  %1855 = vmatprep.subr.bf16.mxu1 %v5592_v23  ;;  %v5655_v52 = vld [vmem:[#allocation2 + $0x1a4] ss:$8 sps:$4 sm:$0xff]   ;;  %v5653_v23 = vld [vmem:[#allocation2 + $0x1a0] ss:$8 sps:$4 sm:$0xff]  }
 0x244   :  { %2540 = vmatprep.subr.bf16.mxu0 %v5595_v32  ;;  %v5658_v32 = vld [vmem:[#allocation2 + $0x1b4] ss:$8 sps:$4 sm:$0xff]  }
 0x246   :  { %1856 = vmatpush1.bf16.msra.mxu1 %v5590_v33  ;;  %v5656_v33 = vld [vmem:[#allocation2 + $0x1b0] ss:$8 sps:$4 sm:$0xff]  }
 0x247   :  { %2541 = vmatpush1.bf16.msra.mxu0 %v5593_v58  ;;  %1857 = vmatprep.subr.bf16.mxu1 %v5598_v53  ;;  %v5661_v58 = vld [vmem:[#allocation2 + $0x1c4] ss:$8 sps:$4 sm:$0xff]   ;;  %v5659_v53 = vld [vmem:[#allocation2 + $0x1c0] ss:$8 sps:$4 sm:$0xff]  }
 0x248   :  { %2542 = vmatprep.subr.bf16.mxu0 %v5601_v57  ;;  %v5664_v57 = vld [vmem:[#allocation2 + $0x1d4] ss:$8 sps:$4 sm:$0xff]  }
 0x24a   :  { %1858 = vmatpush1.bf16.msra.mxu1 %v5596_v44  ;;  %v5662_v44 = vld [vmem:[#allocation2 + $0x1d0] ss:$8 sps:$4 sm:$0xff]  }
 0x24b   :  { %2543 = vmatpush1.bf16.msra.mxu0 %v5599_v61  ;;  %1859 = vmatprep.subr.bf16.mxu1 %v5604_v30  ;;  %v5667_v61 = vld [vmem:[#allocation2 + $0x1e4] ss:$8 sps:$4 sm:$0xff]   ;;  %v1917_v30 = vrot.slane %v7090_v49, 1 }
 0x24c   :  { %2544 = vmatprep.subr.bf16.mxu0 %v5607_v28  ;;  %v1919_v28 = vrot.slane %v7105_v55, 1 }
 0x24e   :  { %1860 = vmatpush1.bf16.msra.mxu1 %v5602_v18  ;;  %v5665_v18 = vld [vmem:[#allocation2 + $0x1e0] ss:$8 sps:$4 sm:$0xff]   ;;  %v1921_v49 = vsel %vm293_vm3, %v1917_v30, %v1919_v28  ;;  %v1923_v55 = vsel %vm293_vm3, %v1919_v28, %v1917_v30  ;;  %v1916_v30 = vrot.slane %v7285_v7, 1  ;;  %v1918_v28 = vrot.slane %v7290_v8, 1 }
 0x24f   :  { %2545 = vmatpush1.bf16.msra.mxu0 %v5605_v0  ;;  %1861 = vmatprep.subr.bf16.mxu1 %v5610_v2  ;;  %v5670_v0 = vld [vmem:[#allocation2 + $0x1f4] ss:$8 sps:$4 sm:$0xff]   ;;  %v7318_v2 = vsel %vm246_vm8, 1.0, %v6224_v22 }
 0x250   :  { %2546 = vmatprep.subr.bf16.mxu0 %v5613_v3  ;;  %v7321_v3 = vsel %vm247_vm9, 1.0, %v6224_v22  ;;  %v1925_v13 = vmul.f32 %v7318_v2, %v1921_v49  ;;  %v5745_v49 = vld [vmem:[#allocation4 + $0x84] ss:$8 sps:$4 sm:$0xff]  }
 0x251   :  { %v1927_v43 = vmul.f32 %v7321_v3, %v1923_v55  ;;  %v5713_v55 = vld [vmem:[#allocation2 + $0x2e0] ss:$8 sps:$4 sm:$0xff]  }
 0x252   :  { %1862 = vmatpush1.bf16.msra.mxu1 %v5608_v1  ;;  %v5673_v1 = vld [vmem:[#allocation2 + $0x204] ss:$8 sps:$4 sm:$0xff]  }
 0x253   :  { %2547 = vmatpush1.bf16.msra.mxu0 %v5611_v5  ;;  %v1930_v5 = vpack.c.bf16 %v7290_v8, %v7285_v7  ;;  %v5743_v7 = vld [vmem:[#allocation4 + $0x80] ss:$8 sps:$4 sm:$0xff]   ;;  %v5748_v8 = vld [vmem:[#allocation4 + $0x94] ss:$8 sps:$4 sm:$0xff]  }
 0x254   :  { %2548 = vmatprep.subr.bf16.mxu0 %v5616_v6  ;;  %v5671_v6 = vld [vmem:[#allocation2 + $0x200] ss:$8 sps:$4 sm:$0xff]  }
 0x255   :  { %1864 = vmatmul.mubr.bf16.vlgmr.msra.gmra.mrb[0].mxu1 %v1129_v31  ;;  %v1928_v31 = vpack.c.bf16 %v1914_v17, %v1912_v29  ;;  %v5683_v29 = vld [vmem:[#allocation2 + $0x240] ss:$8 sps:$4 sm:$0xff]   ;;  %v5688_v17 = vld [vmem:[#allocation2 + $0x254] ss:$8 sps:$4 sm:$0xff]  }
 0x256   :  { %1873 = vmatprep.mubr.bf16.mxu1 %v1136_v19  ;;  %v5628_v19 = vld [vmem:[#allocation2 + $0x114] ss:$8 sps:$4 sm:$0xff]  }
 0x257   :  { %2549 = vmatpush1.bf16.msra.mxu0 %v5614_v11  ;;  %v1933_v11 = vpack.c.bf16 %v1927_v43, %v1925_v13  ;;  %v1922_v13 = vsel %vm293_vm3, %v1918_v28, %v1916_v30  ;;  %v5718_v43 = vld [vmem:[#allocation2 + $0x2f4] ss:$8 sps:$4 sm:$0xff]  }
 0x258   :  { %2550 = vmatprep.subr.bf16.mxu0 %v5619_v20  ;;  %v5679_v20 = vld [vmem:[#allocation2 + $0x224] ss:$8 sps:$4 sm:$0xff]  }
 0x25b   :  { %2551 = vmatpush1.bf16.msra.mxu0 %v5617_v21  ;;  %v5677_v21 = vld [vmem:[#allocation2 + $0x220] ss:$8 sps:$4 sm:$0xff]  }
 0x25c   :  { %2552 = vmatprep.subr.bf16.mxu0 %v5622_v16  ;;  %v5685_v16 = vld [vmem:[#allocation2 + $0x244] ss:$8 sps:$4 sm:$0xff]  }
 0x25d   :  { %1874 = vmatmul.mubr.bf16.gmra.mrb[4].mxu1 %v1135_v4  ;;  %v5635_v4 = vld [vmem:[#allocation2 + $0x140] ss:$8 sps:$4 sm:$0xff]  }
 0x25f   :  { %2553 = vmatpush1.bf16.msra.mxu0 %v5620_v59  ;;  %v5686_v59 = vld [vmem:[#allocation2 + $0x250] ss:$8 sps:$4 sm:$0xff]  }
 0x260   :  { %2565 = vmatprep.subr.bf16.mxu0 %v5625_v25  ;;  %v5691_v25 = vld [vmem:[#allocation2 + $0x264] ss:$8 sps:$4 sm:$0xff]  }
 0x262   :  { %2555 = vmatmul.mubr.bf16.vlgmr.msra.gmra.mrb[16].mxu0 %v1928_v31  ;;  %v5689_v31 = vld [vmem:[#allocation2 + $0x260] ss:$8 sps:$4 sm:$0xff]  }
 0x263   :  { %2566 = vmatpush1.bf16.msra.mxu0 %v5623_v56  ;;  %2597 = vmatprep.mubr.bf16.mxu0 %v1931_v54  ;;  %v5694_v56 = vld [vmem:[#allocation2 + $0x274] ss:$8 sps:$4 sm:$0xff]   ;;  %v5719_v54 = vld [vmem:[#allocation4] ss:$8 sps:$4 sm:$0xff]  }
 0x264   :  { %2567 = vmatprep.subr.bf16.mxu0 %v5628_v19  ;;  %v5721_v19 = vld [vmem:[#allocation4 + $0x4] ss:$8 sps:$4 sm:$0xff]  }
 0x265   :  { %3273 = vmatprep.subr.bf16.mxu1 %v5721_v19 }
 0x266   :  { %3274 = vmatpush1.bf16.msra.mxu1 %v5719_v54 }
 0x267   :  { %2568 = vmatpush1.bf16.msra.mxu0 %v5626_v46  ;;  %v5724_v46 = vld [vmem:[#allocation4 + $0x14] ss:$8 sps:$4 sm:$0xff]  }
 0x268   :  { %2569 = vmatprep.subr.bf16.mxu0 %v5631_v34  ;;  %v5692_v34 = vld [vmem:[#allocation2 + $0x270] ss:$8 sps:$4 sm:$0xff]   ;;  %3275 = vmatprep.subr.bf16.mxu1 %v5724_v46  ;;  %v1233_v46 = vld [vmem:[%s7756_s5] sm:$0x3] }
 0x26b   :  { %2570 = vmatpush1.bf16.msra.mxu0 %v5629_v35  ;;  %v5697_v35 = vld [vmem:[#allocation2 + $0x284] ss:$8 sps:$4 sm:$0xff]  }
 0x26c   :  { %2571 = vmatprep.subr.bf16.mxu0 %v5634_v39  ;;  %v5722_v39 = vld [vmem:[#allocation4 + $0x10] ss:$8 sps:$4 sm:$0xff]  }
 0x26d   :  { %3276 = vmatpush1.bf16.msra.mxu1 %v5722_v39 }
 0x26f   :  { %2572 = vmatpush1.bf16.msra.mxu0 %v5632_v60  ;;  %v5727_v60 = vld [vmem:[#allocation4 + $0x24] ss:$8 sps:$4 sm:$0xff]  }
 0x270   :  { %2573 = vmatprep.subr.bf16.mxu0 %v5637_v62  ;;  %v5695_v62 = vld [vmem:[#allocation2 + $0x280] ss:$8 sps:$4 sm:$0xff]   ;;  %3277 = vmatprep.subr.bf16.mxu1 %v5727_v60 }
 0x273   :  { %2574 = vmatpush1.bf16.msra.mxu0 %v5635_v4  ;;  %v5700_v4 = vld [vmem:[#allocation2 + $0x294] ss:$8 sps:$4 sm:$0xff]  }
 0x274   :  { %2575 = vmatprep.subr.bf16.mxu0 %v5640_v40  ;;  %v5725_v40 = vld [vmem:[#allocation4 + $0x20] ss:$8 sps:$4 sm:$0xff]  }
 0x275   :  { %3278 = vmatpush1.bf16.msra.mxu1 %v5725_v40 }
 0x277   :  { %2576 = vmatpush1.bf16.msra.mxu0 %v5638_v41  ;;  %v5730_v41 = vld [vmem:[#allocation4 + $0x34] ss:$8 sps:$4 sm:$0xff]  }
 0x278   :  { %2577 = vmatprep.subr.bf16.mxu0 %v5643_v42  ;;  %v5698_v42 = vld [vmem:[#allocation2 + $0x290] ss:$8 sps:$4 sm:$0xff]   ;;  %3279 = vmatprep.subr.bf16.mxu1 %v5730_v41 }
 0x27b   :  { %2578 = vmatpush1.bf16.msra.mxu0 %v5641_v51  ;;  %v5703_v51 = vld [vmem:[#allocation2 + $0x2a4] ss:$8 sps:$4 sm:$0xff]  }
 0x27c   :  { %2579 = vmatprep.subr.bf16.mxu0 %v5646_v38  ;;  %v5728_v38 = vld [vmem:[#allocation4 + $0x30] ss:$8 sps:$4 sm:$0xff]  }
 0x27d   :  { %3280 = vmatpush1.bf16.msra.mxu1 %v5728_v38 }
 0x27f   :  { %2580 = vmatpush1.bf16.msra.mxu0 %v5644_v45  ;;  %v5733_v45 = vld [vmem:[#allocation4 + $0x44] ss:$8 sps:$4 sm:$0xff]  }
 0x280   :  { %2581 = vmatprep.subr.bf16.mxu0 %v5649_v37  ;;  %v5701_v37 = vld [vmem:[#allocation2 + $0x2a0] ss:$8 sps:$4 sm:$0xff]   ;;  %3281 = vmatprep.subr.bf16.mxu1 %v5733_v45 }
 0x283   :  { %2582 = vmatpush1.bf16.msra.mxu0 %v5647_v47  ;;  %v5706_v47 = vld [vmem:[#allocation2 + $0x2b4] ss:$8 sps:$4 sm:$0xff]  }
 0x284   :  { %2583 = vmatprep.subr.bf16.mxu0 %v5652_v50  ;;  %v5731_v50 = vld [vmem:[#allocation4 + $0x40] ss:$8 sps:$4 sm:$0xff]  }
 0x285   :  { %3282 = vmatpush1.bf16.msra.mxu1 %v5731_v50 }
 0x287   :  { %2584 = vmatpush1.bf16.msra.mxu0 %v5650_v27  ;;  %v5736_v27 = vld [vmem:[#allocation4 + $0x54] ss:$8 sps:$4 sm:$0xff]  }
 0x288   :  { %2585 = vmatprep.subr.bf16.mxu0 %v5655_v52  ;;  %v5704_v52 = vld [vmem:[#allocation2 + $0x2b0] ss:$8 sps:$4 sm:$0xff]   ;;  %3283 = vmatprep.subr.bf16.mxu1 %v5736_v27 }
 0x28b   :  { %2586 = vmatpush1.bf16.msra.mxu0 %v5653_v23  ;;  %v5709_v23 = vld [vmem:[#allocation2 + $0x2c4] ss:$8 sps:$4 sm:$0xff]  }
 0x28c   :  { %2587 = vmatprep.subr.bf16.mxu0 %v5658_v32  ;;  %v5734_v32 = vld [vmem:[#allocation4 + $0x50] ss:$8 sps:$4 sm:$0xff]  }
 0x28d   :  { %3284 = vmatpush1.bf16.msra.mxu1 %v5734_v32 }
 0x28f   :  { %2588 = vmatpush1.bf16.msra.mxu0 %v5656_v33  ;;  %v5739_v33 = vld [vmem:[#allocation4 + $0x64] ss:$8 sps:$4 sm:$0xff]  }
 0x290   :  { %2589 = vmatprep.subr.bf16.mxu0 %v5661_v58  ;;  %v5707_v58 = vld [vmem:[#allocation2 + $0x2c0] ss:$8 sps:$4 sm:$0xff]   ;;  %3285 = vmatprep.subr.bf16.mxu1 %v5739_v33 }
 0x293   :  { %2590 = vmatpush1.bf16.msra.mxu0 %v5659_v53  ;;  %v5712_v53 = vld [vmem:[#allocation2 + $0x2d4] ss:$8 sps:$4 sm:$0xff]  }
 0x294   :  { %2591 = vmatprep.subr.bf16.mxu0 %v5664_v57  ;;  %v5737_v57 = vld [vmem:[#allocation4 + $0x60] ss:$8 sps:$4 sm:$0xff]  }
 0x295   :  { %3286 = vmatpush1.bf16.msra.mxu1 %v5737_v57 }
 0x297   :  { %2592 = vmatpush1.bf16.msra.mxu0 %v5662_v44  ;;  %v5742_v44 = vld [vmem:[#allocation4 + $0x74] ss:$8 sps:$4 sm:$0xff]  }
 0x298   :  { %2593 = vmatprep.subr.bf16.mxu0 %v5667_v61  ;;  %v5710_v61 = vld [vmem:[#allocation2 + $0x2d0] ss:$8 sps:$4 sm:$0xff]   ;;  %3287 = vmatprep.subr.bf16.mxu1 %v5742_v44 }
 0x29b   :  { %2594 = vmatpush1.bf16.msra.mxu0 %v5665_v18  ;;  %v5715_v18 = vld [vmem:[#allocation2 + $0x2e4] ss:$8 sps:$4 sm:$0xff]  }
 0x29c   :  { %2595 = vmatprep.subr.bf16.mxu0 %v5670_v0  ;;  %v5740_v0 = vld [vmem:[#allocation4 + $0x70] ss:$8 sps:$4 sm:$0xff]  }
 0x29d   :  { %3288 = vmatpush1.bf16.msra.mxu1 %v5740_v0  ;;  %v5763_v0 = vld [vmem:[#allocation4 + $0xe4] ss:$8 sps:$4 sm:$0xff]  }
 0x29e   :  { %3289 = vmatprep.subr.bf16.mxu1 %v5745_v49  ;;  %v5761_v49 = vld [vmem:[#allocation4 + $0xe0] ss:$8 sps:$4 sm:$0xff]  }
 0x29f   :  { %2596 = vmatpush1.bf16.msra.mxu0 %v5668_v48  ;;  %v1920_v48 = vsel %vm293_vm3, %v1916_v30, %v1918_v28  ;;  %v5760_v28 = vld [vmem:[#allocation4 + $0xd4] ss:$8 sps:$4 sm:$0xff]  }
 0x2a0   :  { %2608 = vmatprep.subr.bf16.mxu0 %v5673_v1  ;;  %v1924_v1 = vmul.f32 %v7318_v2, %v1920_v48  ;;  %v5764_v48 = vld [vmem:[#allocation4 + $0xf0] ss:$8 sps:$4 sm:$0xff]  }
 0x2a1   :  { %3290 = vmatpush1.bf16.msra.mxu1 %v5743_v7 }
 0x2a2   :  { %2598 = vmatmul.mubr.bf16.vlgmr.msra.gmra.mrb[16].mxu0 %v1930_v5  ;;  %v1926_v5 = vmul.f32 %v7321_v3, %v1922_v13  ;;  %3291 = vmatprep.subr.bf16.mxu1 %v5748_v8  ;;  %v5769_v13 = vld [vmem:[#allocation4 + $0x104] ss:$8 sps:$4 sm:$0xff]  }
 0x2a3   :  { %2609 = vmatpush1.bf16.msra.mxu0 %v5671_v6  ;;  %2640 = vmatprep.mubr.bf16.mxu0 %v1933_v11  ;;  %v5716_v6 = vld [vmem:[#allocation2 + $0x2f0] ss:$8 sps:$4 sm:$0xff]  }
 0x2a4   :  { %2610 = vmatprep.subr.bf16.mxu0 %v5676_v14  ;;  %v5746_v11 = vld [vmem:[#allocation4 + $0x90] ss:$8 sps:$4 sm:$0xff]   ;;  %v5751_v14 = vld [vmem:[#allocation4 + $0xa4] ss:$8 sps:$4 sm:$0xff]  }
 0x2a5   :  { %3292 = vmatpush1.bf16.msra.mxu1 %v5746_v11 }
 0x2a6   :  { %3293 = vmatprep.subr.bf16.mxu1 %v5751_v14 }
 0x2a7   :  { %2611 = vmatpush1.bf16.msra.mxu0 %v5674_v15  ;;  %v1932_v15 = vpack.c.bf16 %v1926_v5, %v1924_v1 }
 0x2a8   :  { %2612 = vmatprep.subr.bf16.mxu0 %v5679_v20  ;;  %v5749_v20 = vld [vmem:[#allocation4 + $0xa0] ss:$8 sps:$4 sm:$0xff]  }
 0x2a9   :  { %3294 = vmatpush1.bf16.msra.mxu1 %v5749_v20 }
 0x2ab   :  { %2613 = vmatpush1.bf16.msra.mxu0 %v5677_v21  ;;  %v5754_v21 = vld [vmem:[#allocation4 + $0xb4] ss:$8 sps:$4 sm:$0xff]  }
 0x2ac   :  { %2614 = vmatprep.subr.bf16.mxu0 %v5682_v24  ;;  %v5752_v24 = vld [vmem:[#allocation4 + $0xb0] ss:$8 sps:$4 sm:$0xff]   ;;  %3295 = vmatprep.subr.bf16.mxu1 %v5754_v21 }
 0x2ad   :  { %3296 = vmatpush1.bf16.msra.mxu1 %v5752_v24 }
 0x2af   :  { %2615 = vmatpush1.bf16.msra.mxu0 %v5680_v26  ;;  %v5757_v26 = vld [vmem:[#allocation4 + $0xc4] ss:$8 sps:$4 sm:$0xff]  }
 0x2b0   :  { %2616 = vmatprep.subr.bf16.mxu0 %v5685_v16  ;;  %v5755_v16 = vld [vmem:[#allocation4 + $0xc0] ss:$8 sps:$4 sm:$0xff]   ;;  %3297 = vmatprep.subr.bf16.mxu1 %v5757_v26 }
 0x2b1   :  { %3298 = vmatpush1.bf16.msra.mxu1 %v5755_v16 }
 0x2b2   :  { %3299 = vmatprep.subr.bf16.mxu1 %v5760_v28 }
 0x2b3   :  { %2617 = vmatpush1.bf16.msra.mxu0 %v5683_v29 }
 0x2b4   :  { %2618 = vmatprep.subr.bf16.mxu0 %v5688_v17 }
 0x2b7   :  { %2619 = vmatpush1.bf16.msra.mxu0 %v5686_v59 }
 0x2b8   :  { %2620 = vmatprep.subr.bf16.mxu0 %v5691_v25 }
 0x2bb   :  { %2621 = vmatpush1.bf16.msra.mxu0 %v5689_v31 }
 0x2bc   :  { %2622 = vmatprep.subr.bf16.mxu0 %v5694_v56 }
 0x2bf   :  { %2623 = vmatpush1.bf16.msra.mxu0 %v5692_v34  ;;  %v1238_v34 = vrot.slane %v1233_v46, %v7042_v9 }
 0x2c0   :  { %2624 = vmatprep.subr.bf16.mxu0 %v5697_v35  ;;  %v1242_v35 = vrot.slane %v1233_v46, %v7048_v12 }
 0x2c3   :  { %2625 = vmatpush1.bf16.msra.mxu0 %v5695_v62 }
 0x2c4   :  { %2626 = vmatprep.subr.bf16.mxu0 %v5700_v4 }
 0x2c7   :  { %2627 = vmatpush1.bf16.msra.mxu0 %v5698_v42 }
 0x2c8   :  { %2628 = vmatprep.subr.bf16.mxu0 %v5703_v51 }
 0x2cb   :  { %2629 = vmatpush1.bf16.msra.mxu0 %v5701_v37 }
 0x2cc   :  { %2630 = vmatprep.subr.bf16.mxu0 %v5706_v47 }
 0x2cf   :  { %2631 = vmatpush1.bf16.msra.mxu0 %v5704_v52 }
 0x2d0   :  { %2632 = vmatprep.subr.bf16.mxu0 %v5709_v23 }
 0x2d3   :  { %2633 = vmatpush1.bf16.msra.mxu0 %v5707_v58 }
 0x2d4   :  { %2634 = vmatprep.subr.bf16.mxu0 %v5712_v53 }
 0x2d7   :  { %2635 = vmatpush1.bf16.msra.mxu0 %v5710_v61 }
 0x2d8   :  { %2636 = vmatprep.subr.bf16.mxu0 %v5715_v18  ;;  %v5758_v18 = vld [vmem:[#allocation4 + $0xd0] ss:$8 sps:$4 sm:$0xff]  }
 0x2d9   :  { %3300 = vmatpush1.bf16.msra.mxu1 %v5758_v18  ;;  %v5767_v18 = vld [vmem:[#allocation4 + $0x100] ss:$8 sps:$4 sm:$0xff]  }
 0x2da   :  { %3301 = vmatprep.subr.bf16.mxu1 %v5763_v0 }
 0x2db   :  { %2637 = vmatpush1.bf16.msra.mxu0 %v5713_v55  ;;  %v5766_v55 = vld [vmem:[#allocation4 + $0xf4] ss:$8 sps:$4 sm:$0xff]  }
 0x2dc   :  { %2638 = vmatprep.subr.bf16.mxu0 %v5718_v43  ;;  %v2030_v43 = vld [vmem:[%s7758_s7] sm:$0x3] }
 0x2dd   :  { %3302 = vmatpush1.bf16.msra.mxu1 %v5761_v49  ;;  %v2035_v7 = vrot.slane %v2030_v43, %v7042_v9  ;;  %v2039_v8 = vrot.slane %v2030_v43, %v7048_v12  ;;  %v5772_v49 = vld [vmem:[#allocation4 + $0x114] ss:$8 sps:$4 sm:$0xff]   ;;  %v5773_v43 = vld [vmem:[#allocation4 + $0x120] ss:$8 sps:$4 sm:$0xff]  }
 0x2de   :  { %3303 = vmatprep.subr.bf16.mxu1 %v5766_v55 }
 0x2df   :  { %2639 = vmatpush1.bf16.msra.mxu0 %v5716_v6 }
 0x2e1   :  { %3304 = vmatpush1.bf16.msra.mxu1 %v5764_v48 }
 0x2e2   :  { %2641 = vmatmul.mubr.bf16.vlgmr.msra.gmra.mrb[16].mxu0 %v1932_v15  ;;  %3316 = vmatprep.subr.bf16.mxu1 %v5769_v13  ;;  %v5770_v13 = vld [vmem:[#allocation4 + $0x110] ss:$8 sps:$4 sm:$0xff]  }
 0x2f5   :  { %v1759_v29 = vpop.f32.mrb[8].mxu0 }
 0x2f6   :  { %v1761_v17 = vpop.f32.mrb[9].mxu0  ;;  %v1760_v39 = vadd.f32 %v1759_v29, %v1238_v34 }
 0x2f7   :  { %v1763_v59 = vpop.f32.mrb[10].mxu0  ;;  %v1762_v60 = vadd.f32 %v1761_v17, %v1242_v35 }
 0x2f8   :  { %v1765_v25 = vpop.f32.mrb[11].mxu0  ;;  %v1764_v4 = vadd.f32 %v1763_v59, %v1238_v34 }
 0x2f9   :  { %v1766_v42 = vadd.f32 %v1765_v25, %v1242_v35 }
 0x2fd   :  { %v1769_v31 = vpop.f32.mrb[12].mxu0 }
 0x2fe   :  { %v1771_v56 = vpop.f32.mrb[13].mxu0  ;;  %v1770_v50 = vadd.f32 %v1769_v31, %v1238_v34 }
 0x2ff   :  { %v1773_v54 = vpop.f32.mrb[14].mxu0  ;;  %v1772_v27 = vadd.f32 %v1771_v56, %v1242_v35 }
 0x300   :  { %v1775_v19 = vpop.f32.mrb[15].mxu0  ;;  %v1774_v23 = vadd.f32 %v1773_v54, %v1238_v34 }
 0x301   :  { %v1776_v58 = vadd.f32 %v1775_v19, %v1242_v35 }
 0x328   :  { %v1865_v62 = vpop.f32.mrb[0].mxu1 }
 0x329   :  { %v7344_v40 = vadd.f32 %v1865_v62, %v1760_v39  ;;  %v1867_v41 = vpop.f32.mrb[1].mxu1 }
 0x32a   :  { %v7346_v51 = vadd.f32 %v1867_v41, %v1762_v60  ;;  %v1869_v38 = vpop.f32.mrb[2].mxu1 }
 0x32b   :  { %v7348_v45 = vadd.f32 %v1869_v38, %v1764_v4  ;;  %v1871_v37 = vpop.f32.mrb[3].mxu1 }
 0x32c   :  { %v7350_v47 = vadd.f32 %v1871_v37, %v1766_v42 }
 0x330   :  { %v1875_v52 = vpop.f32.mrb[4].mxu1 }
 0x331   :  { %v7352_v32 = vadd.f32 %v1875_v52, %v1770_v50  ;;  %v1877_v33 = vpop.f32.mrb[5].mxu1 }
 0x332   :  { %v7354_v53 = vadd.f32 %v1877_v33, %v1772_v27  ;;  %v1879_v57 = vpop.f32.mrb[6].mxu1 }
 0x333   :  { %v7356_v44 = vadd.f32 %v1879_v57, %v1774_v23  ;;  %v1881_v61 = vpop.f32.mrb[7].mxu1 }
 0x334   :  { %v7358_v30 = vadd.f32 %v1881_v61, %v1776_v58 }
 0x3b5   :  { %v2642_v1 = vpop.f32.mrb[16].mxu0 }
 0x3b6   :  { %v5215_v5 = vadd.f32 %v2642_v1, %v2035_v7  ;;  %v2644_v6 = vpop.f32.mrb[17].mxu0  ;;  %v5779_v1 = vld [vmem:[#allocation4 + $0x140] ss:$8 sps:$4 sm:$0xff]  }
 0x3b7   :  { %v5216_v11 = vadd.f32 %v2644_v6, %v2039_v8  ;;  %v2646_v14 = vpop.f32.mrb[18].mxu0  ;;  %v5865_v6 = vld [vmem:[%s7761_s10] ss:$8 sps:$4 sm:$0xff]  }
 0x3b8   :  { %v7365_v15 = vmax.f32 %v5215_v5, 0.0  ;;  %v5217_v20 = vadd.f32 %v2646_v14, %v2035_v7  ;;  %v2648_v21 = vpop.f32.mrb[19].mxu0  ;;  %v5778_v7 = vld [vmem:[#allocation4 + $0x134] ss:$8 sps:$4 sm:$0xff]   ;;  %v5782_v14 = vld [vmem:[#allocation4 + $0x150] ss:$8 sps:$4 sm:$0xff]  }
 0x3b9   :  { %v2652_v24 = vmax.f32 %v5216_v11, 0.0  ;;  %v5218_v26 = vadd.f32 %v2648_v21, %v2039_v8  ;;  %v5781_v8 = vld [vmem:[#allocation4 + $0x144] ss:$8 sps:$4 sm:$0xff]   ;;  %v5784_v5 = vld [vmem:[#allocation4 + $0x154] ss:$8 sps:$4 sm:$0xff]  }
 0x3ba   :  { %v7367_v16 = vmax.f32 %v5217_v20, 0.0  ;;  %v2655_v29 = vrot.slane %v7365_v15, 7  ;;  %v2667_v17 = vrot.slane %v7365_v15, 1  ;;  %v5867_v11 = vld [vmem:[%s7761_s10 + $0x4] ss:$8 sps:$4 sm:$0xff]  }
 0x3bb   :  { %v2654_v59 = vmax.f32 %v5218_v26, 0.0  ;;  %v2656_v25 = vrot.slane %v2652_v24, 7  ;;  %v2668_v19 = vrot.slane %v2652_v24, 1  ;;  %v5870_v20 = vld [vmem:[%s7761_s10 + $0x14] ss:$8 sps:$4 sm:$0xff]   ;;  %3616 = vmatprep.subr.bf16.mxu0 %v5867_v11 }
 0x3bc   :  { %v2657_v31 = vrot.slane %v7367_v16, 7  ;;  %v2669_v56 = vrot.slane %v7367_v16, 1  ;;  %v2681_v54 = vpack.c.bf16 %v7367_v16, %v7365_v15  ;;  %v5787_v21 = vld [vmem:[#allocation4 + $0x164] ss:$8 sps:$4 sm:$0xff]   ;;  %3617 = vmatpush1.bf16.msra.mxu0 %v5865_v6  ;;  %v5916_v6 = vld [vmem:[%s7761_s10 + $0xa0] ss:$8 sps:$4 sm:$0xff]  }
 0x3bd   :  { %v2658_v46 = vrot.slane %v2654_v59, 7  ;;  %v2670_v34 = vrot.slane %v2654_v59, 1  ;;  %v2682_v35 = vpack.c.bf16 %v2654_v59, %v2652_v24  ;;  %v5868_v24 = vld [vmem:[%s7761_s10 + $0x10] ss:$8 sps:$4 sm:$0xff]   ;;  %3618 = vmatprep.subr.bf16.mxu0 %v5870_v20  ;;  %v5873_v26 = vld [vmem:[%s7761_s10 + $0x24] ss:$8 sps:$4 sm:$0xff]  }
 0x3be   :  { %v2659_v39 = vsel %vm268_vm1, %v2655_v29, %v2657_v31  ;;  %v2661_v60 = vsel %vm268_vm1, %v2657_v31, %v2655_v29  ;;  %v2671_v62 = vsel %vm293_vm3, %v2667_v17, %v2669_v56  ;;  %v2673_v4 = vsel %vm293_vm3, %v2669_v56, %v2667_v17  ;;  %v5785_v29 = vld [vmem:[#allocation4 + $0x160] ss:$8 sps:$4 sm:$0xff]   ;;  %v5790_v17 = vld [vmem:[#allocation4 + $0x174] ss:$8 sps:$4 sm:$0xff]   ;;  %v5788_v31 = vld [vmem:[#allocation4 + $0x170] ss:$8 sps:$4 sm:$0xff]  }
 0x3bf   :  { %v2663_v41 = vmul.f32 %v7201_v63, %v2661_v60  ;;  %v2665_v42 = vmul.f32 %v7193_v36, %v2659_v39  ;;  %v2660_v38 = vsel %vm268_vm1, %v2656_v25, %v2658_v46  ;;  %v2662_v37 = vsel %vm268_vm1, %v2658_v46, %v2656_v25  ;;  %v5871_v59 = vld [vmem:[%s7761_s10 + $0x20] ss:$8 sps:$4 sm:$0xff]   ;;  %v5876_v25 = vld [vmem:[%s7761_s10 + $0x34] ss:$8 sps:$4 sm:$0xff]   ;;  %v5793_v56 = vld [vmem:[#allocation4 + $0x184] ss:$8 sps:$4 sm:$0xff]  }
 0x3c0   :  { %v2664_v50 = vmul.f32 %v7201_v63, %v2662_v37  ;;  %v2666_v27 = vmul.f32 %v7193_v36, %v2660_v38  ;;  %v2672_v52 = vsel %vm293_vm3, %v2668_v19, %v2670_v34  ;;  %v2674_v23 = vsel %vm293_vm3, %v2670_v34, %v2668_v19  ;;  %3619 = vmatpush1.bf16.msra.mxu0 %v5868_v24  ;;  %v5874_v19 = vld [vmem:[%s7761_s10 + $0x30] ss:$8 sps:$4 sm:$0xff]   ;;  %v5882_v46 = vld [vmem:[%s7761_s10 + $0x44] ss:$8 sps:$4 sm:$0xff]   ;;  %v5791_v34 = vld [vmem:[#allocation4 + $0x180] ss:$8 sps:$4 sm:$0xff]  }
 0x3c1   :  { %v2679_v33 = vpack.c.bf16 %v2665_v42, %v2663_v41  ;;  %v7396_v58 = vmul.f32 %v7318_v2, %v2672_v52  ;;  %v7399_v57 = vmul.f32 %v7321_v3, %v2674_v23  ;;  %v7402_v61 = vmul.f32 %v7318_v2, %v2671_v62  ;;  %v5775_v2 = vld [vmem:[#allocation4 + $0x124] ss:$8 sps:$4 sm:$0xff]   ;;  %3620 = vmatprep.subr.bf16.mxu0 %v5873_v26  ;;  %v5880_v39 = vld [vmem:[%s7761_s10 + $0x40] ss:$8 sps:$4 sm:$0xff]   ;;  %v5888_v60 = vld [vmem:[%s7761_s10 + $0x54] ss:$8 sps:$4 sm:$0xff]  }
 0x3c2   :  { %v2680_v28 = vpack.c.bf16 %v2666_v27, %v2664_v50  ;;  %v7405_v0 = vmul.f32 %v7321_v3, %v2673_v4  ;;  %v5776_v3 = vld [vmem:[#allocation4 + $0x130] ss:$8 sps:$4 sm:$0xff]   ;;  %v5799_v4 = vld [vmem:[#allocation4 + $0x1a4] ss:$8 sps:$4 sm:$0xff]   ;;  %v5797_v38 = vld [vmem:[#allocation4 + $0x1a0] ss:$8 sps:$4 sm:$0xff]  }
 0x3c3   :  { %v2684_v55 = vpack.c.bf16 %v7399_v57, %v7396_v58  ;;  %v5794_v62 = vld [vmem:[#allocation4 + $0x190] ss:$8 sps:$4 sm:$0xff]   ;;  %v5894_v42 = vld [vmem:[%s7761_s10 + $0x64] ss:$8 sps:$4 sm:$0xff]   ;;  %v5802_v37 = vld [vmem:[#allocation4 + $0x1b4] ss:$8 sps:$4 sm:$0xff]  }
 0x3c4   :  { %3305 = vmatprep.mubr.bf16.mxu1 %v2680_v28  ;;  %v2683_v48 = vpack.c.bf16 %v7405_v0, %v7402_v61  ;;  %3621 = vmatpush1.bf16.msra.mxu0 %v5871_v59  ;;  %v5886_v41 = vld [vmem:[%s7761_s10 + $0x50] ss:$8 sps:$4 sm:$0xff]   ;;  %v5892_v50 = vld [vmem:[%s7761_s10 + $0x60] ss:$8 sps:$4 sm:$0xff]   ;;  %v5900_v27 = vld [vmem:[%s7761_s10 + $0x74] ss:$8 sps:$4 sm:$0xff]  }
 0x3c5   :  { %3306 = vmatmul.mubr.bf16.vlgmr.msra.gmra.mrb[8].mxu1 %v2679_v33  ;;  %3622 = vmatprep.subr.bf16.mxu0 %v5876_v25  ;;  %v5800_v52 = vld [vmem:[#allocation4 + $0x1b0] ss:$8 sps:$4 sm:$0xff]   ;;  %v5805_v23 = vld [vmem:[#allocation4 + $0x1c4] ss:$8 sps:$4 sm:$0xff]   ;;  %v5924_v11 = vld [vmem:[%s7761_s10 + $0xb4] ss:$8 sps:$4 sm:$0xff]  }
 0x3c6   :  { %3317 = vmatpush1.bf16.msra.mxu1 %v5767_v18  ;;  %3348 = vmatprep.mubr.bf16.mxu1 %v2682_v35  ;;  %v5796_v35 = vld [vmem:[#allocation4 + $0x194] ss:$8 sps:$4 sm:$0xff]   ;;  %v5898_v33 = vld [vmem:[%s7761_s10 + $0x70] ss:$8 sps:$4 sm:$0xff]   ;;  %v5906_v28 = vld [vmem:[%s7761_s10 + $0x84] ss:$8 sps:$4 sm:$0xff]  }
 0x3c7   :  { %3318 = vmatprep.subr.bf16.mxu1 %v5772_v49  ;;  %v5803_v18 = vld [vmem:[#allocation4 + $0x1c0] ss:$8 sps:$4 sm:$0xff]   ;;  %v5808_v49 = vld [vmem:[#allocation4 + $0x1d4] ss:$8 sps:$4 sm:$0xff]   ;;  %v5817_v20 = vld [vmem:[#allocation4 + $0x204] ss:$8 sps:$4 sm:$0xff]  }
 0x3c8   :  { %3623 = vmatpush1.bf16.msra.mxu0 %v5874_v19  ;;  %v5930_v24 = vld [vmem:[%s7761_s10 + $0xc4] ss:$8 sps:$4 sm:$0xff]   ;;  %v5815_v26 = vld [vmem:[#allocation4 + $0x200] ss:$8 sps:$4 sm:$0xff]   ;;  %v5818_v59 = vld [vmem:[#allocation4 + $0x210] ss:$8 sps:$4 sm:$0xff]  }
 0x3c9   :  { %3624 = vmatprep.subr.bf16.mxu0 %v5882_v46  ;;  %v5823_v25 = vld [vmem:[#allocation4 + $0x224] ss:$8 sps:$4 sm:$0xff]   ;;  %v5824_v19 = vld [vmem:[#allocation4 + $0x230] ss:$8 sps:$4 sm:$0xff]   ;;  %v5827_v15 = vld [vmem:[#allocation4 + $0x240] ss:$8 sps:$4 sm:$0xff]  }
 0x3ca   :  { %3319 = vmatpush1.bf16.msra.mxu1 %v5770_v13  ;;  %v5904_v13 = vld [vmem:[%s7761_s10 + $0x80] ss:$8 sps:$4 sm:$0xff]   ;;  %v5829_v46 = vld [vmem:[#allocation4 + $0x244] ss:$8 sps:$4 sm:$0xff]   ;;  %v5832_v16 = vld [vmem:[#allocation4 + $0x254] ss:$8 sps:$4 sm:$0xff]  }
 0x3cb   :  { %3320 = vmatprep.subr.bf16.mxu1 %v5775_v2  ;;  %v5912_v2 = vld [vmem:[%s7761_s10 + $0x94] ss:$8 sps:$4 sm:$0xff]   ;;  %v5835_v58 = vld [vmem:[#allocation4 + $0x264] ss:$8 sps:$4 sm:$0xff]   ;;  %v5833_v57 = vld [vmem:[#allocation4 + $0x260] ss:$8 sps:$4 sm:$0xff]  }
 0x3cc   :  { %3625 = vmatpush1.bf16.msra.mxu0 %v5880_v39  ;;  %v5839_v39 = vld [vmem:[#allocation4 + $0x280] ss:$8 sps:$4 sm:$0xff]   ;;  %v5879_v61 = vld [vmem:[#allocation6 + $0x4] ss:$8 sps:$4 sm:$0xff]  }
 0x3cd   :  { %3626 = vmatprep.subr.bf16.mxu0 %v5888_v60  ;;  %v5844_v60 = vld [vmem:[#allocation4 + $0x294] ss:$8 sps:$4 sm:$0xff]   ;;  %v5864_v0 = vld [vmem:[#allocation10] sm:$0xff]  }
 0x3ce   :  { %3321 = vmatpush1.bf16.msra.mxu1 %v5773_v43  ;;  %v5806_v43 = vld [vmem:[#allocation4 + $0x1d0] ss:$8 sps:$4 sm:$0xff]  }
 0x3cf   :  { %3322 = vmatprep.subr.bf16.mxu1 %v5778_v7  ;;  %v5811_v7 = vld [vmem:[#allocation4 + $0x1e4] ss:$8 sps:$4 sm:$0xff]  }
 0x3d0   :  { %3627 = vmatpush1.bf16.msra.mxu0 %v5886_v41  ;;  %v5845_v41 = vld [vmem:[#allocation4 + $0x2a0] ss:$8 sps:$4 sm:$0xff]  }
 0x3d1   :  { %3628 = vmatprep.subr.bf16.mxu0 %v5894_v42  ;;  %v5850_v42 = vld [vmem:[#allocation4 + $0x2b4] ss:$8 sps:$4 sm:$0xff]  }
 0x3d2   :  { %3323 = vmatpush1.bf16.msra.mxu1 %v5776_v3  ;;  %v5910_v3 = vld [vmem:[%s7761_s10 + $0x90] ss:$8 sps:$4 sm:$0xff]  }
 0x3d3   :  { %3324 = vmatprep.subr.bf16.mxu1 %v5781_v8  ;;  %v5918_v8 = vld [vmem:[%s7761_s10 + $0xa4] ss:$8 sps:$4 sm:$0xff]  }
 0x3d4   :  { %3629 = vmatpush1.bf16.msra.mxu0 %v5892_v50  ;;  %v5851_v50 = vld [vmem:[#allocation4 + $0x2c0] ss:$8 sps:$4 sm:$0xff]  }
 0x3d5   :  { %3630 = vmatprep.subr.bf16.mxu0 %v5900_v27  ;;  %v5856_v27 = vld [vmem:[#allocation4 + $0x2d4] ss:$8 sps:$4 sm:$0xff]  }
 0x3d6   :  { %3325 = vmatpush1.bf16.msra.mxu1 %v5779_v1  ;;  %v5809_v1 = vld [vmem:[#allocation4 + $0x1e0] ss:$8 sps:$4 sm:$0xff]  }
 0x3d7   :  { %3326 = vmatprep.subr.bf16.mxu1 %v5784_v5  ;;  %v5814_v5 = vld [vmem:[#allocation4 + $0x1f4] ss:$8 sps:$4 sm:$0xff]  }
 0x3d8   :  { %3631 = vmatpush1.bf16.msra.mxu0 %v5898_v33  ;;  %v6062_v33 = vld [vmem:[%s7777_s24 + $0x18] sm:$0xff] }
 0x3d9   :  { %3632 = vmatprep.subr.bf16.mxu0 %v5906_v28  ;;  %v7499_v28 = vadd.f32 %v6062_v33, %v7350_v47  ;;  %v5942_v33 = vld [vmem:[%s7761_s10 + $0xe4] ss:$8 sps:$4 sm:$0xff]  }
 0x3da   :  { %3327 = vmatpush1.bf16.msra.mxu1 %v5782_v14  ;;  %v5812_v14 = vld [vmem:[#allocation4 + $0x1f0] ss:$8 sps:$4 sm:$0xff]  }
 0x3db   :  { %3328 = vmatprep.subr.bf16.mxu1 %v5787_v21  ;;  %v5922_v21 = vld [vmem:[%s7761_s10 + $0xb0] ss:$8 sps:$4 sm:$0xff]   ;;  %v1895_v47 = vmax.f32 %v7499_v28, 0.0 }
 0x3dc   :  { %3633 = vmatpush1.bf16.msra.mxu0 %v5904_v13 }
 0x3dd   :  { %3634 = vmatprep.subr.bf16.mxu0 %v5912_v2  ;;  %v5862_v2 = vld [vmem:[#allocation4 + $0x2f4] ss:$8 sps:$4 sm:$0xff]  }
 0x3de   :  { %3329 = vmatpush1.bf16.msra.mxu1 %v5785_v29  ;;  %v5820_v29 = vld [vmem:[#allocation4 + $0x214] ss:$8 sps:$4 sm:$0xff]  }
 0x3df   :  { %3330 = vmatprep.subr.bf16.mxu1 %v5790_v17  ;;  %v5928_v17 = vld [vmem:[%s7761_s10 + $0xc0] ss:$8 sps:$4 sm:$0xff]  }
 0x3e0   :  { %3635 = vmatpush1.bf16.msra.mxu0 %v5910_v3  ;;  %v6065_v3 = vld [vmem:[%s7777_s24 + $0x38] sm:$0xff] }
 0x3e1   :  { %3636 = vmatprep.subr.bf16.mxu0 %v5918_v8  ;;  %v7518_v8 = vadd.f32 %v6065_v3, %v7358_v30  ;;  %v5948_v3 = vld [vmem:[%s7761_s10 + $0xf4] ss:$8 sps:$4 sm:$0xff]  }
 0x3e2   :  { %3331 = vmatpush1.bf16.msra.mxu1 %v5788_v31  ;;  %v5821_v31 = vld [vmem:[#allocation4 + $0x220] ss:$8 sps:$4 sm:$0xff]  }
 0x3e3   :  { %3332 = vmatprep.subr.bf16.mxu1 %v5793_v56  ;;  %v5826_v56 = vld [vmem:[#allocation4 + $0x234] ss:$8 sps:$4 sm:$0xff]  }
 0x3e4   :  { %3637 = vmatpush1.bf16.msra.mxu0 %v5916_v6  ;;  %v6067_v6 = vld [vmem:[%s7777_s24 + $0x28] sm:$0xff] }
 0x3e5   :  { %3638 = vmatprep.subr.bf16.mxu0 %v5924_v11  ;;  %v7531_v11 = vadd.f32 %v6067_v6, %v7354_v53  ;;  %v5954_v6 = vld [vmem:[#allocation6 + $0xd4] ss:$8 sps:$4 sm:$0xff]  }
 0x3e6   :  { %3333 = vmatpush1.bf16.msra.mxu1 %v5791_v34  ;;  %v5836_v34 = vld [vmem:[#allocation4 + $0x270] ss:$8 sps:$4 sm:$0xff]  }
 0x3e7   :  { %3334 = vmatprep.subr.bf16.mxu1 %v5796_v35  ;;  %v5841_v35 = vld [vmem:[#allocation4 + $0x284] ss:$8 sps:$4 sm:$0xff]  }
 0x3e8   :  { %3639 = vmatpush1.bf16.msra.mxu0 %v5922_v21 }
 0x3e9   :  { %3640 = vmatprep.subr.bf16.mxu0 %v5930_v24  ;;  %v6069_v24 = vld [vmem:[%s7777_s24 + $0x20] sm:$0xff] }
 0x3ea   :  { %3335 = vmatpush1.bf16.msra.mxu1 %v5794_v62  ;;  %v5842_v62 = vld [vmem:[#allocation4 + $0x290] ss:$8 sps:$4 sm:$0xff]  }
 0x3eb   :  { %3336 = vmatprep.subr.bf16.mxu1 %v5799_v4  ;;  %v5847_v4 = vld [vmem:[#allocation4 + $0x2a4] ss:$8 sps:$4 sm:$0xff]  }
 0x3ec   :  { %3641 = vmatpush1.bf16.msra.mxu0 %v5928_v17 }
 0x3ee   :  { %3337 = vmatpush1.bf16.msra.mxu1 %v5797_v38  ;;  %v5848_v38 = vld [vmem:[#allocation4 + $0x2b0] ss:$8 sps:$4 sm:$0xff]  }
 0x3ef   :  { %3338 = vmatprep.subr.bf16.mxu1 %v5802_v37  ;;  %v5853_v37 = vld [vmem:[#allocation4 + $0x2c4] ss:$8 sps:$4 sm:$0xff]  }
 0x3f2   :  { %3339 = vmatpush1.bf16.msra.mxu1 %v5800_v52  ;;  %v5854_v52 = vld [vmem:[#allocation4 + $0x2d0] ss:$8 sps:$4 sm:$0xff]  }
 0x3f3   :  { %3340 = vmatprep.subr.bf16.mxu1 %v5805_v23  ;;  %v5859_v23 = vld [vmem:[#allocation4 + $0x2e4] ss:$8 sps:$4 sm:$0xff]  }
 0x3f6   :  { %3341 = vmatpush1.bf16.msra.mxu1 %v5803_v18  ;;  %v5857_v18 = vld [vmem:[#allocation4 + $0x2e0] ss:$8 sps:$4 sm:$0xff]  }
 0x3f7   :  { %3342 = vmatprep.subr.bf16.mxu1 %v5808_v49  ;;  %v6063_v49 = vld [vmem:[%s7777_s24 + $0x8] sm:$0xff] }
 0x3f8   :  { %v7505_v13 = vadd.f32 %v6063_v49, %v7346_v51  ;;  %v6066_v51 = vld [vmem:[%s7777_s24] sm:$0xff]  ;;  %v5945_v49 = vld [vmem:[#allocation6 + $0xb4] ss:$8 sps:$4 sm:$0xff]  }
 0x3fa   :  { %3343 = vmatpush1.bf16.msra.mxu1 %v5806_v43  ;;  %v6064_v43 = vld [vmem:[%s7777_s24 + $0x10] sm:$0xff] }
 0x3fb   :  { %3344 = vmatprep.subr.bf16.mxu1 %v5811_v7  ;;  %v7511_v7 = vadd.f32 %v6064_v43, %v7348_v45  ;;  %v1893_v45 = vmax.f32 %v7505_v13, 0.0  ;;  %v5946_v43 = vld [vmem:[%s7761_s10 + $0xf0] ss:$8 sps:$4 sm:$0xff]  }
 0x3fd   :  { %v1894_v30 = vmax.f32 %v7511_v7, 0.0  ;;  %v3790_v21 = vpack.c.bf16 %v1895_v47, %v1893_v45 }
 0x3fe   :  { %3345 = vmatpush1.bf16.msra.mxu1 %v5809_v1  ;;  %v7524_v1 = vadd.f32 %v6066_v51, %v7344_v40  ;;  %v5951_v51 = vld [vmem:[#allocation6 + $0xc4] ss:$8 sps:$4 sm:$0xff]  }
 0x3ff   :  { %3346 = vmatprep.subr.bf16.mxu1 %v5814_v5  ;;  %v5860_v5 = vld [vmem:[#allocation4 + $0x2f0] ss:$8 sps:$4 sm:$0xff]  }
 0x400   :  { %v1892_v53 = vmax.f32 %v7524_v1, 0.0 }
 0x402   :  { %3347 = vmatpush1.bf16.msra.mxu1 %v5812_v14  ;;  %v6068_v14 = vld [vmem:[%s7777_s24 + $0x30] sm:$0xff] }
 0x403   :  { %3359 = vmatprep.subr.bf16.mxu1 %v5817_v20  ;;  %v7538_v40 = vadd.f32 %v6068_v14, %v7356_v44  ;;  %v1899_v20 = vmax.f32 %v7518_v8, 0.0  ;;  %v1897_v44 = vmax.f32 %v7531_v11, 0.0  ;;  %v5952_v14 = vld [vmem:[#allocation6 + $0xd0] ss:$8 sps:$4 sm:$0xff]  }
 0x405   :  { %3349 = vmatmul.mubr.bf16.vlgmr.msra.gmra.mrb[8].mxu1 %v2681_v54  ;;  %v5830_v54 = vld [vmem:[#allocation4 + $0x250] ss:$8 sps:$4 sm:$0xff]   ;;  %v1898_v17 = vmax.f32 %v7538_v40, 0.0 }
 0x406   :  { %3360 = vmatpush1.bf16.msra.mxu1 %v5815_v26  ;;  %3391 = vmatprep.mubr.bf16.mxu1 %v2684_v55  ;;  %v5838_v55 = vld [vmem:[#allocation4 + $0x274] ss:$8 sps:$4 sm:$0xff]   ;;  %v7550_v26 = vadd.f32 %v6069_v24, %v7352_v32  ;;  %v3792_v32 = vpack.c.bf16 %v1899_v20, %v1897_v44  ;;  %v5955_v24 = vld [vmem:[#allocation6 + $0xe0] ss:$8 sps:$4 sm:$0xff]  }
 0x407   :  { %3361 = vmatprep.subr.bf16.mxu1 %v5820_v29  ;;  %v3789_v29 = vpack.c.bf16 %v1894_v30, %v1892_v53 }
 0x40a   :  { %3362 = vmatpush1.bf16.msra.mxu1 %v5818_v59  ;;  %v1896_v59 = vmax.f32 %v7550_v26, 0.0 }
 0x40b   :  { %3363 = vmatprep.subr.bf16.mxu1 %v5823_v25  ;;  %v6225_v25 = vmov 0  }
 0x40e   :  { %3364 = vmatpush1.bf16.msra.mxu1 %v5821_v31  ;;  %v3791_v31 = vpack.c.bf16 %v1898_v17, %v1896_v59 }
 0x40f   :  { %3365 = vmatprep.subr.bf16.mxu1 %v5826_v56  ;;  %v5863_v56 = vld [vmem:[#allocation9] sm:$0xff]  }
 0x412   :  { %3366 = vmatpush1.bf16.msra.mxu1 %v5824_v19  ;;  %v5885_v19 = vld [vmem:[#allocation6 + $0x14] ss:$8 sps:$4 sm:$0xff]  }
 0x413   :  { %3367 = vmatprep.subr.bf16.mxu1 %v5829_v46  ;;  %v5883_v46 = vld [vmem:[#allocation6 + $0x10] ss:$8 sps:$4 sm:$0xff]  }
 0x416   :  { %3368 = vmatpush1.bf16.msra.mxu1 %v5827_v15  ;;  %v5891_v15 = vld [vmem:[#allocation6 + $0x24] ss:$8 sps:$4 sm:$0xff]  }
 0x417   :  { %3369 = vmatprep.subr.bf16.mxu1 %v5832_v16  ;;  %v5889_v16 = vld [vmem:[#allocation6 + $0x20] ss:$8 sps:$4 sm:$0xff]  }
 0x41a   :  { %3370 = vmatpush1.bf16.msra.mxu1 %v5830_v54  ;;  %v5897_v54 = vld [vmem:[#allocation6 + $0x34] ss:$8 sps:$4 sm:$0xff]  }
 0x41b   :  { %3371 = vmatprep.subr.bf16.mxu1 %v5835_v58  ;;  %v5895_v58 = vld [vmem:[#allocation6 + $0x30] ss:$8 sps:$4 sm:$0xff]  }
 0x41e   :  { %3372 = vmatpush1.bf16.msra.mxu1 %v5833_v57  ;;  %v5903_v57 = vld [vmem:[#allocation6 + $0x44] ss:$8 sps:$4 sm:$0xff]  }
 0x41f   :  { %3373 = vmatprep.subr.bf16.mxu1 %v5838_v55  ;;  %v5901_v55 = vld [vmem:[#allocation6 + $0x40] ss:$8 sps:$4 sm:$0xff]  }
 0x422   :  { %3374 = vmatpush1.bf16.msra.mxu1 %v5836_v34  ;;  %v5909_v34 = vld [vmem:[#allocation6 + $0x54] ss:$8 sps:$4 sm:$0xff]  }
 0x423   :  { %3375 = vmatprep.subr.bf16.mxu1 %v5841_v35  ;;  %v5907_v35 = vld [vmem:[#allocation6 + $0x50] ss:$8 sps:$4 sm:$0xff]  }
 0x426   :  { %3376 = vmatpush1.bf16.msra.mxu1 %v5839_v39  ;;  %v5915_v39 = vld [vmem:[#allocation6 + $0x64] ss:$8 sps:$4 sm:$0xff]  }
 0x427   :  { %3377 = vmatprep.subr.bf16.mxu1 %v5844_v60  ;;  %v5913_v60 = vld [vmem:[#allocation6 + $0x60] ss:$8 sps:$4 sm:$0xff]  }
 0x42a   :  { %3378 = vmatpush1.bf16.msra.mxu1 %v5842_v62  ;;  %v5921_v62 = vld [vmem:[#allocation6 + $0x74] ss:$8 sps:$4 sm:$0xff]  }
 0x42b   :  { %3379 = vmatprep.subr.bf16.mxu1 %v5847_v4  ;;  %v5919_v4 = vld [vmem:[#allocation6 + $0x70] ss:$8 sps:$4 sm:$0xff]  }
 0x42e   :  { %3380 = vmatpush1.bf16.msra.mxu1 %v5845_v41  ;;  %v5927_v41 = vld [vmem:[#allocation6 + $0x84] ss:$8 sps:$4 sm:$0xff]  }
 0x42f   :  { %3381 = vmatprep.subr.bf16.mxu1 %v5850_v42  ;;  %v5925_v42 = vld [vmem:[#allocation6 + $0x80] ss:$8 sps:$4 sm:$0xff]  }
 0x432   :  { %3382 = vmatpush1.bf16.msra.mxu1 %v5848_v38  ;;  %v5933_v38 = vld [vmem:[#allocation6 + $0x94] ss:$8 sps:$4 sm:$0xff]  }
 0x433   :  { %3383 = vmatprep.subr.bf16.mxu1 %v5853_v37  ;;  %v5931_v37 = vld [vmem:[#allocation6 + $0x90] ss:$8 sps:$4 sm:$0xff]  }
 0x436   :  { %3384 = vmatpush1.bf16.msra.mxu1 %v5851_v50  ;;  %v5936_v50 = vld [vmem:[%s7761_s10 + $0xd4] ss:$8 sps:$4 sm:$0xff]  }
 0x437   :  { %3385 = vmatprep.subr.bf16.mxu1 %v5856_v27  ;;  %v5934_v27 = vld [vmem:[%s7761_s10 + $0xd0] ss:$8 sps:$4 sm:$0xff]   ;;  %3642 = vmatprep.subr.bf16.mxu0 %v5936_v50 }
 0x438   :  { %3643 = vmatpush1.bf16.msra.mxu0 %v5934_v27 }
 0x439   :  { %3644 = vmatprep.subr.bf16.mxu0 %v5942_v33 }
 0x43a   :  { %3386 = vmatpush1.bf16.msra.mxu1 %v5854_v52  ;;  %v5939_v52 = vld [vmem:[#allocation6 + $0xa4] ss:$8 sps:$4 sm:$0xff]  }
 0x43b   :  { %3387 = vmatprep.subr.bf16.mxu1 %v5859_v23  ;;  %v5937_v23 = vld [vmem:[#allocation6 + $0xa0] ss:$8 sps:$4 sm:$0xff]  }
 0x43e   :  { %3388 = vmatpush1.bf16.msra.mxu1 %v5857_v18  ;;  %v5940_v18 = vld [vmem:[%s7761_s10 + $0xe0] ss:$8 sps:$4 sm:$0xff]  }
 0x43f   :  { %3389 = vmatprep.subr.bf16.mxu1 %v5862_v2  ;;  %3645 = vmatpush1.bf16.msra.mxu0 %v5940_v18  ;;  %v5943_v2 = vld [vmem:[#allocation6 + $0xb0] ss:$8 sps:$4 sm:$0xff]  }
 0x440   :  { %3646 = vmatprep.subr.bf16.mxu0 %v5948_v3 }
 0x442   :  { %3390 = vmatpush1.bf16.msra.mxu1 %v5860_v5  ;;  %v5949_v5 = vld [vmem:[#allocation6 + $0xc0] ss:$8 sps:$4 sm:$0xff]  }
 0x443   :  { %3804 = vmatprep.subr.bf16.mxu1 %v3790_v21  ;;  %3647 = vmatpush1.bf16.msra.mxu0 %v5946_v43 }
 0x445   :  { %3392 = vmatmul.mubr.bf16.vlgmr.msra.gmra.mrb[8].mxu1 %v2683_v48  ;;  %v5877_v48 = vld [vmem:[#allocation6] ss:$8 sps:$4 sm:$0xff]  }
 0x446   :  { %3805 = vmatpush1.bf16.msra.mxu1 %v3789_v29  ;;  %3836 = vmatprep.mubr.bf16.mxu1 %v6225_v25 }
 0x447   :  { %3806 = vmatprep.subr.bf16.mxu1 %v3792_v32 }
 0x44a   :  { %3807 = vmatpush1.bf16.msra.mxu1 %v3791_v31 }
 0x44b   :  { %3857 = vmatprep.subr.bf16.mxu1 %v3790_v21  ;;  %v5957_v21 = vld [vmem:[#allocation6 + $0xe4] ss:$8 sps:$4 sm:$0xff]  }
 0x44d   :  { %5088 = vmatmul.mubr.msk.bf16.vlgmr.msra.gmra.mrb[12].mxu1 %vm3800_vm10, %v5863_v56 }
 0x44e   :  { %3858 = vmatpush1.bf16.msra.mxu1 %v3789_v29  ;;  %3889 = vmatprep.mubr.bf16.mxu1 %v6225_v25  ;;  %v5960_v29 = vld [vmem:[#allocation6 + $0xf4] ss:$8 sps:$4 sm:$0xff]   ;;  %v5963_v25 = vld [vmem:[#allocation6 + $0x104] ss:$8 sps:$4 sm:$0xff]  }
 0x44f   :  { %3859 = vmatprep.subr.bf16.mxu1 %v3792_v32  ;;  %v5958_v32 = vld [vmem:[#allocation6 + $0xf0] ss:$8 sps:$4 sm:$0xff]  }
 0x452   :  { %3860 = vmatpush1.bf16.msra.mxu1 %v3791_v31  ;;  %v2781_v31 = vld [vmem:[%s7760_s9] sm:$0x3] }
 0x453   :  { %4506 = vmatprep.subr.bf16.mxu1 %v5879_v61  ;;  %v2786_v56 = vrot.slane %v2781_v31, %v7042_v9  ;;  %v2790_v61 = vrot.slane %v2781_v31, %v7048_v12 }
 0x455   :  { %5090 = vmatmul.mubr.msk.bf16.vlgmr.msra.gmra.mrb[16].mxu1 %vm3800_vm10, %v5864_v0 }
 0x456   :  { %4507 = vmatpush1.bf16.msra.mxu1 %v5877_v48 }
 0x457   :  { %4508 = vmatprep.subr.bf16.mxu1 %v5885_v19 }
 0x45a   :  { %4509 = vmatpush1.bf16.msra.mxu1 %v5883_v46 }
 0x45b   :  { %4510 = vmatprep.subr.bf16.mxu1 %v5891_v15 }
 0x45e   :  { %4511 = vmatpush1.bf16.msra.mxu1 %v5889_v16 }
 0x45f   :  { %4512 = vmatprep.subr.bf16.mxu1 %v5897_v54 }
 0x462   :  { %4513 = vmatpush1.bf16.msra.mxu1 %v5895_v58  ;;  %v6070_v58 = vld [vmem:[%s7778_s20 + $0x8] sm:$0xff] }
 0x463   :  { %4514 = vmatprep.subr.bf16.mxu1 %v5903_v57 }
 0x466   :  { %4515 = vmatpush1.bf16.msra.mxu1 %v5901_v55 }
 0x467   :  { %4516 = vmatprep.subr.bf16.mxu1 %v5909_v34  ;;  %v6071_v34 = vld [vmem:[%s7778_s20] sm:$0xff] }
 0x46a   :  { %4517 = vmatpush1.bf16.msra.mxu1 %v5907_v35 }
 0x46b   :  { %4518 = vmatprep.subr.bf16.mxu1 %v5915_v39  ;;  %v6072_v39 = vld [vmem:[%s7778_s20 + $0x10] sm:$0xff] }
 0x46e   :  { %4519 = vmatpush1.bf16.msra.mxu1 %v5913_v60 }
 0x46f   :  { %4520 = vmatprep.subr.bf16.mxu1 %v5921_v62  ;;  %v6073_v62 = vld [vmem:[%s7778_s20 + $0x18] sm:$0xff] }
 0x472   :  { %4521 = vmatpush1.bf16.msra.mxu1 %v5919_v4 }
 0x473   :  { %4522 = vmatprep.subr.bf16.mxu1 %v5927_v41 }
 0x476   :  { %4523 = vmatpush1.bf16.msra.mxu1 %v5925_v42 }
 0x477   :  { %4524 = vmatprep.subr.bf16.mxu1 %v5933_v38 }
 0x47a   :  { %4525 = vmatpush1.bf16.msra.mxu1 %v5931_v37 }
 0x47b   :  { %4526 = vmatprep.subr.bf16.mxu1 %v5939_v52 }
 0x47e   :  { %4527 = vmatpush1.bf16.msra.mxu1 %v5937_v23 }
 0x47f   :  { %4528 = vmatprep.subr.bf16.mxu1 %v5945_v49 }
 0x482   :  { %4529 = vmatpush1.bf16.msra.mxu1 %v5943_v2 }
 0x483   :  { %4530 = vmatprep.subr.bf16.mxu1 %v5951_v51 }
 0x486   :  { %4531 = vmatpush1.bf16.msra.mxu1 %v5949_v5 }
 0x487   :  { %4532 = vmatprep.subr.bf16.mxu1 %v5954_v6 }
 0x48a   :  { %4533 = vmatpush1.bf16.msra.mxu1 %v5952_v14 }
 0x48b   :  { %4534 = vmatprep.subr.bf16.mxu1 %v5957_v21 }
 0x48e   :  { %4535 = vmatpush1.bf16.msra.mxu1 %v5955_v24 }
 0x48f   :  { %4536 = vmatprep.subr.bf16.mxu1 %v5960_v29 }
 0x492   :  { %4537 = vmatpush1.bf16.msra.mxu1 %v5958_v32 }
 0x493   :  { %4549 = vmatprep.subr.bf16.mxu1 %v5963_v25 }
 0x518   :  { %v3393_v0 = vpop.f32.mrb[8].mxu1 }
 0x519   :  { %v5219_v48 = vadd.f32 %v3393_v0, %v2786_v56  ;;  %v3395_v19 = vpop.f32.mrb[9].mxu1 }
 0x51a   :  { %v5220_v46 = vadd.f32 %v3395_v19, %v2790_v61  ;;  %v3397_v15 = vpop.f32.mrb[10].mxu1 }
 0x51b   :  { %v5221_v16 = vadd.f32 %v3397_v15, %v2786_v56  ;;  %v3399_v54 = vpop.f32.mrb[11].mxu1  ;;  %v7601_v35 = vadd.f32 %v6071_v34, %v5219_v48  ;;  %v5969_v34 = vld [vmem:[#allocation6 + $0x124] ss:$8 sps:$4 sm:$0xff]  }
 0x51c   :  { %v7596_v57 = vadd.f32 %v6070_v58, %v5220_v46  ;;  %v5222_v55 = vadd.f32 %v3399_v54, %v2790_v61  ;;  %v5961_v54 = vld [vmem:[#allocation6 + $0x100] ss:$8 sps:$4 sm:$0xff]   ;;  %v5966_v58 = vld [vmem:[#allocation6 + $0x114] ss:$8 sps:$4 sm:$0xff]  }
 0x51d   :  { %v7606_v60 = vadd.f32 %v6072_v39, %v5221_v16  ;;  %v3406_v50 = vmax.f32 %v7601_v35, 0.0  ;;  %v5967_v39 = vld [vmem:[#allocation6 + $0x120] ss:$8 sps:$4 sm:$0xff]  }
 0x51e   :  { %v7611_v4 = vadd.f32 %v6073_v62, %v5222_v55  ;;  %v3407_v42 = vmax.f32 %v7596_v57, 0.0  ;;  %v5964_v55 = vld [vmem:[#allocation6 + $0x110] ss:$8 sps:$4 sm:$0xff]  }
 0x51f   :  { %v3408_v41 = vmax.f32 %v7606_v60, 0.0  ;;  %v5970_v62 = vld [vmem:[#allocation6 + $0x130] ss:$8 sps:$4 sm:$0xff]  }
 0x520   :  { %v3409_v38 = vmax.f32 %v7611_v4, 0.0  ;;  %v7616_v37 = vpop.f32.mrb[12].mxu1 }
 0x521   :  { %v3840_v27 = vpop.f32.mrb[13].mxu1  ;;  %v3410_v33 = vpack.c.bf16 %v3408_v41, %v3406_v50 }
 0x522   :  { %v3411_v52 = vpack.c.bf16 %v3409_v38, %v3407_v42  ;;  %v7623_v23 = vpop.f32.mrb[14].mxu1 }
 0x523   :  { %v3914_v18 = vpack.c.bf16 %v7623_v23, %v7616_v37  ;;  %v3844_v49 = vpop.f32.mrb[15].mxu1  ;;  %v6026_v37 = vld [vmem:[#allocation6 + $0x254] ss:$8 sps:$4 sm:$0xff]   ;;  %v6024_v23 = vld [vmem:[#allocation6 + $0x250] ss:$8 sps:$4 sm:$0xff]  }
 0x524   :  { %3648 = vmatprep.mubr.bf16.mxu0 %v3411_v52  ;;  %v3915_v2 = vpack.c.bf16 %v3844_v49, %v3840_v27  ;;  %v5978_v27 = vld [vmem:[#allocation6 + $0x154] ss:$8 sps:$4 sm:$0xff]   ;;  %v5976_v52 = vld [vmem:[#allocation6 + $0x150] ss:$8 sps:$4 sm:$0xff]   ;;  %v5979_v49 = vld [vmem:[#allocation6 + $0x160] ss:$8 sps:$4 sm:$0xff]  }
 0x525   :  { %3649 = vmatmul.mubr.bf16.vlgmr.msra.gmra.mrb[20].mxu0 %v3410_v33  ;;  %v5981_v33 = vld [vmem:[#allocation6 + $0x164] ss:$8 sps:$4 sm:$0xff]  }
 0x526   :  { %3740 = vmatprep.mubr.f32.mxu0 %v6224_v22 }
 0x528   :  { %v7632_v43 = vpop.f32.mrb[16].mxu1 }
 0x529   :  { %v3900_v3 = vrot.slane %v7632_v43, 7  ;;  %v7635_v51 = vpop.f32.mrb[17].mxu1 }
 0x52a   :  { %v3901_v5 = vrot.slane %v7635_v51, 7  ;;  %v7638_v6 = vpop.f32.mrb[18].mxu1 }
 0x52b   :  { %v3902_v14 = vrot.slane %v7638_v6, 7  ;;  %v3916_v21 = vpack.c.bf16 %v7638_v6, %v7632_v43  ;;  %v7643_v24 = vpop.f32.mrb[19].mxu1  ;;  %v3659_v43 = vld [vmem:[%s7767_s16] sm:$0xff]  ;;  %v3660_v6 = vld [vmem:[%s7767_s16 + $0x8] sm:$0xff] }
 0x52c   :  { %v3903_v29 = vrot.slane %v7643_v24, 7  ;;  %v3917_v32 = vpack.c.bf16 %v7643_v24, %v7635_v51  ;;  %v6027_v51 = vld [vmem:[#allocation6 + $0x260] ss:$8 sps:$4 sm:$0xff]   ;;  %v6032_v24 = vld [vmem:[#allocation6 + $0x274] ss:$8 sps:$4 sm:$0xff]  }
 0x52d   :  { %v3904_v25 = vsel %vm268_vm1, %v3900_v3, %v3902_v14  ;;  %v3906_v31 = vsel %vm268_vm1, %v3902_v14, %v3900_v3  ;;  %v5982_v3 = vld [vmem:[#allocation6 + $0x170] ss:$8 sps:$4 sm:$0xff]   ;;  %v5985_v14 = vld [vmem:[#allocation6 + $0x180] ss:$8 sps:$4 sm:$0xff]  }
 0x52e   :  { %v3908_v56 = vmul.f32 %v7201_v63, %v3906_v31  ;;  %v3910_v61 = vmul.f32 %v7193_v36, %v3904_v25  ;;  %v3905_v0 = vsel %vm268_vm1, %v3901_v5, %v3903_v29  ;;  %v3907_v48 = vsel %vm268_vm1, %v3903_v29, %v3901_v5  ;;  %v5987_v5 = vld [vmem:[#allocation6 + $0x184] ss:$8 sps:$4 sm:$0xff]   ;;  %v5990_v29 = vld [vmem:[#allocation6 + $0x194] ss:$8 sps:$4 sm:$0xff]   ;;  %v5988_v25 = vld [vmem:[#allocation6 + $0x190] ss:$8 sps:$4 sm:$0xff]  }
 0x52f   :  { %v3909_v19 = vmul.f32 %v7201_v63, %v3907_v48  ;;  %v3911_v46 = vmul.f32 %v7193_v36, %v3905_v0  ;;  %v5975_v63 = vld [vmem:[#allocation6 + $0x144] ss:$8 sps:$4 sm:$0xff]   ;;  %v5973_v36 = vld [vmem:[#allocation6 + $0x140] ss:$8 sps:$4 sm:$0xff]   ;;  %v5994_v0 = vld [vmem:[#allocation6 + $0x1b0] ss:$8 sps:$4 sm:$0xff]  }
 0x530   :  { %v3912_v15 = vpack.c.bf16 %v3910_v61, %v3908_v56  ;;  %v5993_v31 = vld [vmem:[#allocation6 + $0x1a4] ss:$8 sps:$4 sm:$0xff]   ;;  %v5991_v56 = vld [vmem:[#allocation6 + $0x1a0] ss:$8 sps:$4 sm:$0xff]   ;;  %v5996_v61 = vld [vmem:[#allocation6 + $0x1b4] ss:$8 sps:$4 sm:$0xff]  }
 0x531   :  { %v3913_v16 = vpack.c.bf16 %v3911_v46, %v3909_v19  ;;  %v5999_v48 = vld [vmem:[#allocation6 + $0x1c4] ss:$8 sps:$4 sm:$0xff]   ;;  %v5997_v19 = vld [vmem:[#allocation6 + $0x1c0] ss:$8 sps:$4 sm:$0xff]   ;;  %v6002_v46 = vld [vmem:[#allocation6 + $0x1d4] ss:$8 sps:$4 sm:$0xff]  }
 0x533   :  { %4538 = vmatprep.mubr.bf16.mxu1 %v3913_v16  ;;  %v6005_v16 = vld [vmem:[#allocation6 + $0x1e4] ss:$8 sps:$4 sm:$0xff]  }
 0x534   :  { %4539 = vmatmul.mubr.bf16.vlgmr.msra.gmra.mrb[20].mxu1 %v3912_v15  ;;  %v6000_v15 = vld [vmem:[#allocation6 + $0x1d0] ss:$8 sps:$4 sm:$0xff]  }
 0x535   :  { %4550 = vmatpush1.bf16.msra.mxu1 %v5961_v54  ;;  %4581 = vmatprep.mubr.bf16.mxu1 %v3915_v2  ;;  %v5984_v2 = vld [vmem:[#allocation6 + $0x174] ss:$8 sps:$4 sm:$0xff]   ;;  %v6003_v54 = vld [vmem:[#allocation6 + $0x1e0] ss:$8 sps:$4 sm:$0xff]  }
 0x536   :  { %4551 = vmatprep.subr.bf16.mxu1 %v5966_v58  ;;  %v6008_v58 = vld [vmem:[#allocation6 + $0x1f4] ss:$8 sps:$4 sm:$0xff]  }
 0x539   :  { %4552 = vmatpush1.bf16.msra.mxu1 %v5964_v55  ;;  %v6006_v55 = vld [vmem:[#allocation6 + $0x1f0] ss:$8 sps:$4 sm:$0xff]  }
 0x53a   :  { %4553 = vmatprep.subr.bf16.mxu1 %v5969_v34  ;;  %v6011_v34 = vld [vmem:[#allocation6 + $0x204] ss:$8 sps:$4 sm:$0xff]  }
 0x53d   :  { %4554 = vmatpush1.bf16.msra.mxu1 %v5967_v39  ;;  %v6009_v39 = vld [vmem:[#allocation6 + $0x200] ss:$8 sps:$4 sm:$0xff]  }
 0x53e   :  { %4555 = vmatprep.subr.bf16.mxu1 %v5972_v10  ;;  %v6014_v10 = vld [vmem:[#allocation6 + $0x214] ss:$8 sps:$4 sm:$0xff]  }
 0x541   :  { %4556 = vmatpush1.bf16.msra.mxu1 %v5970_v62  ;;  %v6012_v62 = vld [vmem:[#allocation6 + $0x210] ss:$8 sps:$4 sm:$0xff]  }
 0x542   :  { %4557 = vmatprep.subr.bf16.mxu1 %v5975_v63  ;;  %v6017_v63 = vld [vmem:[#allocation6 + $0x224] ss:$8 sps:$4 sm:$0xff]  }
 0x545   :  { %4558 = vmatpush1.bf16.msra.mxu1 %v5973_v36  ;;  %v6015_v36 = vld [vmem:[#allocation6 + $0x220] ss:$8 sps:$4 sm:$0xff]  }
 0x546   :  { %4559 = vmatprep.subr.bf16.mxu1 %v5978_v27  ;;  %v6020_v27 = vld [vmem:[#allocation6 + $0x234] ss:$8 sps:$4 sm:$0xff]  }
 0x549   :  { %4560 = vmatpush1.bf16.msra.mxu1 %v5976_v52  ;;  %v6018_v52 = vld [vmem:[#allocation6 + $0x230] ss:$8 sps:$4 sm:$0xff]  }
 0x54a   :  { %4561 = vmatprep.subr.bf16.mxu1 %v5981_v33  ;;  %v6023_v33 = vld [vmem:[#allocation6 + $0x244] ss:$8 sps:$4 sm:$0xff]  }
 0x54d   :  { %4562 = vmatpush1.bf16.msra.mxu1 %v5979_v49  ;;  %v6021_v49 = vld [vmem:[#allocation6 + $0x240] ss:$8 sps:$4 sm:$0xff]  }
 0x54e   :  { %4563 = vmatprep.subr.bf16.mxu1 %v5984_v2  ;;  %v6035_v2 = vld [vmem:[#allocation6 + $0x284] ss:$8 sps:$4 sm:$0xff]  }
 0x551   :  { %4564 = vmatpush1.bf16.msra.mxu1 %v5982_v3  ;;  %v6033_v3 = vld [vmem:[#allocation6 + $0x280] ss:$8 sps:$4 sm:$0xff]  }
 0x552   :  { %4565 = vmatprep.subr.bf16.mxu1 %v5987_v5  ;;  %v6038_v5 = vld [vmem:[#allocation6 + $0x294] ss:$8 sps:$4 sm:$0xff]  }
 0x555   :  { %4566 = vmatpush1.bf16.msra.mxu1 %v5985_v14  ;;  %v6036_v14 = vld [vmem:[#allocation6 + $0x290] ss:$8 sps:$4 sm:$0xff]  }
 0x556   :  { %4567 = vmatprep.subr.bf16.mxu1 %v5990_v29  ;;  %v6041_v29 = vld [vmem:[#allocation6 + $0x2a4] ss:$8 sps:$4 sm:$0xff]  }
 0x559   :  { %4568 = vmatpush1.bf16.msra.mxu1 %v5988_v25  ;;  %v6039_v25 = vld [vmem:[#allocation6 + $0x2a0] ss:$8 sps:$4 sm:$0xff]  }
 0x55a   :  { %4569 = vmatprep.subr.bf16.mxu1 %v5993_v31  ;;  %v6044_v31 = vld [vmem:[#allocation6 + $0x2b4] ss:$8 sps:$4 sm:$0xff]  }
 0x55d   :  { %4570 = vmatpush1.bf16.msra.mxu1 %v5991_v56  ;;  %v6042_v56 = vld [vmem:[#allocation6 + $0x2b0] ss:$8 sps:$4 sm:$0xff]  }
 0x55e   :  { %4571 = vmatprep.subr.bf16.mxu1 %v5996_v61  ;;  %v6047_v61 = vld [vmem:[#allocation6 + $0x2c4] ss:$8 sps:$4 sm:$0xff]  }
 0x561   :  { %4572 = vmatpush1.bf16.msra.mxu1 %v5994_v0  ;;  %v6045_v0 = vld [vmem:[#allocation6 + $0x2c0] ss:$8 sps:$4 sm:$0xff]  }
 0x562   :  { %4573 = vmatprep.subr.bf16.mxu1 %v5999_v48  ;;  %v6050_v48 = vld [vmem:[#allocation6 + $0x2d4] ss:$8 sps:$4 sm:$0xff]  }
 0x565   :  { %4574 = vmatpush1.bf16.msra.mxu1 %v5997_v19  ;;  %v6048_v19 = vld [vmem:[#allocation6 + $0x2d0] ss:$8 sps:$4 sm:$0xff]  }
 0x566   :  { %4575 = vmatprep.subr.bf16.mxu1 %v6002_v46  ;;  %v6053_v46 = vld [vmem:[#allocation6 + $0x2e4] ss:$8 sps:$4 sm:$0xff]  }
 0x569   :  { %4576 = vmatpush1.bf16.msra.mxu1 %v6000_v15  ;;  %v6051_v15 = vld [vmem:[#allocation6 + $0x2e0] ss:$8 sps:$4 sm:$0xff]  }
 0x56a   :  { %4577 = vmatprep.subr.bf16.mxu1 %v6005_v16  ;;  %v6056_v16 = vld [vmem:[#allocation6 + $0x2f4] ss:$8 sps:$4 sm:$0xff]  }
 0x56d   :  { %4578 = vmatpush1.bf16.msra.mxu1 %v6003_v54  ;;  %v6054_v54 = vld [vmem:[#allocation6 + $0x2f0] ss:$8 sps:$4 sm:$0xff]  }
 0x56e   :  { %4579 = vmatprep.subr.bf16.mxu1 %v6008_v58  ;;  %v3444_v58 = vld [vmem:[%s7762_s11] sm:$0x3] }
 0x571   :  { %4580 = vmatpush1.bf16.msra.mxu1 %v6006_v55  ;;  %v3449_v55 = vrot.slane %v3444_v58, %v7042_v9 }
 0x572   :  { %4592 = vmatprep.subr.bf16.mxu1 %v6011_v34 }
 0x574   :  { %4582 = vmatmul.mubr.bf16.vlgmr.msra.gmra.mrb[20].mxu1 %v3914_v18  ;;  %v6029_v18 = vld [vmem:[#allocation6 + $0x264] ss:$8 sps:$4 sm:$0xff]  }
 0x575   :  { %4593 = vmatpush1.bf16.msra.mxu1 %v6009_v39  ;;  %4624 = vmatprep.mubr.bf16.mxu1 %v3917_v32  ;;  %v6030_v32 = vld [vmem:[#allocation6 + $0x270] ss:$8 sps:$4 sm:$0xff]   ;;  %v3453_v39 = vrot.slane %v3444_v58, %v7048_v12 }
 0x576   :  { %4594 = vmatprep.subr.bf16.mxu1 %v6014_v10 }
 0x579   :  { %4595 = vmatpush1.bf16.msra.mxu1 %v6012_v62 }
 0x57a   :  { %4596 = vmatprep.subr.bf16.mxu1 %v6017_v63 }
 0x57d   :  { %4597 = vmatpush1.bf16.msra.mxu1 %v6015_v36 }
 0x57e   :  { %4598 = vmatprep.subr.bf16.mxu1 %v6020_v27 }
 0x581   :  { %4599 = vmatpush1.bf16.msra.mxu1 %v6018_v52 }
 0x582   :  { %4600 = vmatprep.subr.bf16.mxu1 %v6023_v33 }
 0x585   :  { %4601 = vmatpush1.bf16.msra.mxu1 %v6021_v49 }
 0x586   :  { %4602 = vmatprep.subr.bf16.mxu1 %v6026_v37 }
 0x589   :  { %4603 = vmatpush1.bf16.msra.mxu1 %v6024_v23  ;;  %v3662_v23 = vld [vmem:[%s7767_s16 + $0x18] sm:$0xff] }
 0x58a   :  { %4604 = vmatprep.subr.bf16.mxu1 %v6029_v18  ;;  %v4014_v18 = vld [vmem:[#allocation7] sm:$0x3] }
 0x58d   :  { %4605 = vmatpush1.bf16.msra.mxu1 %v6027_v51  ;;  %v4019_v51 = vrot.slane %v4014_v18, %v7042_v9 }
 0x58e   :  { %4606 = vmatprep.subr.bf16.mxu1 %v6032_v24  ;;  %v4023_v24 = vrot.slane %v4014_v18, %v7048_v12 }
 0x591   :  { %4607 = vmatpush1.bf16.msra.mxu1 %v6030_v32 }
 0x592   :  { %4608 = vmatprep.subr.bf16.mxu1 %v6035_v2 }
 0x595   :  { %4609 = vmatpush1.bf16.msra.mxu1 %v6033_v3 }
 0x596   :  { %4610 = vmatprep.subr.bf16.mxu1 %v6038_v5 }
 0x599   :  { %4611 = vmatpush1.bf16.msra.mxu1 %v6036_v14 }
 0x59a   :  { %4612 = vmatprep.subr.bf16.mxu1 %v6041_v29 }
 0x59d   :  { %4613 = vmatpush1.bf16.msra.mxu1 %v6039_v25 }
 0x59e   :  { %4614 = vmatprep.subr.bf16.mxu1 %v6044_v31 }
 0x5a1   :  { %4615 = vmatpush1.bf16.msra.mxu1 %v6042_v56 }
 0x5a2   :  { %4616 = vmatprep.subr.bf16.mxu1 %v6047_v61 }
 0x5a5   :  { %4617 = vmatpush1.bf16.msra.mxu1 %v6045_v0 }
 0x5a6   :  { %4618 = vmatprep.subr.bf16.mxu1 %v6050_v48 }
 0x5a9   :  { %4619 = vmatpush1.bf16.msra.mxu1 %v6048_v19 }
 0x5aa   :  { %4620 = vmatprep.subr.bf16.mxu1 %v6053_v46 }
 0x5ad   :  { %4621 = vmatpush1.bf16.msra.mxu1 %v6051_v15 }
 0x5ae   :  { %4622 = vmatprep.subr.bf16.mxu1 %v6056_v16 }
 0x5b1   :  { %4623 = vmatpush1.bf16.msra.mxu1 %v6054_v54 }
 0x5b4   :  { %4625 = vmatmul.mubr.bf16.vlgmr.msra.gmra.mrb[20].mxu1 %v3916_v21  ;;  %v3661_v21 = vld [vmem:[%s7767_s16 + $0x10] sm:$0xff] }
 0x5f8   :  { %v3650_v34 = vpop.f32.mrb[20].mxu0 }
 0x5f9   :  { %v3652_v10 = vpop.f32.mrb[21].mxu0  ;;  %v3651_v63 = vadd.f32 %v3650_v34, %v3449_v55 }
 0x5fa   :  { %v3654_v62 = vpop.f32.mrb[22].mxu0  ;;  %v3653_v52 = vadd.f32 %v3652_v10, %v3453_v39 }
 0x5fb   :  { %v3655_v36 = vadd.f32 %v3654_v62, %v3449_v55  ;;  %v3656_v27 = vpop.f32.mrb[23].mxu0 }
 0x5fc   :  { %v3657_v33 = vadd.f32 %v3656_v27, %v3453_v39 }
 0x5fd   :  { %v5189_v49 = vpack.c.bf16 %v3655_v36, %v3651_v63 }
 0x5fe   :  { %v5187_v37 = vpack.c.bf16 %v3657_v33, %v3653_v52 }
 0x600   :  { %5188 = vmatprep.subr.bf16.mxu0 %v5187_v37 }
 0x601   :  { %5190 = vmatpush1.bf16.msra.mxu0 %v5189_v49 }
 0x604   :  { %5083 = vmatmul.mubr.msk.f32.vlgmr.msra.gmra.mrb[24].mxu0 %vm3663_vm11, %v3659_v43 }
 0x605   :  { %3746 = vmatprep.mubr.f32.mxu0 %v6224_v22 }
 0x608   :  { %5084 = vmatmul.mubr.msk.f32.gmra.mrb[26].mxu0 %vm3663_vm11, %v3660_v6 }
 0x609   :  { %3752 = vmatprep.mubr.f32.mxu0 %v6224_v22 }
 0x60c   :  { %5085 = vmatmul.mubr.msk.f32.gmra.mrb[28].mxu0 %vm3663_vm11, %v3661_v21 }
 0x60d   :  { %3758 = vmatprep.mubr.f32.mxu0 %v6224_v22 }
 0x610   :  { %5086 = vmatmul.mubr.msk.f32.gmra.mrb[30].mxu0 %vm3663_vm11, %v3662_v23 }
 0x687   :  { %v4626_v32 = vpop.f32.mrb[20].mxu1 }
 0x688   :  { %v5223_v2 = vadd.f32 %v4626_v32, %v4019_v51  ;;  %v4628_v3 = vpop.f32.mrb[21].mxu1 }
 0x689   :  { %v5224_v5 = vadd.f32 %v4628_v3, %v4023_v24  ;;  %v4630_v14 = vpop.f32.mrb[22].mxu1 }
 0x68a   :  { %v4635_v29 = vadd.f32 %v5223_v2, %v3406_v50  ;;  %v5225_v25 = vadd.f32 %v4630_v14, %v4019_v51  ;;  %v4632_v22 = vpop.f32.mrb[23].mxu1 }
 0x68b   :  { %v4636_v31 = vadd.f32 %v5224_v5, %v3407_v42  ;;  %v5226_v56 = vadd.f32 %v4632_v22, %v4023_v24 }
 0x68c   :  { %v4639_v61 = vmax.f32 %v4635_v29, 0.0  ;;  %v4637_v9 = vadd.f32 %v5225_v25, %v3408_v41 }
 0x68d   :  { %v4640_v0 = vmax.f32 %v4636_v31, 0.0  ;;  %v4638_v12 = vadd.f32 %v5226_v56, %v3409_v38 }
 0x68e   :  { %4643 = vst [vmem:[%s7769_s18] sm:$0xff] %v4639_v61  ;;  %v4641_v35 = vmax.f32 %v4637_v9, 0.0 }
 0x68f   :  { %4644 = vst [vmem:[%s7769_s18 + $0x8] sm:$0xff] %v4640_v0  ;;  %v4642_v57 = vmax.f32 %v4638_v12, 0.0 }
 0x690   :  { %4645 = vst [vmem:[%s7769_s18 + $0x10] sm:$0xff] %v4641_v35 }
 0x691   :  { %4646 = vst [vmem:[%s7769_s18 + $0x18] sm:$0xff] %v4642_v57 }
 0x6d7   :  { %v3742_v60 = vpop.f32.mrb[24].mxu0 }
 0x6d8   :  { %v3765_v4 = vadd.f32 %v3742_v60, %v1892_v53  ;;  %v3744_v41 = vpop.f32.mrb[25].mxu0 }
 0x6d9   :  { %v3766_v42 = vadd.f32 %v3744_v41, %v1893_v45 }
 0x6da   :  { %v3773_v38 = vmax.f32 %v3765_v4, 0.0 }
 0x6db   :  { %v3774_v50 = vmax.f32 %v3766_v42, 0.0  ;;  %v3748_v48 = vpop.f32.mrb[26].mxu0 }
 0x6dc   :  { %3781 = vst [vmem:[%s7768_s17] sm:$0xff] %v3773_v38  ;;  %v3767_v19 = vadd.f32 %v3748_v48, %v1894_v30  ;;  %v3750_v46 = vpop.f32.mrb[27].mxu0 }
 0x6dd   :  { %3782 = vst [vmem:[%s7768_s17 + $0x8] sm:$0xff] %v3774_v50  ;;  %v3768_v1 = vadd.f32 %v3750_v46, %v1895_v47 }
 0x6de   :  { %v3775_v13 = vmax.f32 %v3767_v19, 0.0 }
 0x6df   :  { %v3776_v45 = vmax.f32 %v3768_v1, 0.0  ;;  %v3754_v53 = vpop.f32.mrb[28].mxu0 }
 0x6e0   :  { %3783 = vst [vmem:[%s7768_s17 + $0x10] sm:$0xff] %v3775_v13  ;;  %v3769_v15 = vadd.f32 %v3754_v53, %v1896_v59  ;;  %v3756_v7 = vpop.f32.mrb[29].mxu0 }
 0x6e1   :  { %3784 = vst [vmem:[%s7768_s17 + $0x18] sm:$0xff] %v3776_v45  ;;  %v3770_v30 = vadd.f32 %v3756_v7, %v1897_v44 }
 0x6e2   :  { %v3777_v28 = vmax.f32 %v3769_v15, 0.0 }
 0x6e3   :  { %v3778_v47 = vmax.f32 %v3770_v30, 0.0  ;;  %v3760_v16 = vpop.f32.mrb[30].mxu0 }
 0x6e4   :  { %3785 = vst [vmem:[%s7768_s17 + $0x20] sm:$0xff] %v3777_v28  ;;  %v3771_v54 = vadd.f32 %v3760_v16, %v1898_v17  ;;  %v3762_v26 = vpop.f32.mrb[31].mxu0 }
 0x6e5   :  { %3786 = vst [vmem:[%s7768_s17 + $0x28] sm:$0xff] %v3778_v47  ;;  %v3772_v59 = vadd.f32 %v3762_v26, %v1899_v20 }
 0x6e6   :  { %v3779_v11 = vmax.f32 %v3771_v54, 0.0 }
 0x6e7   :  { %v3780_v44 = vmax.f32 %v3772_v59, 0.0 }
 0x6e8   :  { %3787 = vst [vmem:[%s7768_s17 + $0x30] sm:$0xff] %v3779_v11 }
 0x6e9   :  { %3788 = vst [vmem:[%s7768_s17 + $0x38] sm:$0xff] %v3780_v44 }
 0x6ea   :  { %4655 = vsyncpa [#allocation3], 1 }
 0x6eb   :  { %4656 = vsyncpa [#allocation5], 1 }
 0x6ec   :  { %4657 = vsyncpa [#allocation8], 1 }
 0x6ed   :  { %4658 = vsyncpa [#allocation11], 1 }

</bundles_post_ra>
